<compile_context>
chip_gen: v7x
topology: tpu7x:2x2x1
jax: 0.10.0
libtpu: 0.0.40
codegen_flags: <defaults>
</compile_context>

<pallas_src>
import functools

import jax
import jax.numpy as jnp
import numpy as np
from jax.experimental import pallas as pl
from jax.experimental.pallas import tpu as pltpu


def _sigmoid(x):
    # Same formula in kernel and reference → bitwise-comparable math path.
    return 1.0 / (1.0 + jnp.exp(-x))


def bilstm_kernel(x_ref, wih_f_ref, whh_f_ref, b_f_ref,
                  wih_b_ref, whh_b_ref, b_b_ref,
                  out_ref, hn_ref, cn_ref,
                  xg_f_ref, xg_b_ref,
                  *, seq_len, batch, hidden):
    S, B, H = seq_len, batch, hidden

    x = x_ref[...]                                               # (S*B, F) f32

    # Batched input projections: one big MXU matmul per direction covering
    # every time step at once (instead of S tiny per-step matmuls).
    xg_f_ref[...] = jnp.dot(x, wih_f_ref[...],
                            preferred_element_type=jnp.float32) + b_f_ref[...]
    xg_b_ref[...] = jnp.dot(x, wih_b_ref[...],
                            preferred_element_type=jnp.float32) + b_b_ref[...]

    whh_f = whh_f_ref[...]                                       # (H, 4H)
    whh_b = whh_b_ref[...]                                       # (H, 4H)

    def cell(gates, c_prev):
        # PyTorch gate order: i, f, g, o
        i = _sigmoid(gates[:, 0 * H:1 * H])
        f = _sigmoid(gates[:, 1 * H:2 * H])
        g = jnp.tanh(gates[:, 2 * H:3 * H])
        o = _sigmoid(gates[:, 3 * H:4 * H])
        c = f * c_prev + i * g
        h = o * jnp.tanh(c)
        return h, c

    h_f = jnp.zeros((B, H), jnp.float32)
    c_f = jnp.zeros((B, H), jnp.float32)
    h_b = jnp.zeros((B, H), jnp.float32)
    c_b = jnp.zeros((B, H), jnp.float32)

    # S is small & static: unroll the recurrence at trace time so every slice
    # index is static (no dynamic-slice lowering, full LLO visibility).
    for t in range(S):
        # ---- forward direction: time index t
        gates_f = xg_f_ref[pl.ds(t * B, B), :] + jnp.dot(
            h_f, whh_f, preferred_element_type=jnp.float32)      # (B, 4H)
        h_f, c_f = cell(gates_f, c_f)
        out_ref[pl.ds(t * B, B), pl.ds(0, H)] = h_f

        # ---- backward direction: time index S-1-t
        tb = S - 1 - t
        gates_b = xg_b_ref[pl.ds(tb * B, B), :] + jnp.dot(
            h_b, whh_b, preferred_element_type=jnp.float32)      # (B, 4H)
        h_b, c_b = cell(gates_b, c_b)
        out_ref[pl.ds(tb * B, B), pl.ds(H, H)] = h_b

    # Final states, direction-major like PyTorch h_n/c_n (2, B, H) flattened.
    hn_ref[pl.ds(0, B), :] = h_f
    hn_ref[pl.ds(B, B), :] = h_b
    cn_ref[pl.ds(0, B), :] = c_f
    cn_ref[pl.ds(B, B), :] = c_b


def bilstm_forward(x, w_ih_f, w_hh_f, b_ih_f, b_hh_f,
                   w_ih_b, w_hh_b, b_ih_b, b_hh_b):
    """Single-layer bidirectional LSTM, batch_first, zero initial state.
       x: (B, S, F); PyTorch-layout weights (4H, F) / (4H, H) / (4H,).
       Returns y (B, S, 2H), h_n (2, B, H), c_n (2, B, H)."""
    B, S, F = x.shape
    H = w_hh_f.shape[1]

    # Time-major, batch-on-sublanes layout for the kernel (wrapper-side XLA
    # transpose; keeps the kernel free of in-kernel transposes).
    x_tm = jnp.transpose(x, (1, 0, 2)).reshape(S * B, F).astype(jnp.float32)

    # Pre-transpose weights / fuse the two bias vectors once, outside kernel.
    wih_f_t = w_ih_f.T                      # (F, 4H)
    whh_f_t = w_hh_f.T                      # (H, 4H)
    b_f = (b_ih_f + b_hh_f).reshape(1, 4 * H)
    wih_b_t = w_ih_b.T
    whh_b_t = w_hh_b.T
    b_b = (b_ih_b + b_hh_b).reshape(1, 4 * H)

    # This kernel is overhead / bandwidth bound at these sizes; tell XLA.
    flops = 2 * 2 * (S * B) * F * (4 * H) + 2 * 2 * S * B * H * (4 * H)
    transcendentals = 2 * S * B * 5 * H
    bytes_accessed = 4 * (S * B * F
                          + 2 * (F * 4 * H + H * 4 * H + 4 * H)
                          + S * B * 2 * H + 2 * 2 * B * H)

    kernel = functools.partial(bilstm_kernel, seq_len=S, batch=B, hidden=H)

    out, h_n, c_n = pl.pallas_call(
        kernel,
        out_shape=(
            jax.ShapeDtypeStruct((S * B, 2 * H), jnp.float32),   # y (time-major)
            jax.ShapeDtypeStruct((2 * B, H), jnp.float32),       # h_n
            jax.ShapeDtypeStruct((2 * B, H), jnp.float32),       # c_n
        ),
        grid_spec=pltpu.PrefetchScalarGridSpec(
            num_scalar_prefetch=0,
            grid=(1,),
            in_specs=[
                pl.BlockSpec((S * B, F), lambda i: (0, 0)),       # x, time-major
                pl.BlockSpec((F, 4 * H), lambda i: (0, 0)),       # W_ih fwd^T
                pl.BlockSpec((H, 4 * H), lambda i: (0, 0)),       # W_hh fwd^T
                pl.BlockSpec((1, 4 * H), lambda i: (0, 0)),       # bias fwd
                pl.BlockSpec((F, 4 * H), lambda i: (0, 0)),       # W_ih bwd^T
                pl.BlockSpec((H, 4 * H), lambda i: (0, 0)),       # W_hh bwd^T
                pl.BlockSpec((1, 4 * H), lambda i: (0, 0)),       # bias bwd
            ],
            out_specs=(
                pl.BlockSpec((S * B, 2 * H), lambda i: (0, 0)),
                pl.BlockSpec((2 * B, H), lambda i: (0, 0)),
                pl.BlockSpec((2 * B, H), lambda i: (0, 0)),
            ),
            scratch_shapes=[
                pltpu.VMEM((S * B, 4 * H), jnp.float32),   # precomputed x-gates fwd
                pltpu.VMEM((S * B, 4 * H), jnp.float32),   # precomputed x-gates bwd
            ],
        ),
        compiler_params=pltpu.CompilerParams(
            dimension_semantics=("arbitrary",)),
        cost_estimate=pl.CostEstimate(
            flops=flops, transcendentals=transcendentals,
            bytes_accessed=bytes_accessed),
    )(x_tm, wih_f_t, whh_f_t, b_f, wih_b_t, whh_b_t, b_b)

    y = out.reshape(S, B, 2 * H).transpose(1, 0, 2)               # (B, S, 2H)
    return y, h_n.reshape(2, B, H), c_n.reshape(2, B, H)


def lstm_layer_forward(x, params):
    """Mirrors LSTM_Layer.forward: returns the sequence output plus the
       h_n / c_n the module stashes (h_n already .view'ed to (B, 2H))."""
    y, h_n, c_n = bilstm_forward(x, *params)
    h_n_view = h_n.reshape(x.shape[0], y.shape[-1])   # == h_n.view(B, 2H)
    return y, h_n_view, c_n


def reference_bilstm(x, w_ih_f, w_hh_f, b_ih_f, b_hh_f,
                     w_ih_b, w_hh_b, b_ih_b, b_hh_b):
    """Pure-JAX transcription of a 1-layer bidirectional batch_first LSTM."""
    B, S, F = x.shape
    H = w_hh_f.shape[1]

    def cell(x_t, h, c, w_ih, w_hh, b):
        gates = x_t @ w_ih.T + b + h @ w_hh.T
        i = _sigmoid(gates[:, 0 * H:1 * H])
        f = _sigmoid(gates[:, 1 * H:2 * H])
        g = jnp.tanh(gates[:, 2 * H:3 * H])
        o = _sigmoid(gates[:, 3 * H:4 * H])
        c = f * c + i * g
        h = o * jnp.tanh(c)
        return h, c

    b_f = b_ih_f + b_hh_f
    b_b = b_ih_b + b_hh_b
    h_f = c_f = jnp.zeros((B, H), jnp.float32)
    h_b = c_b = jnp.zeros((B, H), jnp.float32)
    outs_f = []
    outs_b = [None] * S
    for t in range(S):
        h_f, c_f = cell(x[:, t], h_f, c_f, w_ih_f, w_hh_f, b_f)
        outs_f.append(h_f)
    for t in range(S - 1, -1, -1):
        h_b, c_b = cell(x[:, t], h_b, c_b, w_ih_b, w_hh_b, b_b)
        outs_b[t] = h_b
    y = jnp.concatenate(
        [jnp.stack(outs_f, axis=1), jnp.stack(outs_b, axis=1)], axis=-1)
    h_n = jnp.stack([h_f, h_b], axis=0)
    c_n = jnp.stack([c_f, c_b], axis=0)
    return y, h_n, c_n


if __name__ == "__main__":
    # parameters = {'LSTM_hidden_size': 64, 'LSTM_layers': 1, 'LSTM_dropout': 0}
    # previous_layer.outputDimensions = 64
    B, S, F, H = 8, 16, 64, 64

    key = jax.random.PRNGKey(0)
    keys = jax.random.split(key, 9)
    bnd = 1.0 / np.sqrt(H)

    x = jax.random.normal(keys[0], (B, S, F), dtype=jnp.float32)
    w_ih_f = jax.random.uniform(keys[1], (4 * H, F), jnp.float32, -bnd, bnd)
    w_hh_f = jax.random.uniform(keys[2], (4 * H, H), jnp.float32, -bnd, bnd)
    b_ih_f = jax.random.uniform(keys[3], (4 * H,), jnp.float32, -bnd, bnd)
    b_hh_f = jax.random.uniform(keys[4], (4 * H,), jnp.float32, -bnd, bnd)
    w_ih_b = jax.random.uniform(keys[5], (4 * H, F), jnp.float32, -bnd, bnd)
    w_hh_b = jax.random.uniform(keys[6], (4 * H, H), jnp.float32, -bnd, bnd)
    b_ih_b = jax.random.uniform(keys[7], (4 * H,), jnp.float32, -bnd, bnd)
    b_hh_b = jax.random.uniform(keys[8], (4 * H,), jnp.float32, -bnd, bnd)

    params = (w_ih_f, w_hh_f, b_ih_f, b_hh_f,
              w_ih_b, w_hh_b, b_ih_b, b_hh_b)

    y, h_n_view, c_n = lstm_layer_forward(x, params)
    y = jax.block_until_ready(y)

    y_ref, h_n_ref, c_n_ref = reference_bilstm(x, *params)
    np.testing.assert_allclose(np.asarray(y), np.asarray(y_ref),
                               rtol=1e-4, atol=1e-4)
    np.testing.assert_allclose(np.asarray(h_n_view),
                               np.asarray(h_n_ref.reshape(B, 2 * H)),
                               rtol=1e-4, atol=1e-4)
    np.testing.assert_allclose(np.asarray(c_n), np.asarray(c_n_ref),
                               rtol=1e-4, atol=1e-4)

    print("KERNEL_OK")
</pallas_src>

<mosaic_0001>
module attributes {stable_mosaic.version = 11 : i64} {
  func.func @bilstm_kernel(%arg0: i32, %arg1: memref<128x64xf32, #tpu.memory_space<vmem>>, %arg2: memref<64x256xf32, #tpu.memory_space<vmem>>, %arg3: memref<64x256xf32, #tpu.memory_space<vmem>>, %arg4: memref<1x256xf32, #tpu.memory_space<vmem>>, %arg5: memref<64x256xf32, #tpu.memory_space<vmem>>, %arg6: memref<64x256xf32, #tpu.memory_space<vmem>>, %arg7: memref<1x256xf32, #tpu.memory_space<vmem>>, %arg8: memref<128x128xf32, #tpu.memory_space<vmem>>, %arg9: memref<16x64xf32, #tpu.memory_space<vmem>>, %arg10: memref<16x64xf32, #tpu.memory_space<vmem>>, %arg11: memref<128x256xf32, #tpu.memory_space<vmem>>, %arg12: memref<128x256xf32, #tpu.memory_space<vmem>>) attributes {dimension_semantics = [#tpu.dimension_semantics<arbitrary>], iteration_bounds = array<i64: 1>, scalar_prefetch = 0 : i64, scratch_operands = 2 : i64, tpu.core_type = #tpu.core_type<tc>, window_params = [{pipeline_mode = #tpu.pipeline_mode<synchronous>, transform_indices = @transform_0, window_bounds = array<i64: 128, 64>}, {pipeline_mode = #tpu.pipeline_mode<synchronous>, transform_indices = @transform_1, window_bounds = array<i64: 64, 256>}, {pipeline_mode = #tpu.pipeline_mode<synchronous>, transform_indices = @transform_2, window_bounds = array<i64: 64, 256>}, {pipeline_mode = #tpu.pipeline_mode<synchronous>, transform_indices = @transform_3, window_bounds = array<i64: 1, 256>}, {pipeline_mode = #tpu.pipeline_mode<synchronous>, transform_indices = @transform_4, window_bounds = array<i64: 64, 256>}, {pipeline_mode = #tpu.pipeline_mode<synchronous>, transform_indices = @transform_5, window_bounds = array<i64: 64, 256>}, {pipeline_mode = #tpu.pipeline_mode<synchronous>, transform_indices = @transform_6, window_bounds = array<i64: 1, 256>}, {pipeline_mode = #tpu.pipeline_mode<synchronous>, transform_indices = @transform_7, window_bounds = array<i64: 128, 128>}, {pipeline_mode = #tpu.pipeline_mode<synchronous>, transform_indices = @transform_8, window_bounds = array<i64: 16, 64>}, {pipeline_mode = #tpu.pipeline_mode<synchronous>, transform_indices = @transform_9, window_bounds = array<i64: 16, 64>}]} {
    %c0 = arith.constant 0 : index
    %c0_0 = arith.constant 0 : index
    %0 = vector.load %arg1[%c0, %c0_0] : memref<128x64xf32, #tpu.memory_space<vmem>>, vector<128x64xf32>
    %c0_1 = arith.constant 0 : index
    %c0_2 = arith.constant 0 : index
    %1 = vector.load %arg2[%c0_1, %c0_2] : memref<64x256xf32, #tpu.memory_space<vmem>>, vector<64x256xf32>
    %cst = arith.constant dense<0.000000e+00> : vector<128x256xf32>
    %2 = tpu.matmul %0, %1, %cst {dimension_numbers = #tpu.dot_dimension_numbers<[1], [0], [0], [1], [0, 0, 1, 1], [], []>} : vector<128x64xf32>, vector<64x256xf32>, vector<128x256xf32> -> vector<128x256xf32>
    %c0_3 = arith.constant 0 : index
    %c0_4 = arith.constant 0 : index
    %3 = vector.load %arg4[%c0_3, %c0_4] : memref<1x256xf32, #tpu.memory_space<vmem>>, vector<1x256xf32>
    %4 = vector.broadcast %3 : vector<1x256xf32> to vector<128x256xf32>
    %5 = arith.addf %2, %4 : vector<128x256xf32>
    %c0_5 = arith.constant 0 : index
    %c0_6 = arith.constant 0 : index
    %6 = vector.load %arg11[%c0_5, %c0_6] : memref<128x256xf32, #tpu.memory_space<vmem>>, vector<128x256xf32>
    tpu.vector_store %arg11[%c0_5, %c0_6], %5 {strides = array<i32>} : memref<128x256xf32, #tpu.memory_space<vmem>>, vector<128x256xf32>,
    %c0_7 = arith.constant 0 : index
    %c0_8 = arith.constant 0 : index
    %7 = vector.load %arg5[%c0_7, %c0_8] : memref<64x256xf32, #tpu.memory_space<vmem>>, vector<64x256xf32>
    %cst_9 = arith.constant dense<0.000000e+00> : vector<128x256xf32>
    %8 = tpu.matmul %0, %7, %cst_9 {dimension_numbers = #tpu.dot_dimension_numbers<[1], [0], [0], [1], [0, 0, 1, 1], [], []>} : vector<128x64xf32>, vector<64x256xf32>, vector<128x256xf32> -> vector<128x256xf32>
    %c0_10 = arith.constant 0 : index
    %c0_11 = arith.constant 0 : index
    %9 = vector.load %arg7[%c0_10, %c0_11] : memref<1x256xf32, #tpu.memory_space<vmem>>, vector<1x256xf32>
    %10 = vector.broadcast %9 : vector<1x256xf32> to vector<128x256xf32>
    %11 = arith.addf %8, %10 : vector<128x256xf32>
    %c0_12 = arith.constant 0 : index
    %c0_13 = arith.constant 0 : index
    %12 = vector.load %arg12[%c0_12, %c0_13] : memref<128x256xf32, #tpu.memory_space<vmem>>, vector<128x256xf32>
    tpu.vector_store %arg12[%c0_12, %c0_13], %11 {strides = array<i32>} : memref<128x256xf32, #tpu.memory_space<vmem>>, vector<128x256xf32>,
    %c0_14 = arith.constant 0 : index
    %c0_15 = arith.constant 0 : index
    %13 = vector.load %arg3[%c0_14, %c0_15] : memref<64x256xf32, #tpu.memory_space<vmem>>, vector<64x256xf32>
    %c0_16 = arith.constant 0 : index
    %c0_17 = arith.constant 0 : index
    %14 = vector.load %arg6[%c0_16, %c0_17] : memref<64x256xf32, #tpu.memory_space<vmem>>, vector<64x256xf32>
    %cst_18 = arith.constant 0.000000e+00 : f32
    %15 = vector.broadcast %cst_18 : f32 to vector<8x64xf32>
    %cst_19 = arith.constant 0.000000e+00 : f32
    %16 = vector.broadcast %cst_19 : f32 to vector<8x64xf32>
    %cst_20 = arith.constant 0.000000e+00 : f32
    %17 = vector.broadcast %cst_20 : f32 to vector<8x64xf32>
    %cst_21 = arith.constant 0.000000e+00 : f32
    %18 = vector.broadcast %cst_21 : f32 to vector<8x64xf32>
    %c0_22 = arith.constant 0 : index
    %c0_23 = arith.constant 0 : index
    %19 = vector.load %arg11[%c0_22, %c0_23] : memref<128x256xf32, #tpu.memory_space<vmem>>, vector<8x256xf32>
    %cst_24 = arith.constant dense<0.000000e+00> : vector<8x256xf32>
    %20 = tpu.matmul %15, %13, %cst_24 {dimension_numbers = #tpu.dot_dimension_numbers<[1], [0], [0], [1], [0, 0, 1, 1], [], []>} : vector<8x64xf32>, vector<64x256xf32>, vector<8x256xf32> -> vector<8x256xf32>
    %21 = arith.addf %19, %20 : vector<8x256xf32>
    %22 = vector.extract_strided_slice %21 {offsets = [0, 0], sizes = [8, 64], strides = [1, 1]} : vector<8x256xf32> to vector<8x64xf32>
    %cst_25 = arith.constant 0.000000e+00 : f32
    %23 = vector.broadcast %cst_25 : f32 to vector<8x64xf32>
    %24 = arith.subf %23, %22 : vector<8x64xf32>
    %25 = math.exp %24 : vector<8x64xf32>
    %cst_26 = arith.constant 1.000000e+00 : f32
    %26 = vector.broadcast %cst_26 : f32 to vector<8x64xf32>
    %27 = arith.addf %26, %25 : vector<8x64xf32>
    %cst_27 = arith.constant 1.000000e+00 : f32
    %28 = vector.broadcast %cst_27 : f32 to vector<8x64xf32>
    %29 = arith.divf %28, %27 : vector<8x64xf32>
    %30 = vector.extract_strided_slice %21 {offsets = [0, 64], sizes = [8, 64], strides = [1, 1]} : vector<8x256xf32> to vector<8x64xf32>
    %cst_28 = arith.constant 0.000000e+00 : f32
    %31 = vector.broadcast %cst_28 : f32 to vector<8x64xf32>
    %32 = arith.subf %31, %30 : vector<8x64xf32>
    %33 = math.exp %32 : vector<8x64xf32>
    %cst_29 = arith.constant 1.000000e+00 : f32
    %34 = vector.broadcast %cst_29 : f32 to vector<8x64xf32>
    %35 = arith.addf %34, %33 : vector<8x64xf32>
    %cst_30 = arith.constant 1.000000e+00 : f32
    %36 = vector.broadcast %cst_30 : f32 to vector<8x64xf32>
    %37 = arith.divf %36, %35 : vector<8x64xf32>
    %38 = vector.extract_strided_slice %21 {offsets = [0, 128], sizes = [8, 64], strides = [1, 1]} : vector<8x256xf32> to vector<8x64xf32>
    %39 = math.tanh %38 : vector<8x64xf32>
    %40 = vector.extract_strided_slice %21 {offsets = [0, 192], sizes = [8, 64], strides = [1, 1]} : vector<8x256xf32> to vector<8x64xf32>
    %cst_31 = arith.constant 0.000000e+00 : f32
    %41 = vector.broadcast %cst_31 : f32 to vector<8x64xf32>
    %42 = arith.subf %41, %40 : vector<8x64xf32>
    %43 = math.exp %42 : vector<8x64xf32>
    %cst_32 = arith.constant 1.000000e+00 : f32
    %44 = vector.broadcast %cst_32 : f32 to vector<8x64xf32>
    %45 = arith.addf %44, %43 : vector<8x64xf32>
    %cst_33 = arith.constant 1.000000e+00 : f32
    %46 = vector.broadcast %cst_33 : f32 to vector<8x64xf32>
    %47 = arith.divf %46, %45 : vector<8x64xf32>
    %48 = arith.mulf %37, %16 : vector<8x64xf32>
    %49 = arith.mulf %29, %39 : vector<8x64xf32>
    %50 = arith.addf %48, %49 : vector<8x64xf32>
    %51 = math.tanh %50 : vector<8x64xf32>
    %52 = arith.mulf %47, %51 : vector<8x64xf32>
    %c0_34 = arith.constant 0 : index
    %c0_35 = arith.constant 0 : index
    %53 = vector.load %arg8[%c0_34, %c0_35] : memref<128x128xf32, #tpu.memory_space<vmem>>, vector<8x64xf32>
    tpu.vector_store %arg8[%c0_34, %c0_35], %52 {strides = array<i32>} : memref<128x128xf32, #tpu.memory_space<vmem>>, vector<8x64xf32>,
    %c120 = arith.constant 120 : index
    %c0_36 = arith.constant 0 : index
    %54 = vector.load %arg12[%c120, %c0_36] : memref<128x256xf32, #tpu.memory_space<vmem>>, vector<8x256xf32>
    %cst_37 = arith.constant dense<0.000000e+00> : vector<8x256xf32>
    %55 = tpu.matmul %17, %14, %cst_37 {dimension_numbers = #tpu.dot_dimension_numbers<[1], [0], [0], [1], [0, 0, 1, 1], [], []>} : vector<8x64xf32>, vector<64x256xf32>, vector<8x256xf32> -> vector<8x256xf32>
    %56 = arith.addf %54, %55 : vector<8x256xf32>
    %57 = vector.extract_strided_slice %56 {offsets = [0, 0], sizes = [8, 64], strides = [1, 1]} : vector<8x256xf32> to vector<8x64xf32>
    %cst_38 = arith.constant 0.000000e+00 : f32
    %58 = vector.broadcast %cst_38 : f32 to vector<8x64xf32>
    %59 = arith.subf %58, %57 : vector<8x64xf32>
    %60 = math.exp %59 : vector<8x64xf32>
    %cst_39 = arith.constant 1.000000e+00 : f32
    %61 = vector.broadcast %cst_39 : f32 to vector<8x64xf32>
    %62 = arith.addf %61, %60 : vector<8x64xf32>
    %cst_40 = arith.constant 1.000000e+00 : f32
    %63 = vector.broadcast %cst_40 : f32 to vector<8x64xf32>
    %64 = arith.divf %63, %62 : vector<8x64xf32>
    %65 = vector.extract_strided_slice %56 {offsets = [0, 64], sizes = [8, 64], strides = [1, 1]} : vector<8x256xf32> to vector<8x64xf32>
    %cst_41 = arith.constant 0.000000e+00 : f32
    %66 = vector.broadcast %cst_41 : f32 to vector<8x64xf32>
    %67 = arith.subf %66, %65 : vector<8x64xf32>
    %68 = math.exp %67 : vector<8x64xf32>
    %cst_42 = arith.constant 1.000000e+00 : f32
    %69 = vector.broadcast %cst_42 : f32 to vector<8x64xf32>
    %70 = arith.addf %69, %68 : vector<8x64xf32>
    %cst_43 = arith.constant 1.000000e+00 : f32
    %71 = vector.broadcast %cst_43 : f32 to vector<8x64xf32>
    %72 = arith.divf %71, %70 : vector<8x64xf32>
    %73 = vector.extract_strided_slice %56 {offsets = [0, 128], sizes = [8, 64], strides = [1, 1]} : vector<8x256xf32> to vector<8x64xf32>
    %74 = math.tanh %73 : vector<8x64xf32>
    %75 = vector.extract_strided_slice %56 {offsets = [0, 192], sizes = [8, 64], strides = [1, 1]} : vector<8x256xf32> to vector<8x64xf32>
    %cst_44 = arith.constant 0.000000e+00 : f32
    %76 = vector.broadcast %cst_44 : f32 to vector<8x64xf32>
    %77 = arith.subf %76, %75 : vector<8x64xf32>
    %78 = math.exp %77 : vector<8x64xf32>
    %cst_45 = arith.constant 1.000000e+00 : f32
    %79 = vector.broadcast %cst_45 : f32 to vector<8x64xf32>
    %80 = arith.addf %79, %78 : vector<8x64xf32>
    %cst_46 = arith.constant 1.000000e+00 : f32
    %81 = vector.broadcast %cst_46 : f32 to vector<8x64xf32>
    %82 = arith.divf %81, %80 : vector<8x64xf32>
    %83 = arith.mulf %72, %18 : vector<8x64xf32>
    %84 = arith.mulf %64, %74 : vector<8x64xf32>
    %85 = arith.addf %83, %84 : vector<8x64xf32>
    %86 = math.tanh %85 : vector<8x64xf32>
    %87 = arith.mulf %82, %86 : vector<8x64xf32>
    %c120_47 = arith.constant 120 : index
    %c64 = arith.constant 64 : index
    %88 = vector.load %arg8[%c120_47, %c64] : memref<128x128xf32, #tpu.memory_space<vmem>>, vector<8x64xf32>
    tpu.vector_store %arg8[%c120_47, %c64], %87 {strides = array<i32>} : memref<128x128xf32, #tpu.memory_space<vmem>>, vector<8x64xf32>,
    %c8 = arith.constant 8 : index
    %c0_48 = arith.constant 0 : index
    %89 = vector.load %arg11[%c8, %c0_48] : memref<128x256xf32, #tpu.memory_space<vmem>>, vector<8x256xf32>
    %cst_49 = arith.constant dense<0.000000e+00> : vector<8x256xf32>
    %90 = tpu.matmul %52, %13, %cst_49 {dimension_numbers = #tpu.dot_dimension_numbers<[1], [0], [0], [1], [0, 0, 1, 1], [], []>} : vector<8x64xf32>, vector<64x256xf32>, vector<8x256xf32> -> vector<8x256xf32>
    %91 = arith.addf %89, %90 : vector<8x256xf32>
    %92 = vector.extract_strided_slice %91 {offsets = [0, 0], sizes = [8, 64], strides = [1, 1]} : vector<8x256xf32> to vector<8x64xf32>
    %cst_50 = arith.constant 0.000000e+00 : f32
    %93 = vector.broadcast %cst_50 : f32 to vector<8x64xf32>
    %94 = arith.subf %93, %92 : vector<8x64xf32>
    %95 = math.exp %94 : vector<8x64xf32>
    %cst_51 = arith.constant 1.000000e+00 : f32
    %96 = vector.broadcast %cst_51 : f32 to vector<8x64xf32>
    %97 = arith.addf %96, %95 : vector<8x64xf32>
    %cst_52 = arith.constant 1.000000e+00 : f32
    %98 = vector.broadcast %cst_52 : f32 to vector<8x64xf32>
    %99 = arith.divf %98, %97 : vector<8x64xf32>
    %100 = vector.extract_strided_slice %91 {offsets = [0, 64], sizes = [8, 64], strides = [1, 1]} : vector<8x256xf32> to vector<8x64xf32>
    %cst_53 = arith.constant 0.000000e+00 : f32
    %101 = vector.broadcast %cst_53 : f32 to vector<8x64xf32>
    %102 = arith.subf %101, %100 : vector<8x64xf32>
    %103 = math.exp %102 : vector<8x64xf32>
    %cst_54 = arith.constant 1.000000e+00 : f32
    %104 = vector.broadcast %cst_54 : f32 to vector<8x64xf32>
    %105 = arith.addf %104, %103 : vector<8x64xf32>
    %cst_55 = arith.constant 1.000000e+00 : f32
    %106 = vector.broadcast %cst_55 : f32 to vector<8x64xf32>
    %107 = arith.divf %106, %105 : vector<8x64xf32>
    %108 = vector.extract_strided_slice %91 {offsets = [0, 128], sizes = [8, 64], strides = [1, 1]} : vector<8x256xf32> to vector<8x64xf32>
    %109 = math.tanh %108 : vector<8x64xf32>
    %110 = vector.extract_strided_slice %91 {offsets = [0, 192], sizes = [8, 64], strides = [1, 1]} : vector<8x256xf32> to vector<8x64xf32>
    %cst_56 = arith.constant 0.000000e+00 : f32
    %111 = vector.broadcast %cst_56 : f32 to vector<8x64xf32>
    %112 = arith.subf %111, %110 : vector<8x64xf32>
    %113 = math.exp %112 : vector<8x64xf32>
    %cst_57 = arith.constant 1.000000e+00 : f32
    %114 = vector.broadcast %cst_57 : f32 to vector<8x64xf32>
    %115 = arith.addf %114, %113 : vector<8x64xf32>
    %cst_58 = arith.constant 1.000000e+00 : f32
    %116 = vector.broadcast %cst_58 : f32 to vector<8x64xf32>
    %117 = arith.divf %116, %115 : vector<8x64xf32>
    %118 = arith.mulf %107, %50 : vector<8x64xf32>
    %119 = arith.mulf %99, %109 : vector<8x64xf32>
    %120 = arith.addf %118, %119 : vector<8x64xf32>
    %121 = math.tanh %120 : vector<8x64xf32>
    %122 = arith.mulf %117, %121 : vector<8x64xf32>
    %c8_59 = arith.constant 8 : index
    %c0_60 = arith.constant 0 : index
    %123 = vector.load %arg8[%c8_59, %c0_60] : memref<128x128xf32, #tpu.memory_space<vmem>>, vector<8x64xf32>
    tpu.vector_store %arg8[%c8_59, %c0_60], %122 {strides = array<i32>} : memref<128x128xf32, #tpu.memory_space<vmem>>, vector<8x64xf32>,
    %c112 = arith.constant 112 : index
    %c0_61 = arith.constant 0 : index
    %124 = vector.load %arg12[%c112, %c0_61] : memref<128x256xf32, #tpu.memory_space<vmem>>, vector<8x256xf32>
    %cst_62 = arith.constant dense<0.000000e+00> : vector<8x256xf32>
    %125 = tpu.matmul %87, %14, %cst_62 {dimension_numbers = #tpu.dot_dimension_numbers<[1], [0], [0], [1], [0, 0, 1, 1], [], []>} : vector<8x64xf32>, vector<64x256xf32>, vector<8x256xf32> -> vector<8x256xf32>
    %126 = arith.addf %124, %125 : vector<8x256xf32>
    %127 = vector.extract_strided_slice %126 {offsets = [0, 0], sizes = [8, 64], strides = [1, 1]} : vector<8x256xf32> to vector<8x64xf32>
    %cst_63 = arith.constant 0.000000e+00 : f32
    %128 = vector.broadcast %cst_63 : f32 to vector<8x64xf32>
    %129 = arith.subf %128, %127 : vector<8x64xf32>
    %130 = math.exp %129 : vector<8x64xf32>
    %cst_64 = arith.constant 1.000000e+00 : f32
    %131 = vector.broadcast %cst_64 : f32 to vector<8x64xf32>
    %132 = arith.addf %131, %130 : vector<8x64xf32>
    %cst_65 = arith.constant 1.000000e+00 : f32
    %133 = vector.broadcast %cst_65 : f32 to vector<8x64xf32>
    %134 = arith.divf %133, %132 : vector<8x64xf32>
    %135 = vector.extract_strided_slice %126 {offsets = [0, 64], sizes = [8, 64], strides = [1, 1]} : vector<8x256xf32> to vector<8x64xf32>
    %cst_66 = arith.constant 0.000000e+00 : f32
    %136 = vector.broadcast %cst_66 : f32 to vector<8x64xf32>
    %137 = arith.subf %136, %135 : vector<8x64xf32>
    %138 = math.exp %137 : vector<8x64xf32>
    %cst_67 = arith.constant 1.000000e+00 : f32
    %139 = vector.broadcast %cst_67 : f32 to vector<8x64xf32>
    %140 = arith.addf %139, %138 : vector<8x64xf32>
    %cst_68 = arith.constant 1.000000e+00 : f32
    %141 = vector.broadcast %cst_68 : f32 to vector<8x64xf32>
    %142 = arith.divf %141, %140 : vector<8x64xf32>
    %143 = vector.extract_strided_slice %126 {offsets = [0, 128], sizes = [8, 64], strides = [1, 1]} : vector<8x256xf32> to vector<8x64xf32>
    %144 = math.tanh %143 : vector<8x64xf32>
    %145 = vector.extract_strided_slice %126 {offsets = [0, 192], sizes = [8, 64], strides = [1, 1]} : vector<8x256xf32> to vector<8x64xf32>
    %cst_69 = arith.constant 0.000000e+00 : f32
    %146 = vector.broadcast %cst_69 : f32 to vector<8x64xf32>
    %147 = arith.subf %146, %145 : vector<8x64xf32>
    %148 = math.exp %147 : vector<8x64xf32>
    %cst_70 = arith.constant 1.000000e+00 : f32
    %149 = vector.broadcast %cst_70 : f32 to vector<8x64xf32>
    %150 = arith.addf %149, %148 : vector<8x64xf32>
    %cst_71 = arith.constant 1.000000e+00 : f32
    %151 = vector.broadcast %cst_71 : f32 to vector<8x64xf32>
    %152 = arith.divf %151, %150 : vector<8x64xf32>
    %153 = arith.mulf %142, %85 : vector<8x64xf32>
    %154 = arith.mulf %134, %144 : vector<8x64xf32>
    %155 = arith.addf %153, %154 : vector<8x64xf32>
    %156 = math.tanh %155 : vector<8x64xf32>
    %157 = arith.mulf %152, %156 : vector<8x64xf32>
    %c112_72 = arith.constant 112 : index
    %c64_73 = arith.constant 64 : index
    %158 = vector.load %arg8[%c112_72, %c64_73] : memref<128x128xf32, #tpu.memory_space<vmem>>, vector<8x64xf32>
    tpu.vector_store %arg8[%c112_72, %c64_73], %157 {strides = array<i32>} : memref<128x128xf32, #tpu.memory_space<vmem>>, vector<8x64xf32>,
    %c16 = arith.constant 16 : index
    %c0_74 = arith.constant 0 : index
    %159 = vector.load %arg11[%c16, %c0_74] : memref<128x256xf32, #tpu.memory_space<vmem>>, vector<8x256xf32>
    %cst_75 = arith.constant dense<0.000000e+00> : vector<8x256xf32>
    %160 = tpu.matmul %122, %13, %cst_75 {dimension_numbers = #tpu.dot_dimension_numbers<[1], [0], [0], [1], [0, 0, 1, 1], [], []>} : vector<8x64xf32>, vector<64x256xf32>, vector<8x256xf32> -> vector<8x256xf32>
    %161 = arith.addf %159, %160 : vector<8x256xf32>
    %162 = vector.extract_strided_slice %161 {offsets = [0, 0], sizes = [8, 64], strides = [1, 1]} : vector<8x256xf32> to vector<8x64xf32>
    %cst_76 = arith.constant 0.000000e+00 : f32
    %163 = vector.broadcast %cst_76 : f32 to vector<8x64xf32>
    %164 = arith.subf %163, %162 : vector<8x64xf32>
    %165 = math.exp %164 : vector<8x64xf32>
    %cst_77 = arith.constant 1.000000e+00 : f32
    %166 = vector.broadcast %cst_77 : f32 to vector<8x64xf32>
    %167 = arith.addf %166, %165 : vector<8x64xf32>
    %cst_78 = arith.constant 1.000000e+00 : f32
    %168 = vector.broadcast %cst_78 : f32 to vector<8x64xf32>
    %169 = arith.divf %168, %167 : vector<8x64xf32>
    %170 = vector.extract_strided_slice %161 {offsets = [0, 64], sizes = [8, 64], strides = [1, 1]} : vector<8x256xf32> to vector<8x64xf32>
    %cst_79 = arith.constant 0.000000e+00 : f32
    %171 = vector.broadcast %cst_79 : f32 to vector<8x64xf32>
    %172 = arith.subf %171, %170 : vector<8x64xf32>
    %173 = math.exp %172 : vector<8x64xf32>
    %cst_80 = arith.constant 1.000000e+00 : f32
    %174 = vector.broadcast %cst_80 : f32 to vector<8x64xf32>
    %175 = arith.addf %174, %173 : vector<8x64xf32>
    %cst_81 = arith.constant 1.000000e+00 : f32
    %176 = vector.broadcast %cst_81 : f32 to vector<8x64xf32>
    %177 = arith.divf %176, %175 : vector<8x64xf32>
    %178 = vector.extract_strided_slice %161 {offsets = [0, 128], sizes = [8, 64], strides = [1, 1]} : vector<8x256xf32> to vector<8x64xf32>
    %179 = math.tanh %178 : vector<8x64xf32>
    %180 = vector.extract_strided_slice %161 {offsets = [0, 192], sizes = [8, 64], strides = [1, 1]} : vector<8x256xf32> to vector<8x64xf32>
    %cst_82 = arith.constant 0.000000e+00 : f32
    %181 = vector.broadcast %cst_82 : f32 to vector<8x64xf32>
    %182 = arith.subf %181, %180 : vector<8x64xf32>
    %183 = math.exp %182 : vector<8x64xf32>
    %cst_83 = arith.constant 1.000000e+00 : f32
    %184 = vector.broadcast %cst_83 : f32 to vector<8x64xf32>
    %185 = arith.addf %184, %183 : vector<8x64xf32>
    %cst_84 = arith.constant 1.000000e+00 : f32
    %186 = vector.broadcast %cst_84 : f32 to vector<8x64xf32>
    %187 = arith.divf %186, %185 : vector<8x64xf32>
    %188 = arith.mulf %177, %120 : vector<8x64xf32>
    %189 = arith.mulf %169, %179 : vector<8x64xf32>
    %190 = arith.addf %188, %189 : vector<8x64xf32>
    %191 = math.tanh %190 : vector<8x64xf32>
    %192 = arith.mulf %187, %191 : vector<8x64xf32>
    %c16_85 = arith.constant 16 : index
    %c0_86 = arith.constant 0 : index
    %193 = vector.load %arg8[%c16_85, %c0_86] : memref<128x128xf32, #tpu.memory_space<vmem>>, vector<8x64xf32>
    tpu.vector_store %arg8[%c16_85, %c0_86], %192 {strides = array<i32>} : memref<128x128xf32, #tpu.memory_space<vmem>>, vector<8x64xf32>,
    %c104 = arith.constant 104 : index
    %c0_87 = arith.constant 0 : index
    %194 = vector.load %arg12[%c104, %c0_87] : memref<128x256xf32, #tpu.memory_space<vmem>>, vector<8x256xf32>
    %cst_88 = arith.constant dense<0.000000e+00> : vector<8x256xf32>
    %195 = tpu.matmul %157, %14, %cst_88 {dimension_numbers = #tpu.dot_dimension_numbers<[1], [0], [0], [1], [0, 0, 1, 1], [], []>} : vector<8x64xf32>, vector<64x256xf32>, vector<8x256xf32> -> vector<8x256xf32>
    %196 = arith.addf %194, %195 : vector<8x256xf32>
    %197 = vector.extract_strided_slice %196 {offsets = [0, 0], sizes = [8, 64], strides = [1, 1]} : vector<8x256xf32> to vector<8x64xf32>
    %cst_89 = arith.constant 0.000000e+00 : f32
    %198 = vector.broadcast %cst_89 : f32 to vector<8x64xf32>
    %199 = arith.subf %198, %197 : vector<8x64xf32>
    %200 = math.exp %199 : vector<8x64xf32>
    %cst_90 = arith.constant 1.000000e+00 : f32
    %201 = vector.broadcast %cst_90 : f32 to vector<8x64xf32>
    %202 = arith.addf %201, %200 : vector<8x64xf32>
    %cst_91 = arith.constant 1.000000e+00 : f32
    %203 = vector.broadcast %cst_91 : f32 to vector<8x64xf32>
    %204 = arith.divf %203, %202 : vector<8x64xf32>
    %205 = vector.extract_strided_slice %196 {offsets = [0, 64], sizes = [8, 64], strides = [1, 1]} : vector<8x256xf32> to vector<8x64xf32>
    %cst_92 = arith.constant 0.000000e+00 : f32
    %206 = vector.broadcast %cst_92 : f32 to vector<8x64xf32>
    %207 = arith.subf %206, %205 : vector<8x64xf32>
    %208 = math.exp %207 : vector<8x64xf32>
    %cst_93 = arith.constant 1.000000e+00 : f32
    %209 = vector.broadcast %cst_93 : f32 to vector<8x64xf32>
    %210 = arith.addf %209, %208 : vector<8x64xf32>
    %cst_94 = arith.constant 1.000000e+00 : f32
    %211 = vector.broadcast %cst_94 : f32 to vector<8x64xf32>
    %212 = arith.divf %211, %210 : vector<8x64xf32>
    %213 = vector.extract_strided_slice %196 {offsets = [0, 128], sizes = [8, 64], strides = [1, 1]} : vector<8x256xf32> to vector<8x64xf32>
    %214 = math.tanh %213 : vector<8x64xf32>
    %215 = vector.extract_strided_slice %196 {offsets = [0, 192], sizes = [8, 64], strides = [1, 1]} : vector<8x256xf32> to vector<8x64xf32>
    %cst_95 = arith.constant 0.000000e+00 : f32
    %216 = vector.broadcast %cst_95 : f32 to vector<8x64xf32>
    %217 = arith.subf %216, %215 : vector<8x64xf32>
    %218 = math.exp %217 : vector<8x64xf32>
    %cst_96 = arith.constant 1.000000e+00 : f32
    %219 = vector.broadcast %cst_96 : f32 to vector<8x64xf32>
    %220 = arith.addf %219, %218 : vector<8x64xf32>
    %cst_97 = arith.constant 1.000000e+00 : f32
    %221 = vector.broadcast %cst_97 : f32 to vector<8x64xf32>
    %222 = arith.divf %221, %220 : vector<8x64xf32>
    %223 = arith.mulf %212, %155 : vector<8x64xf32>
    %224 = arith.mulf %204, %214 : vector<8x64xf32>
    %225 = arith.addf %223, %224 : vector<8x64xf32>
    %226 = math.tanh %225 : vector<8x64xf32>
    %227 = arith.mulf %222, %226 : vector<8x64xf32>
    %c104_98 = arith.constant 104 : index
    %c64_99 = arith.constant 64 : index
    %228 = vector.load %arg8[%c104_98, %c64_99] : memref<128x128xf32, #tpu.memory_space<vmem>>, vector<8x64xf32>
    tpu.vector_store %arg8[%c104_98, %c64_99], %227 {strides = array<i32>} : memref<128x128xf32, #tpu.memory_space<vmem>>, vector<8x64xf32>,
    %c24 = arith.constant 24 : index
    %c0_100 = arith.constant 0 : index
    %229 = vector.load %arg11[%c24, %c0_100] : memref<128x256xf32, #tpu.memory_space<vmem>>, vector<8x256xf32>
    %cst_101 = arith.constant dense<0.000000e+00> : vector<8x256xf32>
    %230 = tpu.matmul %192, %13, %cst_101 {dimension_numbers = #tpu.dot_dimension_numbers<[1], [0], [0], [1], [0, 0, 1, 1], [], []>} : vector<8x64xf32>, vector<64x256xf32>, vector<8x256xf32> -> vector<8x256xf32>
    %231 = arith.addf %229, %230 : vector<8x256xf32>
    %232 = vector.extract_strided_slice %231 {offsets = [0, 0], sizes = [8, 64], strides = [1, 1]} : vector<8x256xf32> to vector<8x64xf32>
    %cst_102 = arith.constant 0.000000e+00 : f32
    %233 = vector.broadcast %cst_102 : f32 to vector<8x64xf32>
    %234 = arith.subf %233, %232 : vector<8x64xf32>
    %235 = math.exp %234 : vector<8x64xf32>
    %cst_103 = arith.constant 1.000000e+00 : f32
    %236 = vector.broadcast %cst_103 : f32 to vector<8x64xf32>
    %237 = arith.addf %236, %235 : vector<8x64xf32>
    %cst_104 = arith.constant 1.000000e+00 : f32
    %238 = vector.broadcast %cst_104 : f32 to vector<8x64xf32>
    %239 = arith.divf %238, %237 : vector<8x64xf32>
    %240 = vector.extract_strided_slice %231 {offsets = [0, 64], sizes = [8, 64], strides = [1, 1]} : vector<8x256xf32> to vector<8x64xf32>
    %cst_105 = arith.constant 0.000000e+00 : f32
    %241 = vector.broadcast %cst_105 : f32 to vector<8x64xf32>
    %242 = arith.subf %241, %240 : vector<8x64xf32>
    %243 = math.exp %242 : vector<8x64xf32>
    %cst_106 = arith.constant 1.000000e+00 : f32
    %244 = vector.broadcast %cst_106 : f32 to vector<8x64xf32>
    %245 = arith.addf %244, %243 : vector<8x64xf32>
    %cst_107 = arith.constant 1.000000e+00 : f32
    %246 = vector.broadcast %cst_107 : f32 to vector<8x64xf32>
    %247 = arith.divf %246, %245 : vector<8x64xf32>
    %248 = vector.extract_strided_slice %231 {offsets = [0, 128], sizes = [8, 64], strides = [1, 1]} : vector<8x256xf32> to vector<8x64xf32>
    %249 = math.tanh %248 : vector<8x64xf32>
    %250 = vector.extract_strided_slice %231 {offsets = [0, 192], sizes = [8, 64], strides = [1, 1]} : vector<8x256xf32> to vector<8x64xf32>
    %cst_108 = arith.constant 0.000000e+00 : f32
    %251 = vector.broadcast %cst_108 : f32 to vector<8x64xf32>
    %252 = arith.subf %251, %250 : vector<8x64xf32>
    %253 = math.exp %252 : vector<8x64xf32>
    %cst_109 = arith.constant 1.000000e+00 : f32
    %254 = vector.broadcast %cst_109 : f32 to vector<8x64xf32>
    %255 = arith.addf %254, %253 : vector<8x64xf32>
    %cst_110 = arith.constant 1.000000e+00 : f32
    %256 = vector.broadcast %cst_110 : f32 to vector<8x64xf32>
    %257 = arith.divf %256, %255 : vector<8x64xf32>
    %258 = arith.mulf %247, %190 : vector<8x64xf32>
    %259 = arith.mulf %239, %249 : vector<8x64xf32>
    %260 = arith.addf %258, %259 : vector<8x64xf32>
    %261 = math.tanh %260 : vector<8x64xf32>
    %262 = arith.mulf %257, %261 : vector<8x64xf32>
    %c24_111 = arith.constant 24 : index
    %c0_112 = arith.constant 0 : index
    %263 = vector.load %arg8[%c24_111, %c0_112] : memref<128x128xf32, #tpu.memory_space<vmem>>, vector<8x64xf32>
    tpu.vector_store %arg8[%c24_111, %c0_112], %262 {strides = array<i32>} : memref<128x128xf32, #tpu.memory_space<vmem>>, vector<8x64xf32>,
    %c96 = arith.constant 96 : index
    %c0_113 = arith.constant 0 : index
    %264 = vector.load %arg12[%c96, %c0_113] : memref<128x256xf32, #tpu.memory_space<vmem>>, vector<8x256xf32>
    %cst_114 = arith.constant dense<0.000000e+00> : vector<8x256xf32>
    %265 = tpu.matmul %227, %14, %cst_114 {dimension_numbers = #tpu.dot_dimension_numbers<[1], [0], [0], [1], [0, 0, 1, 1], [], []>} : vector<8x64xf32>, vector<64x256xf32>, vector<8x256xf32> -> vector<8x256xf32>
    %266 = arith.addf %264, %265 : vector<8x256xf32>
    %267 = vector.extract_strided_slice %266 {offsets = [0, 0], sizes = [8, 64], strides = [1, 1]} : vector<8x256xf32> to vector<8x64xf32>
    %cst_115 = arith.constant 0.000000e+00 : f32
    %268 = vector.broadcast %cst_115 : f32 to vector<8x64xf32>
    %269 = arith.subf %268, %267 : vector<8x64xf32>
    %270 = math.exp %269 : vector<8x64xf32>
    %cst_116 = arith.constant 1.000000e+00 : f32
    %271 = vector.broadcast %cst_116 : f32 to vector<8x64xf32>
    %272 = arith.addf %271, %270 : vector<8x64xf32>
    %cst_117 = arith.constant 1.000000e+00 : f32
    %273 = vector.broadcast %cst_117 : f32 to vector<8x64xf32>
    %274 = arith.divf %273, %272 : vector<8x64xf32>
    %275 = vector.extract_strided_slice %266 {offsets = [0, 64], sizes = [8, 64], strides = [1, 1]} : vector<8x256xf32> to vector<8x64xf32>
    %cst_118 = arith.constant 0.000000e+00 : f32
    %276 = vector.broadcast %cst_118 : f32 to vector<8x64xf32>
    %277 = arith.subf %276, %275 : vector<8x64xf32>
    %278 = math.exp %277 : vector<8x64xf32>
    %cst_119 = arith.constant 1.000000e+00 : f32
    %279 = vector.broadcast %cst_119 : f32 to vector<8x64xf32>
    %280 = arith.addf %279, %278 : vector<8x64xf32>
    %cst_120 = arith.constant 1.000000e+00 : f32
    %281 = vector.broadcast %cst_120 : f32 to vector<8x64xf32>
    %282 = arith.divf %281, %280 : vector<8x64xf32>
    %283 = vector.extract_strided_slice %266 {offsets = [0, 128], sizes = [8, 64], strides = [1, 1]} : vector<8x256xf32> to vector<8x64xf32>
    %284 = math.tanh %283 : vector<8x64xf32>
    %285 = vector.extract_strided_slice %266 {offsets = [0, 192], sizes = [8, 64], strides = [1, 1]} : vector<8x256xf32> to vector<8x64xf32>
    %cst_121 = arith.constant 0.000000e+00 : f32
    %286 = vector.broadcast %cst_121 : f32 to vector<8x64xf32>
    %287 = arith.subf %286, %285 : vector<8x64xf32>
    %288 = math.exp %287 : vector<8x64xf32>
    %cst_122 = arith.constant 1.000000e+00 : f32
    %289 = vector.broadcast %cst_122 : f32 to vector<8x64xf32>
    %290 = arith.addf %289, %288 : vector<8x64xf32>
    %cst_123 = arith.constant 1.000000e+00 : f32
    %291 = vector.broadcast %cst_123 : f32 to vector<8x64xf32>
    %292 = arith.divf %291, %290 : vector<8x64xf32>
    %293 = arith.mulf %282, %225 : vector<8x64xf32>
    %294 = arith.mulf %274, %284 : vector<8x64xf32>
    %295 = arith.addf %293, %294 : vector<8x64xf32>
    %296 = math.tanh %295 : vector<8x64xf32>
    %297 = arith.mulf %292, %296 : vector<8x64xf32>
    %c96_124 = arith.constant 96 : index
    %c64_125 = arith.constant 64 : index
    %298 = vector.load %arg8[%c96_124, %c64_125] : memref<128x128xf32, #tpu.memory_space<vmem>>, vector<8x64xf32>
    tpu.vector_store %arg8[%c96_124, %c64_125], %297 {strides = array<i32>} : memref<128x128xf32, #tpu.memory_space<vmem>>, vector<8x64xf32>,
    %c32 = arith.constant 32 : index
    %c0_126 = arith.constant 0 : index
    %299 = vector.load %arg11[%c32, %c0_126] : memref<128x256xf32, #tpu.memory_space<vmem>>, vector<8x256xf32>
    %cst_127 = arith.constant dense<0.000000e+00> : vector<8x256xf32>
    %300 = tpu.matmul %262, %13, %cst_127 {dimension_numbers = #tpu.dot_dimension_numbers<[1], [0], [0], [1], [0, 0, 1, 1], [], []>} : vector<8x64xf32>, vector<64x256xf32>, vector<8x256xf32> -> vector<8x256xf32>
    %301 = arith.addf %299, %300 : vector<8x256xf32>
    %302 = vector.extract_strided_slice %301 {offsets = [0, 0], sizes = [8, 64], strides = [1, 1]} : vector<8x256xf32> to vector<8x64xf32>
    %cst_128 = arith.constant 0.000000e+00 : f32
    %303 = vector.broadcast %cst_128 : f32 to vector<8x64xf32>
    %304 = arith.subf %303, %302 : vector<8x64xf32>
    %305 = math.exp %304 : vector<8x64xf32>
    %cst_129 = arith.constant 1.000000e+00 : f32
    %306 = vector.broadcast %cst_129 : f32 to vector<8x64xf32>
    %307 = arith.addf %306, %305 : vector<8x64xf32>
    %cst_130 = arith.constant 1.000000e+00 : f32
    %308 = vector.broadcast %cst_130 : f32 to vector<8x64xf32>
    %309 = arith.divf %308, %307 : vector<8x64xf32>
    %310 = vector.extract_strided_slice %301 {offsets = [0, 64], sizes = [8, 64], strides = [1, 1]} : vector<8x256xf32> to vector<8x64xf32>
    %cst_131 = arith.constant 0.000000e+00 : f32
    %311 = vector.broadcast %cst_131 : f32 to vector<8x64xf32>
    %312 = arith.subf %311, %310 : vector<8x64xf32>
    %313 = math.exp %312 : vector<8x64xf32>
    %cst_132 = arith.constant 1.000000e+00 : f32
    %314 = vector.broadcast %cst_132 : f32 to vector<8x64xf32>
    %315 = arith.addf %314, %313 : vector<8x64xf32>
    %cst_133 = arith.constant 1.000000e+00 : f32
    %316 = vector.broadcast %cst_133 : f32 to vector<8x64xf32>
    %317 = arith.divf %316, %315 : vector<8x64xf32>
    %318 = vector.extract_strided_slice %301 {offsets = [0, 128], sizes = [8, 64], strides = [1, 1]} : vector<8x256xf32> to vector<8x64xf32>
    %319 = math.tanh %318 : vector<8x64xf32>
    %320 = vector.extract_strided_slice %301 {offsets = [0, 192], sizes = [8, 64], strides = [1, 1]} : vector<8x256xf32> to vector<8x64xf32>
    %cst_134 = arith.constant 0.000000e+00 : f32
    %321 = vector.broadcast %cst_134 : f32 to vector<8x64xf32>
    %322 = arith.subf %321, %320 : vector<8x64xf32>
    %323 = math.exp %322 : vector<8x64xf32>
    %cst_135 = arith.constant 1.000000e+00 : f32
    %324 = vector.broadcast %cst_135 : f32 to vector<8x64xf32>
    %325 = arith.addf %324, %323 : vector<8x64xf32>
    %cst_136 = arith.constant 1.000000e+00 : f32
    %326 = vector.broadcast %cst_136 : f32 to vector<8x64xf32>
    %327 = arith.divf %326, %325 : vector<8x64xf32>
    %328 = arith.mulf %317, %260 : vector<8x64xf32>
    %329 = arith.mulf %309, %319 : vector<8x64xf32>
    %330 = arith.addf %328, %329 : vector<8x64xf32>
    %331 = math.tanh %330 : vector<8x64xf32>
    %332 = arith.mulf %327, %331 : vector<8x64xf32>
    %c32_137 = arith.constant 32 : index
    %c0_138 = arith.constant 0 : index
    %333 = vector.load %arg8[%c32_137, %c0_138] : memref<128x128xf32, #tpu.memory_space<vmem>>, vector<8x64xf32>
    tpu.vector_store %arg8[%c32_137, %c0_138], %332 {strides = array<i32>} : memref<128x128xf32, #tpu.memory_space<vmem>>, vector<8x64xf32>,
    %c88 = arith.constant 88 : index
    %c0_139 = arith.constant 0 : index
    %334 = vector.load %arg12[%c88, %c0_139] : memref<128x256xf32, #tpu.memory_space<vmem>>, vector<8x256xf32>
    %cst_140 = arith.constant dense<0.000000e+00> : vector<8x256xf32>
    %335 = tpu.matmul %297, %14, %cst_140 {dimension_numbers = #tpu.dot_dimension_numbers<[1], [0], [0], [1], [0, 0, 1, 1], [], []>} : vector<8x64xf32>, vector<64x256xf32>, vector<8x256xf32> -> vector<8x256xf32>
    %336 = arith.addf %334, %335 : vector<8x256xf32>
    %337 = vector.extract_strided_slice %336 {offsets = [0, 0], sizes = [8, 64], strides = [1, 1]} : vector<8x256xf32> to vector<8x64xf32>
    %cst_141 = arith.constant 0.000000e+00 : f32
    %338 = vector.broadcast %cst_141 : f32 to vector<8x64xf32>
    %339 = arith.subf %338, %337 : vector<8x64xf32>
    %340 = math.exp %339 : vector<8x64xf32>
    %cst_142 = arith.constant 1.000000e+00 : f32
    %341 = vector.broadcast %cst_142 : f32 to vector<8x64xf32>
    %342 = arith.addf %341, %340 : vector<8x64xf32>
    %cst_143 = arith.constant 1.000000e+00 : f32
    %343 = vector.broadcast %cst_143 : f32 to vector<8x64xf32>
    %344 = arith.divf %343, %342 : vector<8x64xf32>
    %345 = vector.extract_strided_slice %336 {offsets = [0, 64], sizes = [8, 64], strides = [1, 1]} : vector<8x256xf32> to vector<8x64xf32>
    %cst_144 = arith.constant 0.000000e+00 : f32
    %346 = vector.broadcast %cst_144 : f32 to vector<8x64xf32>
    %347 = arith.subf %346, %345 : vector<8x64xf32>
    %348 = math.exp %347 : vector<8x64xf32>
    %cst_145 = arith.constant 1.000000e+00 : f32
    %349 = vector.broadcast %cst_145 : f32 to vector<8x64xf32>
    %350 = arith.addf %349, %348 : vector<8x64xf32>
    %cst_146 = arith.constant 1.000000e+00 : f32
    %351 = vector.broadcast %cst_146 : f32 to vector<8x64xf32>
    %352 = arith.divf %351, %350 : vector<8x64xf32>
    %353 = vector.extract_strided_slice %336 {offsets = [0, 128], sizes = [8, 64], strides = [1, 1]} : vector<8x256xf32> to vector<8x64xf32>
    %354 = math.tanh %353 : vector<8x64xf32>
    %355 = vector.extract_strided_slice %336 {offsets = [0, 192], sizes = [8, 64], strides = [1, 1]} : vector<8x256xf32> to vector<8x64xf32>
    %cst_147 = arith.constant 0.000000e+00 : f32
    %356 = vector.broadcast %cst_147 : f32 to vector<8x64xf32>
    %357 = arith.subf %356, %355 : vector<8x64xf32>
    %358 = math.exp %357 : vector<8x64xf32>
    %cst_148 = arith.constant 1.000000e+00 : f32
    %359 = vector.broadcast %cst_148 : f32 to vector<8x64xf32>
    %360 = arith.addf %359, %358 : vector<8x64xf32>
    %cst_149 = arith.constant 1.000000e+00 : f32
    %361 = vector.broadcast %cst_149 : f32 to vector<8x64xf32>
    %362 = arith.divf %361, %360 : vector<8x64xf32>
    %363 = arith.mulf %352, %295 : vector<8x64xf32>
    %364 = arith.mulf %344, %354 : vector<8x64xf32>
    %365 = arith.addf %363, %364 : vector<8x64xf32>
    %366 = math.tanh %365 : vector<8x64xf32>
    %367 = arith.mulf %362, %366 : vector<8x64xf32>
    %c88_150 = arith.constant 88 : index
    %c64_151 = arith.constant 64 : index
    %368 = vector.load %arg8[%c88_150, %c64_151] : memref<128x128xf32, #tpu.memory_space<vmem>>, vector<8x64xf32>
    tpu.vector_store %arg8[%c88_150, %c64_151], %367 {strides = array<i32>} : memref<128x128xf32, #tpu.memory_space<vmem>>, vector<8x64xf32>,
    %c40 = arith.constant 40 : index
    %c0_152 = arith.constant 0 : index
    %369 = vector.load %arg11[%c40, %c0_152] : memref<128x256xf32, #tpu.memory_space<vmem>>, vector<8x256xf32>
    %cst_153 = arith.constant dense<0.000000e+00> : vector<8x256xf32>
    %370 = tpu.matmul %332, %13, %cst_153 {dimension_numbers = #tpu.dot_dimension_numbers<[1], [0], [0], [1], [0, 0, 1, 1], [], []>} : vector<8x64xf32>, vector<64x256xf32>, vector<8x256xf32> -> vector<8x256xf32>
    %371 = arith.addf %369, %370 : vector<8x256xf32>
    %372 = vector.extract_strided_slice %371 {offsets = [0, 0], sizes = [8, 64], strides = [1, 1]} : vector<8x256xf32> to vector<8x64xf32>
    %cst_154 = arith.constant 0.000000e+00 : f32
    %373 = vector.broadcast %cst_154 : f32 to vector<8x64xf32>
    %374 = arith.subf %373, %372 : vector<8x64xf32>
    %375 = math.exp %374 : vector<8x64xf32>
    %cst_155 = arith.constant 1.000000e+00 : f32
    %376 = vector.broadcast %cst_155 : f32 to vector<8x64xf32>
    %377 = arith.addf %376, %375 : vector<8x64xf32>
    %cst_156 = arith.constant 1.000000e+00 : f32
    %378 = vector.broadcast %cst_156 : f32 to vector<8x64xf32>
    %379 = arith.divf %378, %377 : vector<8x64xf32>
    %380 = vector.extract_strided_slice %371 {offsets = [0, 64], sizes = [8, 64], strides = [1, 1]} : vector<8x256xf32> to vector<8x64xf32>
    %cst_157 = arith.constant 0.000000e+00 : f32
    %381 = vector.broadcast %cst_157 : f32 to vector<8x64xf32>
    %382 = arith.subf %381, %380 : vector<8x64xf32>
    %383 = math.exp %382 : vector<8x64xf32>
    %cst_158 = arith.constant 1.000000e+00 : f32
    %384 = vector.broadcast %cst_158 : f32 to vector<8x64xf32>
    %385 = arith.addf %384, %383 : vector<8x64xf32>
    %cst_159 = arith.constant 1.000000e+00 : f32
    %386 = vector.broadcast %cst_159 : f32 to vector<8x64xf32>
    %387 = arith.divf %386, %385 : vector<8x64xf32>
    %388 = vector.extract_strided_slice %371 {offsets = [0, 128], sizes = [8, 64], strides = [1, 1]} : vector<8x256xf32> to vector<8x64xf32>
    %389 = math.tanh %388 : vector<8x64xf32>
    %390 = vector.extract_strided_slice %371 {offsets = [0, 192], sizes = [8, 64], strides = [1, 1]} : vector<8x256xf32> to vector<8x64xf32>
    %cst_160 = arith.constant 0.000000e+00 : f32
    %391 = vector.broadcast %cst_160 : f32 to vector<8x64xf32>
    %392 = arith.subf %391, %390 : vector<8x64xf32>
    %393 = math.exp %392 : vector<8x64xf32>
    %cst_161 = arith.constant 1.000000e+00 : f32
    %394 = vector.broadcast %cst_161 : f32 to vector<8x64xf32>
    %395 = arith.addf %394, %393 : vector<8x64xf32>
    %cst_162 = arith.constant 1.000000e+00 : f32
    %396 = vector.broadcast %cst_162 : f32 to vector<8x64xf32>
    %397 = arith.divf %396, %395 : vector<8x64xf32>
    %398 = arith.mulf %387, %330 : vector<8x64xf32>
    %399 = arith.mulf %379, %389 : vector<8x64xf32>
    %400 = arith.addf %398, %399 : vector<8x64xf32>
    %401 = math.tanh %400 : vector<8x64xf32>
    %402 = arith.mulf %397, %401 : vector<8x64xf32>
    %c40_163 = arith.constant 40 : index
    %c0_164 = arith.constant 0 : index
    %403 = vector.load %arg8[%c40_163, %c0_164] : memref<128x128xf32, #tpu.memory_space<vmem>>, vector<8x64xf32>
    tpu.vector_store %arg8[%c40_163, %c0_164], %402 {strides = array<i32>} : memref<128x128xf32, #tpu.memory_space<vmem>>, vector<8x64xf32>,
    %c80 = arith.constant 80 : index
    %c0_165 = arith.constant 0 : index
    %404 = vector.load %arg12[%c80, %c0_165] : memref<128x256xf32, #tpu.memory_space<vmem>>, vector<8x256xf32>
    %cst_166 = arith.constant dense<0.000000e+00> : vector<8x256xf32>
    %405 = tpu.matmul %367, %14, %cst_166 {dimension_numbers = #tpu.dot_dimension_numbers<[1], [0], [0], [1], [0, 0, 1, 1], [], []>} : vector<8x64xf32>, vector<64x256xf32>, vector<8x256xf32> -> vector<8x256xf32>
    %406 = arith.addf %404, %405 : vector<8x256xf32>
    %407 = vector.extract_strided_slice %406 {offsets = [0, 0], sizes = [8, 64], strides = [1, 1]} : vector<8x256xf32> to vector<8x64xf32>
    %cst_167 = arith.constant 0.000000e+00 : f32
    %408 = vector.broadcast %cst_167 : f32 to vector<8x64xf32>
    %409 = arith.subf %408, %407 : vector<8x64xf32>
    %410 = math.exp %409 : vector<8x64xf32>
    %cst_168 = arith.constant 1.000000e+00 : f32
    %411 = vector.broadcast %cst_168 : f32 to vector<8x64xf32>
    %412 = arith.addf %411, %410 : vector<8x64xf32>
    %cst_169 = arith.constant 1.000000e+00 : f32
    %413 = vector.broadcast %cst_169 : f32 to vector<8x64xf32>
    %414 = arith.divf %413, %412 : vector<8x64xf32>
    %415 = vector.extract_strided_slice %406 {offsets = [0, 64], sizes = [8, 64], strides = [1, 1]} : vector<8x256xf32> to vector<8x64xf32>
    %cst_170 = arith.constant 0.000000e+00 : f32
    %416 = vector.broadcast %cst_170 : f32 to vector<8x64xf32>
    %417 = arith.subf %416, %415 : vector<8x64xf32>
    %418 = math.exp %417 : vector<8x64xf32>
    %cst_171 = arith.constant 1.000000e+00 : f32
    %419 = vector.broadcast %cst_171 : f32 to vector<8x64xf32>
    %420 = arith.addf %419, %418 : vector<8x64xf32>
    %cst_172 = arith.constant 1.000000e+00 : f32
    %421 = vector.broadcast %cst_172 : f32 to vector<8x64xf32>
    %422 = arith.divf %421, %420 : vector<8x64xf32>
    %423 = vector.extract_strided_slice %406 {offsets = [0, 128], sizes = [8, 64], strides = [1, 1]} : vector<8x256xf32> to vector<8x64xf32>
    %424 = math.tanh %423 : vector<8x64xf32>
    %425 = vector.extract_strided_slice %406 {offsets = [0, 192], sizes = [8, 64], strides = [1, 1]} : vector<8x256xf32> to vector<8x64xf32>
    %cst_173 = arith.constant 0.000000e+00 : f32
    %426 = vector.broadcast %cst_173 : f32 to vector<8x64xf32>
    %427 = arith.subf %426, %425 : vector<8x64xf32>
    %428 = math.exp %427 : vector<8x64xf32>
    %cst_174 = arith.constant 1.000000e+00 : f32
    %429 = vector.broadcast %cst_174 : f32 to vector<8x64xf32>
    %430 = arith.addf %429, %428 : vector<8x64xf32>
    %cst_175 = arith.constant 1.000000e+00 : f32
    %431 = vector.broadcast %cst_175 : f32 to vector<8x64xf32>
    %432 = arith.divf %431, %430 : vector<8x64xf32>
    %433 = arith.mulf %422, %365 : vector<8x64xf32>
    %434 = arith.mulf %414, %424 : vector<8x64xf32>
    %435 = arith.addf %433, %434 : vector<8x64xf32>
    %436 = math.tanh %435 : vector<8x64xf32>
    %437 = arith.mulf %432, %436 : vector<8x64xf32>
    %c80_176 = arith.constant 80 : index
    %c64_177 = arith.constant 64 : index
    %438 = vector.load %arg8[%c80_176, %c64_177] : memref<128x128xf32, #tpu.memory_space<vmem>>, vector<8x64xf32>
    tpu.vector_store %arg8[%c80_176, %c64_177], %437 {strides = array<i32>} : memref<128x128xf32, #tpu.memory_space<vmem>>, vector<8x64xf32>,
    %c48 = arith.constant 48 : index
    %c0_178 = arith.constant 0 : index
    %439 = vector.load %arg11[%c48, %c0_178] : memref<128x256xf32, #tpu.memory_space<vmem>>, vector<8x256xf32>
    %cst_179 = arith.constant dense<0.000000e+00> : vector<8x256xf32>
    %440 = tpu.matmul %402, %13, %cst_179 {dimension_numbers = #tpu.dot_dimension_numbers<[1], [0], [0], [1], [0, 0, 1, 1], [], []>} : vector<8x64xf32>, vector<64x256xf32>, vector<8x256xf32> -> vector<8x256xf32>
    %441 = arith.addf %439, %440 : vector<8x256xf32>
    %442 = vector.extract_strided_slice %441 {offsets = [0, 0], sizes = [8, 64], strides = [1, 1]} : vector<8x256xf32> to vector<8x64xf32>
    %cst_180 = arith.constant 0.000000e+00 : f32
    %443 = vector.broadcast %cst_180 : f32 to vector<8x64xf32>
    %444 = arith.subf %443, %442 : vector<8x64xf32>
    %445 = math.exp %444 : vector<8x64xf32>
    %cst_181 = arith.constant 1.000000e+00 : f32
    %446 = vector.broadcast %cst_181 : f32 to vector<8x64xf32>
    %447 = arith.addf %446, %445 : vector<8x64xf32>
    %cst_182 = arith.constant 1.000000e+00 : f32
    %448 = vector.broadcast %cst_182 : f32 to vector<8x64xf32>
    %449 = arith.divf %448, %447 : vector<8x64xf32>
    %450 = vector.extract_strided_slice %441 {offsets = [0, 64], sizes = [8, 64], strides = [1, 1]} : vector<8x256xf32> to vector<8x64xf32>
    %cst_183 = arith.constant 0.000000e+00 : f32
    %451 = vector.broadcast %cst_183 : f32 to vector<8x64xf32>
    %452 = arith.subf %451, %450 : vector<8x64xf32>
    %453 = math.exp %452 : vector<8x64xf32>
    %cst_184 = arith.constant 1.000000e+00 : f32
    %454 = vector.broadcast %cst_184 : f32 to vector<8x64xf32>
    %455 = arith.addf %454, %453 : vector<8x64xf32>
    %cst_185 = arith.constant 1.000000e+00 : f32
    %456 = vector.broadcast %cst_185 : f32 to vector<8x64xf32>
    %457 = arith.divf %456, %455 : vector<8x64xf32>
    %458 = vector.extract_strided_slice %441 {offsets = [0, 128], sizes = [8, 64], strides = [1, 1]} : vector<8x256xf32> to vector<8x64xf32>
    %459 = math.tanh %458 : vector<8x64xf32>
    %460 = vector.extract_strided_slice %441 {offsets = [0, 192], sizes = [8, 64], strides = [1, 1]} : vector<8x256xf32> to vector<8x64xf32>
    %cst_186 = arith.constant 0.000000e+00 : f32
    %461 = vector.broadcast %cst_186 : f32 to vector<8x64xf32>
    %462 = arith.subf %461, %460 : vector<8x64xf32>
    %463 = math.exp %462 : vector<8x64xf32>
    %cst_187 = arith.constant 1.000000e+00 : f32
    %464 = vector.broadcast %cst_187 : f32 to vector<8x64xf32>
    %465 = arith.addf %464, %463 : vector<8x64xf32>
    %cst_188 = arith.constant 1.000000e+00 : f32
    %466 = vector.broadcast %cst_188 : f32 to vector<8x64xf32>
    %467 = arith.divf %466, %465 : vector<8x64xf32>
    %468 = arith.mulf %457, %400 : vector<8x64xf32>
    %469 = arith.mulf %449, %459 : vector<8x64xf32>
    %470 = arith.addf %468, %469 : vector<8x64xf32>
    %471 = math.tanh %470 : vector<8x64xf32>
    %472 = arith.mulf %467, %471 : vector<8x64xf32>
    %c48_189 = arith.constant 48 : index
    %c0_190 = arith.constant 0 : index
    %473 = vector.load %arg8[%c48_189, %c0_190] : memref<128x128xf32, #tpu.memory_space<vmem>>, vector<8x64xf32>
    tpu.vector_store %arg8[%c48_189, %c0_190], %472 {strides = array<i32>} : memref<128x128xf32, #tpu.memory_space<vmem>>, vector<8x64xf32>,
    %c72 = arith.constant 72 : index
    %c0_191 = arith.constant 0 : index
    %474 = vector.load %arg12[%c72, %c0_191] : memref<128x256xf32, #tpu.memory_space<vmem>>, vector<8x256xf32>
    %cst_192 = arith.constant dense<0.000000e+00> : vector<8x256xf32>
    %475 = tpu.matmul %437, %14, %cst_192 {dimension_numbers = #tpu.dot_dimension_numbers<[1], [0], [0], [1], [0, 0, 1, 1], [], []>} : vector<8x64xf32>, vector<64x256xf32>, vector<8x256xf32> -> vector<8x256xf32>
    %476 = arith.addf %474, %475 : vector<8x256xf32>
    %477 = vector.extract_strided_slice %476 {offsets = [0, 0], sizes = [8, 64], strides = [1, 1]} : vector<8x256xf32> to vector<8x64xf32>
    %cst_193 = arith.constant 0.000000e+00 : f32
    %478 = vector.broadcast %cst_193 : f32 to vector<8x64xf32>
    %479 = arith.subf %478, %477 : vector<8x64xf32>
    %480 = math.exp %479 : vector<8x64xf32>
    %cst_194 = arith.constant 1.000000e+00 : f32
    %481 = vector.broadcast %cst_194 : f32 to vector<8x64xf32>
    %482 = arith.addf %481, %480 : vector<8x64xf32>
    %cst_195 = arith.constant 1.000000e+00 : f32
    %483 = vector.broadcast %cst_195 : f32 to vector<8x64xf32>
    %484 = arith.divf %483, %482 : vector<8x64xf32>
    %485 = vector.extract_strided_slice %476 {offsets = [0, 64], sizes = [8, 64], strides = [1, 1]} : vector<8x256xf32> to vector<8x64xf32>
    %cst_196 = arith.constant 0.000000e+00 : f32
    %486 = vector.broadcast %cst_196 : f32 to vector<8x64xf32>
    %487 = arith.subf %486, %485 : vector<8x64xf32>
    %488 = math.exp %487 : vector<8x64xf32>
    %cst_197 = arith.constant 1.000000e+00 : f32
    %489 = vector.broadcast %cst_197 : f32 to vector<8x64xf32>
    %490 = arith.addf %489, %488 : vector<8x64xf32>
    %cst_198 = arith.constant 1.000000e+00 : f32
    %491 = vector.broadcast %cst_198 : f32 to vector<8x64xf32>
    %492 = arith.divf %491, %490 : vector<8x64xf32>
    %493 = vector.extract_strided_slice %476 {offsets = [0, 128], sizes = [8, 64], strides = [1, 1]} : vector<8x256xf32> to vector<8x64xf32>
    %494 = math.tanh %493 : vector<8x64xf32>
    %495 = vector.extract_strided_slice %476 {offsets = [0, 192], sizes = [8, 64], strides = [1, 1]} : vector<8x256xf32> to vector<8x64xf32>
    %cst_199 = arith.constant 0.000000e+00 : f32
    %496 = vector.broadcast %cst_199 : f32 to vector<8x64xf32>
    %497 = arith.subf %496, %495 : vector<8x64xf32>
    %498 = math.exp %497 : vector<8x64xf32>
    %cst_200 = arith.constant 1.000000e+00 : f32
    %499 = vector.broadcast %cst_200 : f32 to vector<8x64xf32>
    %500 = arith.addf %499, %498 : vector<8x64xf32>
    %cst_201 = arith.constant 1.000000e+00 : f32
    %501 = vector.broadcast %cst_201 : f32 to vector<8x64xf32>
    %502 = arith.divf %501, %500 : vector<8x64xf32>
    %503 = arith.mulf %492, %435 : vector<8x64xf32>
    %504 = arith.mulf %484, %494 : vector<8x64xf32>
    %505 = arith.addf %503, %504 : vector<8x64xf32>
    %506 = math.tanh %505 : vector<8x64xf32>
    %507 = arith.mulf %502, %506 : vector<8x64xf32>
    %c72_202 = arith.constant 72 : index
    %c64_203 = arith.constant 64 : index
    %508 = vector.load %arg8[%c72_202, %c64_203] : memref<128x128xf32, #tpu.memory_space<vmem>>, vector<8x64xf32>
    tpu.vector_store %arg8[%c72_202, %c64_203], %507 {strides = array<i32>} : memref<128x128xf32, #tpu.memory_space<vmem>>, vector<8x64xf32>,
    %c56 = arith.constant 56 : index
    %c0_204 = arith.constant 0 : index
    %509 = vector.load %arg11[%c56, %c0_204] : memref<128x256xf32, #tpu.memory_space<vmem>>, vector<8x256xf32>
    %cst_205 = arith.constant dense<0.000000e+00> : vector<8x256xf32>
    %510 = tpu.matmul %472, %13, %cst_205 {dimension_numbers = #tpu.dot_dimension_numbers<[1], [0], [0], [1], [0, 0, 1, 1], [], []>} : vector<8x64xf32>, vector<64x256xf32>, vector<8x256xf32> -> vector<8x256xf32>
    %511 = arith.addf %509, %510 : vector<8x256xf32>
    %512 = vector.extract_strided_slice %511 {offsets = [0, 0], sizes = [8, 64], strides = [1, 1]} : vector<8x256xf32> to vector<8x64xf32>
    %cst_206 = arith.constant 0.000000e+00 : f32
    %513 = vector.broadcast %cst_206 : f32 to vector<8x64xf32>
    %514 = arith.subf %513, %512 : vector<8x64xf32>
    %515 = math.exp %514 : vector<8x64xf32>
    %cst_207 = arith.constant 1.000000e+00 : f32
    %516 = vector.broadcast %cst_207 : f32 to vector<8x64xf32>
    %517 = arith.addf %516, %515 : vector<8x64xf32>
    %cst_208 = arith.constant 1.000000e+00 : f32
    %518 = vector.broadcast %cst_208 : f32 to vector<8x64xf32>
    %519 = arith.divf %518, %517 : vector<8x64xf32>
    %520 = vector.extract_strided_slice %511 {offsets = [0, 64], sizes = [8, 64], strides = [1, 1]} : vector<8x256xf32> to vector<8x64xf32>
    %cst_209 = arith.constant 0.000000e+00 : f32
    %521 = vector.broadcast %cst_209 : f32 to vector<8x64xf32>
    %522 = arith.subf %521, %520 : vector<8x64xf32>
    %523 = math.exp %522 : vector<8x64xf32>
    %cst_210 = arith.constant 1.000000e+00 : f32
    %524 = vector.broadcast %cst_210 : f32 to vector<8x64xf32>
    %525 = arith.addf %524, %523 : vector<8x64xf32>
    %cst_211 = arith.constant 1.000000e+00 : f32
    %526 = vector.broadcast %cst_211 : f32 to vector<8x64xf32>
    %527 = arith.divf %526, %525 : vector<8x64xf32>
    %528 = vector.extract_strided_slice %511 {offsets = [0, 128], sizes = [8, 64], strides = [1, 1]} : vector<8x256xf32> to vector<8x64xf32>
    %529 = math.tanh %528 : vector<8x64xf32>
    %530 = vector.extract_strided_slice %511 {offsets = [0, 192], sizes = [8, 64], strides = [1, 1]} : vector<8x256xf32> to vector<8x64xf32>
    %cst_212 = arith.constant 0.000000e+00 : f32
    %531 = vector.broadcast %cst_212 : f32 to vector<8x64xf32>
    %532 = arith.subf %531, %530 : vector<8x64xf32>
    %533 = math.exp %532 : vector<8x64xf32>
    %cst_213 = arith.constant 1.000000e+00 : f32
    %534 = vector.broadcast %cst_213 : f32 to vector<8x64xf32>
    %535 = arith.addf %534, %533 : vector<8x64xf32>
    %cst_214 = arith.constant 1.000000e+00 : f32
    %536 = vector.broadcast %cst_214 : f32 to vector<8x64xf32>
    %537 = arith.divf %536, %535 : vector<8x64xf32>
    %538 = arith.mulf %527, %470 : vector<8x64xf32>
    %539 = arith.mulf %519, %529 : vector<8x64xf32>
    %540 = arith.addf %538, %539 : vector<8x64xf32>
    %541 = math.tanh %540 : vector<8x64xf32>
    %542 = arith.mulf %537, %541 : vector<8x64xf32>
    %c56_215 = arith.constant 56 : index
    %c0_216 = arith.constant 0 : index
    %543 = vector.load %arg8[%c56_215, %c0_216] : memref<128x128xf32, #tpu.memory_space<vmem>>, vector<8x64xf32>
    tpu.vector_store %arg8[%c56_215, %c0_216], %542 {strides = array<i32>} : memref<128x128xf32, #tpu.memory_space<vmem>>, vector<8x64xf32>,
    %c64_217 = arith.constant 64 : index
    %c0_218 = arith.constant 0 : index
    %544 = vector.load %arg12[%c64_217, %c0_218] : memref<128x256xf32, #tpu.memory_space<vmem>>, vector<8x256xf32>
    %cst_219 = arith.constant dense<0.000000e+00> : vector<8x256xf32>
    %545 = tpu.matmul %507, %14, %cst_219 {dimension_numbers = #tpu.dot_dimension_numbers<[1], [0], [0], [1], [0, 0, 1, 1], [], []>} : vector<8x64xf32>, vector<64x256xf32>, vector<8x256xf32> -> vector<8x256xf32>
    %546 = arith.addf %544, %545 : vector<8x256xf32>
    %547 = vector.extract_strided_slice %546 {offsets = [0, 0], sizes = [8, 64], strides = [1, 1]} : vector<8x256xf32> to vector<8x64xf32>
    %cst_220 = arith.constant 0.000000e+00 : f32
    %548 = vector.broadcast %cst_220 : f32 to vector<8x64xf32>
    %549 = arith.subf %548, %547 : vector<8x64xf32>
    %550 = math.exp %549 : vector<8x64xf32>
    %cst_221 = arith.constant 1.000000e+00 : f32
    %551 = vector.broadcast %cst_221 : f32 to vector<8x64xf32>
    %552 = arith.addf %551, %550 : vector<8x64xf32>
    %cst_222 = arith.constant 1.000000e+00 : f32
    %553 = vector.broadcast %cst_222 : f32 to vector<8x64xf32>
    %554 = arith.divf %553, %552 : vector<8x64xf32>
    %555 = vector.extract_strided_slice %546 {offsets = [0, 64], sizes = [8, 64], strides = [1, 1]} : vector<8x256xf32> to vector<8x64xf32>
    %cst_223 = arith.constant 0.000000e+00 : f32
    %556 = vector.broadcast %cst_223 : f32 to vector<8x64xf32>
    %557 = arith.subf %556, %555 : vector<8x64xf32>
    %558 = math.exp %557 : vector<8x64xf32>
    %cst_224 = arith.constant 1.000000e+00 : f32
    %559 = vector.broadcast %cst_224 : f32 to vector<8x64xf32>
    %560 = arith.addf %559, %558 : vector<8x64xf32>
    %cst_225 = arith.constant 1.000000e+00 : f32
    %561 = vector.broadcast %cst_225 : f32 to vector<8x64xf32>
    %562 = arith.divf %561, %560 : vector<8x64xf32>
    %563 = vector.extract_strided_slice %546 {offsets = [0, 128], sizes = [8, 64], strides = [1, 1]} : vector<8x256xf32> to vector<8x64xf32>
    %564 = math.tanh %563 : vector<8x64xf32>
    %565 = vector.extract_strided_slice %546 {offsets = [0, 192], sizes = [8, 64], strides = [1, 1]} : vector<8x256xf32> to vector<8x64xf32>
    %cst_226 = arith.constant 0.000000e+00 : f32
    %566 = vector.broadcast %cst_226 : f32 to vector<8x64xf32>
    %567 = arith.subf %566, %565 : vector<8x64xf32>
    %568 = math.exp %567 : vector<8x64xf32>
    %cst_227 = arith.constant 1.000000e+00 : f32
    %569 = vector.broadcast %cst_227 : f32 to vector<8x64xf32>
    %570 = arith.addf %569, %568 : vector<8x64xf32>
    %cst_228 = arith.constant 1.000000e+00 : f32
    %571 = vector.broadcast %cst_228 : f32 to vector<8x64xf32>
    %572 = arith.divf %571, %570 : vector<8x64xf32>
    %573 = arith.mulf %562, %505 : vector<8x64xf32>
    %574 = arith.mulf %554, %564 : vector<8x64xf32>
    %575 = arith.addf %573, %574 : vector<8x64xf32>
    %576 = math.tanh %575 : vector<8x64xf32>
    %577 = arith.mulf %572, %576 : vector<8x64xf32>
    %c64_229 = arith.constant 64 : index
    %c64_230 = arith.constant 64 : index
    %578 = vector.load %arg8[%c64_229, %c64_230] : memref<128x128xf32, #tpu.memory_space<vmem>>, vector<8x64xf32>
    tpu.vector_store %arg8[%c64_229, %c64_230], %577 {strides = array<i32>} : memref<128x128xf32, #tpu.memory_space<vmem>>, vector<8x64xf32>,
    %c64_231 = arith.constant 64 : index
    %c0_232 = arith.constant 0 : index
    %579 = vector.load %arg11[%c64_231, %c0_232] : memref<128x256xf32, #tpu.memory_space<vmem>>, vector<8x256xf32>
    %cst_233 = arith.constant dense<0.000000e+00> : vector<8x256xf32>
    %580 = tpu.matmul %542, %13, %cst_233 {dimension_numbers = #tpu.dot_dimension_numbers<[1], [0], [0], [1], [0, 0, 1, 1], [], []>} : vector<8x64xf32>, vector<64x256xf32>, vector<8x256xf32> -> vector<8x256xf32>
    %581 = arith.addf %579, %580 : vector<8x256xf32>
    %582 = vector.extract_strided_slice %581 {offsets = [0, 0], sizes = [8, 64], strides = [1, 1]} : vector<8x256xf32> to vector<8x64xf32>
    %cst_234 = arith.constant 0.000000e+00 : f32
    %583 = vector.broadcast %cst_234 : f32 to vector<8x64xf32>
    %584 = arith.subf %583, %582 : vector<8x64xf32>
    %585 = math.exp %584 : vector<8x64xf32>
    %cst_235 = arith.constant 1.000000e+00 : f32
    %586 = vector.broadcast %cst_235 : f32 to vector<8x64xf32>
    %587 = arith.addf %586, %585 : vector<8x64xf32>
    %cst_236 = arith.constant 1.000000e+00 : f32
    %588 = vector.broadcast %cst_236 : f32 to vector<8x64xf32>
    %589 = arith.divf %588, %587 : vector<8x64xf32>
    %590 = vector.extract_strided_slice %581 {offsets = [0, 64], sizes = [8, 64], strides = [1, 1]} : vector<8x256xf32> to vector<8x64xf32>
    %cst_237 = arith.constant 0.000000e+00 : f32
    %591 = vector.broadcast %cst_237 : f32 to vector<8x64xf32>
    %592 = arith.subf %591, %590 : vector<8x64xf32>
    %593 = math.exp %592 : vector<8x64xf32>
    %cst_238 = arith.constant 1.000000e+00 : f32
    %594 = vector.broadcast %cst_238 : f32 to vector<8x64xf32>
    %595 = arith.addf %594, %593 : vector<8x64xf32>
    %cst_239 = arith.constant 1.000000e+00 : f32
    %596 = vector.broadcast %cst_239 : f32 to vector<8x64xf32>
    %597 = arith.divf %596, %595 : vector<8x64xf32>
    %598 = vector.extract_strided_slice %581 {offsets = [0, 128], sizes = [8, 64], strides = [1, 1]} : vector<8x256xf32> to vector<8x64xf32>
    %599 = math.tanh %598 : vector<8x64xf32>
    %600 = vector.extract_strided_slice %581 {offsets = [0, 192], sizes = [8, 64], strides = [1, 1]} : vector<8x256xf32> to vector<8x64xf32>
    %cst_240 = arith.constant 0.000000e+00 : f32
    %601 = vector.broadcast %cst_240 : f32 to vector<8x64xf32>
    %602 = arith.subf %601, %600 : vector<8x64xf32>
    %603 = math.exp %602 : vector<8x64xf32>
    %cst_241 = arith.constant 1.000000e+00 : f32
    %604 = vector.broadcast %cst_241 : f32 to vector<8x64xf32>
    %605 = arith.addf %604, %603 : vector<8x64xf32>
    %cst_242 = arith.constant 1.000000e+00 : f32
    %606 = vector.broadcast %cst_242 : f32 to vector<8x64xf32>
    %607 = arith.divf %606, %605 : vector<8x64xf32>
    %608 = arith.mulf %597, %540 : vector<8x64xf32>
    %609 = arith.mulf %589, %599 : vector<8x64xf32>
    %610 = arith.addf %608, %609 : vector<8x64xf32>
    %611 = math.tanh %610 : vector<8x64xf32>
    %612 = arith.mulf %607, %611 : vector<8x64xf32>
    %c64_243 = arith.constant 64 : index
    %c0_244 = arith.constant 0 : index
    %613 = vector.load %arg8[%c64_243, %c0_244] : memref<128x128xf32, #tpu.memory_space<vmem>>, vector<8x64xf32>
    tpu.vector_store %arg8[%c64_243, %c0_244], %612 {strides = array<i32>} : memref<128x128xf32, #tpu.memory_space<vmem>>, vector<8x64xf32>,
    %c56_245 = arith.constant 56 : index
    %c0_246 = arith.constant 0 : index
    %614 = vector.load %arg12[%c56_245, %c0_246] : memref<128x256xf32, #tpu.memory_space<vmem>>, vector<8x256xf32>
    %cst_247 = arith.constant dense<0.000000e+00> : vector<8x256xf32>
    %615 = tpu.matmul %577, %14, %cst_247 {dimension_numbers = #tpu.dot_dimension_numbers<[1], [0], [0], [1], [0, 0, 1, 1], [], []>} : vector<8x64xf32>, vector<64x256xf32>, vector<8x256xf32> -> vector<8x256xf32>
    %616 = arith.addf %614, %615 : vector<8x256xf32>
    %617 = vector.extract_strided_slice %616 {offsets = [0, 0], sizes = [8, 64], strides = [1, 1]} : vector<8x256xf32> to vector<8x64xf32>
    %cst_248 = arith.constant 0.000000e+00 : f32
    %618 = vector.broadcast %cst_248 : f32 to vector<8x64xf32>
    %619 = arith.subf %618, %617 : vector<8x64xf32>
    %620 = math.exp %619 : vector<8x64xf32>
    %cst_249 = arith.constant 1.000000e+00 : f32
    %621 = vector.broadcast %cst_249 : f32 to vector<8x64xf32>
    %622 = arith.addf %621, %620 : vector<8x64xf32>
    %cst_250 = arith.constant 1.000000e+00 : f32
    %623 = vector.broadcast %cst_250 : f32 to vector<8x64xf32>
    %624 = arith.divf %623, %622 : vector<8x64xf32>
    %625 = vector.extract_strided_slice %616 {offsets = [0, 64], sizes = [8, 64], strides = [1, 1]} : vector<8x256xf32> to vector<8x64xf32>
    %cst_251 = arith.constant 0.000000e+00 : f32
    %626 = vector.broadcast %cst_251 : f32 to vector<8x64xf32>
    %627 = arith.subf %626, %625 : vector<8x64xf32>
    %628 = math.exp %627 : vector<8x64xf32>
    %cst_252 = arith.constant 1.000000e+00 : f32
    %629 = vector.broadcast %cst_252 : f32 to vector<8x64xf32>
    %630 = arith.addf %629, %628 : vector<8x64xf32>
    %cst_253 = arith.constant 1.000000e+00 : f32
    %631 = vector.broadcast %cst_253 : f32 to vector<8x64xf32>
    %632 = arith.divf %631, %630 : vector<8x64xf32>
    %633 = vector.extract_strided_slice %616 {offsets = [0, 128], sizes = [8, 64], strides = [1, 1]} : vector<8x256xf32> to vector<8x64xf32>
    %634 = math.tanh %633 : vector<8x64xf32>
    %635 = vector.extract_strided_slice %616 {offsets = [0, 192], sizes = [8, 64], strides = [1, 1]} : vector<8x256xf32> to vector<8x64xf32>
    %cst_254 = arith.constant 0.000000e+00 : f32
    %636 = vector.broadcast %cst_254 : f32 to vector<8x64xf32>
    %637 = arith.subf %636, %635 : vector<8x64xf32>
    %638 = math.exp %637 : vector<8x64xf32>
    %cst_255 = arith.constant 1.000000e+00 : f32
    %639 = vector.broadcast %cst_255 : f32 to vector<8x64xf32>
    %640 = arith.addf %639, %638 : vector<8x64xf32>
    %cst_256 = arith.constant 1.000000e+00 : f32
    %641 = vector.broadcast %cst_256 : f32 to vector<8x64xf32>
    %642 = arith.divf %641, %640 : vector<8x64xf32>
    %643 = arith.mulf %632, %575 : vector<8x64xf32>
    %644 = arith.mulf %624, %634 : vector<8x64xf32>
    %645 = arith.addf %643, %644 : vector<8x64xf32>
    %646 = math.tanh %645 : vector<8x64xf32>
    %647 = arith.mulf %642, %646 : vector<8x64xf32>
    %c56_257 = arith.constant 56 : index
    %c64_258 = arith.constant 64 : index
    %648 = vector.load %arg8[%c56_257, %c64_258] : memref<128x128xf32, #tpu.memory_space<vmem>>, vector<8x64xf32>
    tpu.vector_store %arg8[%c56_257, %c64_258], %647 {strides = array<i32>} : memref<128x128xf32, #tpu.memory_space<vmem>>, vector<8x64xf32>,
    %c72_259 = arith.constant 72 : index
    %c0_260 = arith.constant 0 : index
    %649 = vector.load %arg11[%c72_259, %c0_260] : memref<128x256xf32, #tpu.memory_space<vmem>>, vector<8x256xf32>
    %cst_261 = arith.constant dense<0.000000e+00> : vector<8x256xf32>
    %650 = tpu.matmul %612, %13, %cst_261 {dimension_numbers = #tpu.dot_dimension_numbers<[1], [0], [0], [1], [0, 0, 1, 1], [], []>} : vector<8x64xf32>, vector<64x256xf32>, vector<8x256xf32> -> vector<8x256xf32>
    %651 = arith.addf %649, %650 : vector<8x256xf32>
    %652 = vector.extract_strided_slice %651 {offsets = [0, 0], sizes = [8, 64], strides = [1, 1]} : vector<8x256xf32> to vector<8x64xf32>
    %cst_262 = arith.constant 0.000000e+00 : f32
    %653 = vector.broadcast %cst_262 : f32 to vector<8x64xf32>
    %654 = arith.subf %653, %652 : vector<8x64xf32>
    %655 = math.exp %654 : vector<8x64xf32>
    %cst_263 = arith.constant 1.000000e+00 : f32
    %656 = vector.broadcast %cst_263 : f32 to vector<8x64xf32>
    %657 = arith.addf %656, %655 : vector<8x64xf32>
    %cst_264 = arith.constant 1.000000e+00 : f32
    %658 = vector.broadcast %cst_264 : f32 to vector<8x64xf32>
    %659 = arith.divf %658, %657 : vector<8x64xf32>
    %660 = vector.extract_strided_slice %651 {offsets = [0, 64], sizes = [8, 64], strides = [1, 1]} : vector<8x256xf32> to vector<8x64xf32>
    %cst_265 = arith.constant 0.000000e+00 : f32
    %661 = vector.broadcast %cst_265 : f32 to vector<8x64xf32>
    %662 = arith.subf %661, %660 : vector<8x64xf32>
    %663 = math.exp %662 : vector<8x64xf32>
    %cst_266 = arith.constant 1.000000e+00 : f32
    %664 = vector.broadcast %cst_266 : f32 to vector<8x64xf32>
    %665 = arith.addf %664, %663 : vector<8x64xf32>
    %cst_267 = arith.constant 1.000000e+00 : f32
    %666 = vector.broadcast %cst_267 : f32 to vector<8x64xf32>
    %667 = arith.divf %666, %665 : vector<8x64xf32>
    %668 = vector.extract_strided_slice %651 {offsets = [0, 128], sizes = [8, 64], strides = [1, 1]} : vector<8x256xf32> to vector<8x64xf32>
    %669 = math.tanh %668 : vector<8x64xf32>
    %670 = vector.extract_strided_slice %651 {offsets = [0, 192], sizes = [8, 64], strides = [1, 1]} : vector<8x256xf32> to vector<8x64xf32>
    %cst_268 = arith.constant 0.000000e+00 : f32
    %671 = vector.broadcast %cst_268 : f32 to vector<8x64xf32>
    %672 = arith.subf %671, %670 : vector<8x64xf32>
    %673 = math.exp %672 : vector<8x64xf32>
    %cst_269 = arith.constant 1.000000e+00 : f32
    %674 = vector.broadcast %cst_269 : f32 to vector<8x64xf32>
    %675 = arith.addf %674, %673 : vector<8x64xf32>
    %cst_270 = arith.constant 1.000000e+00 : f32
    %676 = vector.broadcast %cst_270 : f32 to vector<8x64xf32>
    %677 = arith.divf %676, %675 : vector<8x64xf32>
    %678 = arith.mulf %667, %610 : vector<8x64xf32>
    %679 = arith.mulf %659, %669 : vector<8x64xf32>
    %680 = arith.addf %678, %679 : vector<8x64xf32>
    %681 = math.tanh %680 : vector<8x64xf32>
    %682 = arith.mulf %677, %681 : vector<8x64xf32>
    %c72_271 = arith.constant 72 : index
    %c0_272 = arith.constant 0 : index
    %683 = vector.load %arg8[%c72_271, %c0_272] : memref<128x128xf32, #tpu.memory_space<vmem>>, vector<8x64xf32>
    tpu.vector_store %arg8[%c72_271, %c0_272], %682 {strides = array<i32>} : memref<128x128xf32, #tpu.memory_space<vmem>>, vector<8x64xf32>,
    %c48_273 = arith.constant 48 : index
    %c0_274 = arith.constant 0 : index
    %684 = vector.load %arg12[%c48_273, %c0_274] : memref<128x256xf32, #tpu.memory_space<vmem>>, vector<8x256xf32>
    %cst_275 = arith.constant dense<0.000000e+00> : vector<8x256xf32>
    %685 = tpu.matmul %647, %14, %cst_275 {dimension_numbers = #tpu.dot_dimension_numbers<[1], [0], [0], [1], [0, 0, 1, 1], [], []>} : vector<8x64xf32>, vector<64x256xf32>, vector<8x256xf32> -> vector<8x256xf32>
    %686 = arith.addf %684, %685 : vector<8x256xf32>
    %687 = vector.extract_strided_slice %686 {offsets = [0, 0], sizes = [8, 64], strides = [1, 1]} : vector<8x256xf32> to vector<8x64xf32>
    %cst_276 = arith.constant 0.000000e+00 : f32
    %688 = vector.broadcast %cst_276 : f32 to vector<8x64xf32>
    %689 = arith.subf %688, %687 : vector<8x64xf32>
    %690 = math.exp %689 : vector<8x64xf32>
    %cst_277 = arith.constant 1.000000e+00 : f32
    %691 = vector.broadcast %cst_277 : f32 to vector<8x64xf32>
    %692 = arith.addf %691, %690 : vector<8x64xf32>
    %cst_278 = arith.constant 1.000000e+00 : f32
    %693 = vector.broadcast %cst_278 : f32 to vector<8x64xf32>
    %694 = arith.divf %693, %692 : vector<8x64xf32>
    %695 = vector.extract_strided_slice %686 {offsets = [0, 64], sizes = [8, 64], strides = [1, 1]} : vector<8x256xf32> to vector<8x64xf32>
    %cst_279 = arith.constant 0.000000e+00 : f32
    %696 = vector.broadcast %cst_279 : f32 to vector<8x64xf32>
    %697 = arith.subf %696, %695 : vector<8x64xf32>
    %698 = math.exp %697 : vector<8x64xf32>
    %cst_280 = arith.constant 1.000000e+00 : f32
    %699 = vector.broadcast %cst_280 : f32 to vector<8x64xf32>
    %700 = arith.addf %699, %698 : vector<8x64xf32>
    %cst_281 = arith.constant 1.000000e+00 : f32
    %701 = vector.broadcast %cst_281 : f32 to vector<8x64xf32>
    %702 = arith.divf %701, %700 : vector<8x64xf32>
    %703 = vector.extract_strided_slice %686 {offsets = [0, 128], sizes = [8, 64], strides = [1, 1]} : vector<8x256xf32> to vector<8x64xf32>
    %704 = math.tanh %703 : vector<8x64xf32>
    %705 = vector.extract_strided_slice %686 {offsets = [0, 192], sizes = [8, 64], strides = [1, 1]} : vector<8x256xf32> to vector<8x64xf32>
    %cst_282 = arith.constant 0.000000e+00 : f32
    %706 = vector.broadcast %cst_282 : f32 to vector<8x64xf32>
    %707 = arith.subf %706, %705 : vector<8x64xf32>
    %708 = math.exp %707 : vector<8x64xf32>
    %cst_283 = arith.constant 1.000000e+00 : f32
    %709 = vector.broadcast %cst_283 : f32 to vector<8x64xf32>
    %710 = arith.addf %709, %708 : vector<8x64xf32>
    %cst_284 = arith.constant 1.000000e+00 : f32
    %711 = vector.broadcast %cst_284 : f32 to vector<8x64xf32>
    %712 = arith.divf %711, %710 : vector<8x64xf32>
    %713 = arith.mulf %702, %645 : vector<8x64xf32>
    %714 = arith.mulf %694, %704 : vector<8x64xf32>
    %715 = arith.addf %713, %714 : vector<8x64xf32>
    %716 = math.tanh %715 : vector<8x64xf32>
    %717 = arith.mulf %712, %716 : vector<8x64xf32>
    %c48_285 = arith.constant 48 : index
    %c64_286 = arith.constant 64 : index
    %718 = vector.load %arg8[%c48_285, %c64_286] : memref<128x128xf32, #tpu.memory_space<vmem>>, vector<8x64xf32>
    tpu.vector_store %arg8[%c48_285, %c64_286], %717 {strides = array<i32>} : memref<128x128xf32, #tpu.memory_space<vmem>>, vector<8x64xf32>,
    %c80_287 = arith.constant 80 : index
    %c0_288 = arith.constant 0 : index
    %719 = vector.load %arg11[%c80_287, %c0_288] : memref<128x256xf32, #tpu.memory_space<vmem>>, vector<8x256xf32>
    %cst_289 = arith.constant dense<0.000000e+00> : vector<8x256xf32>
    %720 = tpu.matmul %682, %13, %cst_289 {dimension_numbers = #tpu.dot_dimension_numbers<[1], [0], [0], [1], [0, 0, 1, 1], [], []>} : vector<8x64xf32>, vector<64x256xf32>, vector<8x256xf32> -> vector<8x256xf32>
    %721 = arith.addf %719, %720 : vector<8x256xf32>
    %722 = vector.extract_strided_slice %721 {offsets = [0, 0], sizes = [8, 64], strides = [1, 1]} : vector<8x256xf32> to vector<8x64xf32>
    %cst_290 = arith.constant 0.000000e+00 : f32
    %723 = vector.broadcast %cst_290 : f32 to vector<8x64xf32>
    %724 = arith.subf %723, %722 : vector<8x64xf32>
    %725 = math.exp %724 : vector<8x64xf32>
    %cst_291 = arith.constant 1.000000e+00 : f32
    %726 = vector.broadcast %cst_291 : f32 to vector<8x64xf32>
    %727 = arith.addf %726, %725 : vector<8x64xf32>
    %cst_292 = arith.constant 1.000000e+00 : f32
    %728 = vector.broadcast %cst_292 : f32 to vector<8x64xf32>
    %729 = arith.divf %728, %727 : vector<8x64xf32>
    %730 = vector.extract_strided_slice %721 {offsets = [0, 64], sizes = [8, 64], strides = [1, 1]} : vector<8x256xf32> to vector<8x64xf32>
    %cst_293 = arith.constant 0.000000e+00 : f32
    %731 = vector.broadcast %cst_293 : f32 to vector<8x64xf32>
    %732 = arith.subf %731, %730 : vector<8x64xf32>
    %733 = math.exp %732 : vector<8x64xf32>
    %cst_294 = arith.constant 1.000000e+00 : f32
    %734 = vector.broadcast %cst_294 : f32 to vector<8x64xf32>
    %735 = arith.addf %734, %733 : vector<8x64xf32>
    %cst_295 = arith.constant 1.000000e+00 : f32
    %736 = vector.broadcast %cst_295 : f32 to vector<8x64xf32>
    %737 = arith.divf %736, %735 : vector<8x64xf32>
    %738 = vector.extract_strided_slice %721 {offsets = [0, 128], sizes = [8, 64], strides = [1, 1]} : vector<8x256xf32> to vector<8x64xf32>
    %739 = math.tanh %738 : vector<8x64xf32>
    %740 = vector.extract_strided_slice %721 {offsets = [0, 192], sizes = [8, 64], strides = [1, 1]} : vector<8x256xf32> to vector<8x64xf32>
    %cst_296 = arith.constant 0.000000e+00 : f32
    %741 = vector.broadcast %cst_296 : f32 to vector<8x64xf32>
    %742 = arith.subf %741, %740 : vector<8x64xf32>
    %743 = math.exp %742 : vector<8x64xf32>
    %cst_297 = arith.constant 1.000000e+00 : f32
    %744 = vector.broadcast %cst_297 : f32 to vector<8x64xf32>
    %745 = arith.addf %744, %743 : vector<8x64xf32>
    %cst_298 = arith.constant 1.000000e+00 : f32
    %746 = vector.broadcast %cst_298 : f32 to vector<8x64xf32>
    %747 = arith.divf %746, %745 : vector<8x64xf32>
    %748 = arith.mulf %737, %680 : vector<8x64xf32>
    %749 = arith.mulf %729, %739 : vector<8x64xf32>
    %750 = arith.addf %748, %749 : vector<8x64xf32>
    %751 = math.tanh %750 : vector<8x64xf32>
    %752 = arith.mulf %747, %751 : vector<8x64xf32>
    %c80_299 = arith.constant 80 : index
    %c0_300 = arith.constant 0 : index
    %753 = vector.load %arg8[%c80_299, %c0_300] : memref<128x128xf32, #tpu.memory_space<vmem>>, vector<8x64xf32>
    tpu.vector_store %arg8[%c80_299, %c0_300], %752 {strides = array<i32>} : memref<128x128xf32, #tpu.memory_space<vmem>>, vector<8x64xf32>,
    %c40_301 = arith.constant 40 : index
    %c0_302 = arith.constant 0 : index
    %754 = vector.load %arg12[%c40_301, %c0_302] : memref<128x256xf32, #tpu.memory_space<vmem>>, vector<8x256xf32>
    %cst_303 = arith.constant dense<0.000000e+00> : vector<8x256xf32>
    %755 = tpu.matmul %717, %14, %cst_303 {dimension_numbers = #tpu.dot_dimension_numbers<[1], [0], [0], [1], [0, 0, 1, 1], [], []>} : vector<8x64xf32>, vector<64x256xf32>, vector<8x256xf32> -> vector<8x256xf32>
    %756 = arith.addf %754, %755 : vector<8x256xf32>
    %757 = vector.extract_strided_slice %756 {offsets = [0, 0], sizes = [8, 64], strides = [1, 1]} : vector<8x256xf32> to vector<8x64xf32>
    %cst_304 = arith.constant 0.000000e+00 : f32
    %758 = vector.broadcast %cst_304 : f32 to vector<8x64xf32>
    %759 = arith.subf %758, %757 : vector<8x64xf32>
    %760 = math.exp %759 : vector<8x64xf32>
    %cst_305 = arith.constant 1.000000e+00 : f32
    %761 = vector.broadcast %cst_305 : f32 to vector<8x64xf32>
    %762 = arith.addf %761, %760 : vector<8x64xf32>
    %cst_306 = arith.constant 1.000000e+00 : f32
    %763 = vector.broadcast %cst_306 : f32 to vector<8x64xf32>
    %764 = arith.divf %763, %762 : vector<8x64xf32>
    %765 = vector.extract_strided_slice %756 {offsets = [0, 64], sizes = [8, 64], strides = [1, 1]} : vector<8x256xf32> to vector<8x64xf32>
    %cst_307 = arith.constant 0.000000e+00 : f32
    %766 = vector.broadcast %cst_307 : f32 to vector<8x64xf32>
    %767 = arith.subf %766, %765 : vector<8x64xf32>
    %768 = math.exp %767 : vector<8x64xf32>
    %cst_308 = arith.constant 1.000000e+00 : f32
    %769 = vector.broadcast %cst_308 : f32 to vector<8x64xf32>
    %770 = arith.addf %769, %768 : vector<8x64xf32>
    %cst_309 = arith.constant 1.000000e+00 : f32
    %771 = vector.broadcast %cst_309 : f32 to vector<8x64xf32>
    %772 = arith.divf %771, %770 : vector<8x64xf32>
    %773 = vector.extract_strided_slice %756 {offsets = [0, 128], sizes = [8, 64], strides = [1, 1]} : vector<8x256xf32> to vector<8x64xf32>
    %774 = math.tanh %773 : vector<8x64xf32>
    %775 = vector.extract_strided_slice %756 {offsets = [0, 192], sizes = [8, 64], strides = [1, 1]} : vector<8x256xf32> to vector<8x64xf32>
    %cst_310 = arith.constant 0.000000e+00 : f32
    %776 = vector.broadcast %cst_310 : f32 to vector<8x64xf32>
    %777 = arith.subf %776, %775 : vector<8x64xf32>
    %778 = math.exp %777 : vector<8x64xf32>
    %cst_311 = arith.constant 1.000000e+00 : f32
    %779 = vector.broadcast %cst_311 : f32 to vector<8x64xf32>
    %780 = arith.addf %779, %778 : vector<8x64xf32>
    %cst_312 = arith.constant 1.000000e+00 : f32
    %781 = vector.broadcast %cst_312 : f32 to vector<8x64xf32>
    %782 = arith.divf %781, %780 : vector<8x64xf32>
    %783 = arith.mulf %772, %715 : vector<8x64xf32>
    %784 = arith.mulf %764, %774 : vector<8x64xf32>
    %785 = arith.addf %783, %784 : vector<8x64xf32>
    %786 = math.tanh %785 : vector<8x64xf32>
    %787 = arith.mulf %782, %786 : vector<8x64xf32>
    %c40_313 = arith.constant 40 : index
    %c64_314 = arith.constant 64 : index
    %788 = vector.load %arg8[%c40_313, %c64_314] : memref<128x128xf32, #tpu.memory_space<vmem>>, vector<8x64xf32>
    tpu.vector_store %arg8[%c40_313, %c64_314], %787 {strides = array<i32>} : memref<128x128xf32, #tpu.memory_space<vmem>>, vector<8x64xf32>,
    %c88_315 = arith.constant 88 : index
    %c0_316 = arith.constant 0 : index
    %789 = vector.load %arg11[%c88_315, %c0_316] : memref<128x256xf32, #tpu.memory_space<vmem>>, vector<8x256xf32>
    %cst_317 = arith.constant dense<0.000000e+00> : vector<8x256xf32>
    %790 = tpu.matmul %752, %13, %cst_317 {dimension_numbers = #tpu.dot_dimension_numbers<[1], [0], [0], [1], [0, 0, 1, 1], [], []>} : vector<8x64xf32>, vector<64x256xf32>, vector<8x256xf32> -> vector<8x256xf32>
    %791 = arith.addf %789, %790 : vector<8x256xf32>
    %792 = vector.extract_strided_slice %791 {offsets = [0, 0], sizes = [8, 64], strides = [1, 1]} : vector<8x256xf32> to vector<8x64xf32>
    %cst_318 = arith.constant 0.000000e+00 : f32
    %793 = vector.broadcast %cst_318 : f32 to vector<8x64xf32>
    %794 = arith.subf %793, %792 : vector<8x64xf32>
    %795 = math.exp %794 : vector<8x64xf32>
    %cst_319 = arith.constant 1.000000e+00 : f32
    %796 = vector.broadcast %cst_319 : f32 to vector<8x64xf32>
    %797 = arith.addf %796, %795 : vector<8x64xf32>
    %cst_320 = arith.constant 1.000000e+00 : f32
    %798 = vector.broadcast %cst_320 : f32 to vector<8x64xf32>
    %799 = arith.divf %798, %797 : vector<8x64xf32>
    %800 = vector.extract_strided_slice %791 {offsets = [0, 64], sizes = [8, 64], strides = [1, 1]} : vector<8x256xf32> to vector<8x64xf32>
    %cst_321 = arith.constant 0.000000e+00 : f32
    %801 = vector.broadcast %cst_321 : f32 to vector<8x64xf32>
    %802 = arith.subf %801, %800 : vector<8x64xf32>
    %803 = math.exp %802 : vector<8x64xf32>
    %cst_322 = arith.constant 1.000000e+00 : f32
    %804 = vector.broadcast %cst_322 : f32 to vector<8x64xf32>
    %805 = arith.addf %804, %803 : vector<8x64xf32>
    %cst_323 = arith.constant 1.000000e+00 : f32
    %806 = vector.broadcast %cst_323 : f32 to vector<8x64xf32>
    %807 = arith.divf %806, %805 : vector<8x64xf32>
    %808 = vector.extract_strided_slice %791 {offsets = [0, 128], sizes = [8, 64], strides = [1, 1]} : vector<8x256xf32> to vector<8x64xf32>
    %809 = math.tanh %808 : vector<8x64xf32>
    %810 = vector.extract_strided_slice %791 {offsets = [0, 192], sizes = [8, 64], strides = [1, 1]} : vector<8x256xf32> to vector<8x64xf32>
    %cst_324 = arith.constant 0.000000e+00 : f32
    %811 = vector.broadcast %cst_324 : f32 to vector<8x64xf32>
    %812 = arith.subf %811, %810 : vector<8x64xf32>
    %813 = math.exp %812 : vector<8x64xf32>
    %cst_325 = arith.constant 1.000000e+00 : f32
    %814 = vector.broadcast %cst_325 : f32 to vector<8x64xf32>
    %815 = arith.addf %814, %813 : vector<8x64xf32>
    %cst_326 = arith.constant 1.000000e+00 : f32
    %816 = vector.broadcast %cst_326 : f32 to vector<8x64xf32>
    %817 = arith.divf %816, %815 : vector<8x64xf32>
    %818 = arith.mulf %807, %750 : vector<8x64xf32>
    %819 = arith.mulf %799, %809 : vector<8x64xf32>
    %820 = arith.addf %818, %819 : vector<8x64xf32>
    %821 = math.tanh %820 : vector<8x64xf32>
    %822 = arith.mulf %817, %821 : vector<8x64xf32>
    %c88_327 = arith.constant 88 : index
    %c0_328 = arith.constant 0 : index
    %823 = vector.load %arg8[%c88_327, %c0_328] : memref<128x128xf32, #tpu.memory_space<vmem>>, vector<8x64xf32>
    tpu.vector_store %arg8[%c88_327, %c0_328], %822 {strides = array<i32>} : memref<128x128xf32, #tpu.memory_space<vmem>>, vector<8x64xf32>,
    %c32_329 = arith.constant 32 : index
    %c0_330 = arith.constant 0 : index
    %824 = vector.load %arg12[%c32_329, %c0_330] : memref<128x256xf32, #tpu.memory_space<vmem>>, vector<8x256xf32>
    %cst_331 = arith.constant dense<0.000000e+00> : vector<8x256xf32>
    %825 = tpu.matmul %787, %14, %cst_331 {dimension_numbers = #tpu.dot_dimension_numbers<[1], [0], [0], [1], [0, 0, 1, 1], [], []>} : vector<8x64xf32>, vector<64x256xf32>, vector<8x256xf32> -> vector<8x256xf32>
    %826 = arith.addf %824, %825 : vector<8x256xf32>
    %827 = vector.extract_strided_slice %826 {offsets = [0, 0], sizes = [8, 64], strides = [1, 1]} : vector<8x256xf32> to vector<8x64xf32>
    %cst_332 = arith.constant 0.000000e+00 : f32
    %828 = vector.broadcast %cst_332 : f32 to vector<8x64xf32>
    %829 = arith.subf %828, %827 : vector<8x64xf32>
    %830 = math.exp %829 : vector<8x64xf32>
    %cst_333 = arith.constant 1.000000e+00 : f32
    %831 = vector.broadcast %cst_333 : f32 to vector<8x64xf32>
    %832 = arith.addf %831, %830 : vector<8x64xf32>
    %cst_334 = arith.constant 1.000000e+00 : f32
    %833 = vector.broadcast %cst_334 : f32 to vector<8x64xf32>
    %834 = arith.divf %833, %832 : vector<8x64xf32>
    %835 = vector.extract_strided_slice %826 {offsets = [0, 64], sizes = [8, 64], strides = [1, 1]} : vector<8x256xf32> to vector<8x64xf32>
    %cst_335 = arith.constant 0.000000e+00 : f32
    %836 = vector.broadcast %cst_335 : f32 to vector<8x64xf32>
    %837 = arith.subf %836, %835 : vector<8x64xf32>
    %838 = math.exp %837 : vector<8x64xf32>
    %cst_336 = arith.constant 1.000000e+00 : f32
    %839 = vector.broadcast %cst_336 : f32 to vector<8x64xf32>
    %840 = arith.addf %839, %838 : vector<8x64xf32>
    %cst_337 = arith.constant 1.000000e+00 : f32
    %841 = vector.broadcast %cst_337 : f32 to vector<8x64xf32>
    %842 = arith.divf %841, %840 : vector<8x64xf32>
    %843 = vector.extract_strided_slice %826 {offsets = [0, 128], sizes = [8, 64], strides = [1, 1]} : vector<8x256xf32> to vector<8x64xf32>
    %844 = math.tanh %843 : vector<8x64xf32>
    %845 = vector.extract_strided_slice %826 {offsets = [0, 192], sizes = [8, 64], strides = [1, 1]} : vector<8x256xf32> to vector<8x64xf32>
    %cst_338 = arith.constant 0.000000e+00 : f32
    %846 = vector.broadcast %cst_338 : f32 to vector<8x64xf32>
    %847 = arith.subf %846, %845 : vector<8x64xf32>
    %848 = math.exp %847 : vector<8x64xf32>
    %cst_339 = arith.constant 1.000000e+00 : f32
    %849 = vector.broadcast %cst_339 : f32 to vector<8x64xf32>
    %850 = arith.addf %849, %848 : vector<8x64xf32>
    %cst_340 = arith.constant 1.000000e+00 : f32
    %851 = vector.broadcast %cst_340 : f32 to vector<8x64xf32>
    %852 = arith.divf %851, %850 : vector<8x64xf32>
    %853 = arith.mulf %842, %785 : vector<8x64xf32>
    %854 = arith.mulf %834, %844 : vector<8x64xf32>
    %855 = arith.addf %853, %854 : vector<8x64xf32>
    %856 = math.tanh %855 : vector<8x64xf32>
    %857 = arith.mulf %852, %856 : vector<8x64xf32>
    %c32_341 = arith.constant 32 : index
    %c64_342 = arith.constant 64 : index
    %858 = vector.load %arg8[%c32_341, %c64_342] : memref<128x128xf32, #tpu.memory_space<vmem>>, vector<8x64xf32>
    tpu.vector_store %arg8[%c32_341, %c64_342], %857 {strides = array<i32>} : memref<128x128xf32, #tpu.memory_space<vmem>>, vector<8x64xf32>,
    %c96_343 = arith.constant 96 : index
    %c0_344 = arith.constant 0 : index
    %859 = vector.load %arg11[%c96_343, %c0_344] : memref<128x256xf32, #tpu.memory_space<vmem>>, vector<8x256xf32>
    %cst_345 = arith.constant dense<0.000000e+00> : vector<8x256xf32>
    %860 = tpu.matmul %822, %13, %cst_345 {dimension_numbers = #tpu.dot_dimension_numbers<[1], [0], [0], [1], [0, 0, 1, 1], [], []>} : vector<8x64xf32>, vector<64x256xf32>, vector<8x256xf32> -> vector<8x256xf32>
    %861 = arith.addf %859, %860 : vector<8x256xf32>
    %862 = vector.extract_strided_slice %861 {offsets = [0, 0], sizes = [8, 64], strides = [1, 1]} : vector<8x256xf32> to vector<8x64xf32>
    %cst_346 = arith.constant 0.000000e+00 : f32
    %863 = vector.broadcast %cst_346 : f32 to vector<8x64xf32>
    %864 = arith.subf %863, %862 : vector<8x64xf32>
    %865 = math.exp %864 : vector<8x64xf32>
    %cst_347 = arith.constant 1.000000e+00 : f32
    %866 = vector.broadcast %cst_347 : f32 to vector<8x64xf32>
    %867 = arith.addf %866, %865 : vector<8x64xf32>
    %cst_348 = arith.constant 1.000000e+00 : f32
    %868 = vector.broadcast %cst_348 : f32 to vector<8x64xf32>
    %869 = arith.divf %868, %867 : vector<8x64xf32>
    %870 = vector.extract_strided_slice %861 {offsets = [0, 64], sizes = [8, 64], strides = [1, 1]} : vector<8x256xf32> to vector<8x64xf32>
    %cst_349 = arith.constant 0.000000e+00 : f32
    %871 = vector.broadcast %cst_349 : f32 to vector<8x64xf32>
    %872 = arith.subf %871, %870 : vector<8x64xf32>
    %873 = math.exp %872 : vector<8x64xf32>
    %cst_350 = arith.constant 1.000000e+00 : f32
    %874 = vector.broadcast %cst_350 : f32 to vector<8x64xf32>
    %875 = arith.addf %874, %873 : vector<8x64xf32>
    %cst_351 = arith.constant 1.000000e+00 : f32
    %876 = vector.broadcast %cst_351 : f32 to vector<8x64xf32>
    %877 = arith.divf %876, %875 : vector<8x64xf32>
    %878 = vector.extract_strided_slice %861 {offsets = [0, 128], sizes = [8, 64], strides = [1, 1]} : vector<8x256xf32> to vector<8x64xf32>
    %879 = math.tanh %878 : vector<8x64xf32>
    %880 = vector.extract_strided_slice %861 {offsets = [0, 192], sizes = [8, 64], strides = [1, 1]} : vector<8x256xf32> to vector<8x64xf32>
    %cst_352 = arith.constant 0.000000e+00 : f32
    %881 = vector.broadcast %cst_352 : f32 to vector<8x64xf32>
    %882 = arith.subf %881, %880 : vector<8x64xf32>
    %883 = math.exp %882 : vector<8x64xf32>
    %cst_353 = arith.constant 1.000000e+00 : f32
    %884 = vector.broadcast %cst_353 : f32 to vector<8x64xf32>
    %885 = arith.addf %884, %883 : vector<8x64xf32>
    %cst_354 = arith.constant 1.000000e+00 : f32
    %886 = vector.broadcast %cst_354 : f32 to vector<8x64xf32>
    %887 = arith.divf %886, %885 : vector<8x64xf32>
    %888 = arith.mulf %877, %820 : vector<8x64xf32>
    %889 = arith.mulf %869, %879 : vector<8x64xf32>
    %890 = arith.addf %888, %889 : vector<8x64xf32>
    %891 = math.tanh %890 : vector<8x64xf32>
    %892 = arith.mulf %887, %891 : vector<8x64xf32>
    %c96_355 = arith.constant 96 : index
    %c0_356 = arith.constant 0 : index
    %893 = vector.load %arg8[%c96_355, %c0_356] : memref<128x128xf32, #tpu.memory_space<vmem>>, vector<8x64xf32>
    tpu.vector_store %arg8[%c96_355, %c0_356], %892 {strides = array<i32>} : memref<128x128xf32, #tpu.memory_space<vmem>>, vector<8x64xf32>,
    %c24_357 = arith.constant 24 : index
    %c0_358 = arith.constant 0 : index
    %894 = vector.load %arg12[%c24_357, %c0_358] : memref<128x256xf32, #tpu.memory_space<vmem>>, vector<8x256xf32>
    %cst_359 = arith.constant dense<0.000000e+00> : vector<8x256xf32>
    %895 = tpu.matmul %857, %14, %cst_359 {dimension_numbers = #tpu.dot_dimension_numbers<[1], [0], [0], [1], [0, 0, 1, 1], [], []>} : vector<8x64xf32>, vector<64x256xf32>, vector<8x256xf32> -> vector<8x256xf32>
    %896 = arith.addf %894, %895 : vector<8x256xf32>
    %897 = vector.extract_strided_slice %896 {offsets = [0, 0], sizes = [8, 64], strides = [1, 1]} : vector<8x256xf32> to vector<8x64xf32>
    %cst_360 = arith.constant 0.000000e+00 : f32
    %898 = vector.broadcast %cst_360 : f32 to vector<8x64xf32>
    %899 = arith.subf %898, %897 : vector<8x64xf32>
    %900 = math.exp %899 : vector<8x64xf32>
    %cst_361 = arith.constant 1.000000e+00 : f32
    %901 = vector.broadcast %cst_361 : f32 to vector<8x64xf32>
    %902 = arith.addf %901, %900 : vector<8x64xf32>
    %cst_362 = arith.constant 1.000000e+00 : f32
    %903 = vector.broadcast %cst_362 : f32 to vector<8x64xf32>
    %904 = arith.divf %903, %902 : vector<8x64xf32>
    %905 = vector.extract_strided_slice %896 {offsets = [0, 64], sizes = [8, 64], strides = [1, 1]} : vector<8x256xf32> to vector<8x64xf32>
    %cst_363 = arith.constant 0.000000e+00 : f32
    %906 = vector.broadcast %cst_363 : f32 to vector<8x64xf32>
    %907 = arith.subf %906, %905 : vector<8x64xf32>
    %908 = math.exp %907 : vector<8x64xf32>
    %cst_364 = arith.constant 1.000000e+00 : f32
    %909 = vector.broadcast %cst_364 : f32 to vector<8x64xf32>
    %910 = arith.addf %909, %908 : vector<8x64xf32>
    %cst_365 = arith.constant 1.000000e+00 : f32
    %911 = vector.broadcast %cst_365 : f32 to vector<8x64xf32>
    %912 = arith.divf %911, %910 : vector<8x64xf32>
    %913 = vector.extract_strided_slice %896 {offsets = [0, 128], sizes = [8, 64], strides = [1, 1]} : vector<8x256xf32> to vector<8x64xf32>
    %914 = math.tanh %913 : vector<8x64xf32>
    %915 = vector.extract_strided_slice %896 {offsets = [0, 192], sizes = [8, 64], strides = [1, 1]} : vector<8x256xf32> to vector<8x64xf32>
    %cst_366 = arith.constant 0.000000e+00 : f32
    %916 = vector.broadcast %cst_366 : f32 to vector<8x64xf32>
    %917 = arith.subf %916, %915 : vector<8x64xf32>
    %918 = math.exp %917 : vector<8x64xf32>
    %cst_367 = arith.constant 1.000000e+00 : f32
    %919 = vector.broadcast %cst_367 : f32 to vector<8x64xf32>
    %920 = arith.addf %919, %918 : vector<8x64xf32>
    %cst_368 = arith.constant 1.000000e+00 : f32
    %921 = vector.broadcast %cst_368 : f32 to vector<8x64xf32>
    %922 = arith.divf %921, %920 : vector<8x64xf32>
    %923 = arith.mulf %912, %855 : vector<8x64xf32>
    %924 = arith.mulf %904, %914 : vector<8x64xf32>
    %925 = arith.addf %923, %924 : vector<8x64xf32>
    %926 = math.tanh %925 : vector<8x64xf32>
    %927 = arith.mulf %922, %926 : vector<8x64xf32>
    %c24_369 = arith.constant 24 : index
    %c64_370 = arith.constant 64 : index
    %928 = vector.load %arg8[%c24_369, %c64_370] : memref<128x128xf32, #tpu.memory_space<vmem>>, vector<8x64xf32>
    tpu.vector_store %arg8[%c24_369, %c64_370], %927 {strides = array<i32>} : memref<128x128xf32, #tpu.memory_space<vmem>>, vector<8x64xf32>,
    %c104_371 = arith.constant 104 : index
    %c0_372 = arith.constant 0 : index
    %929 = vector.load %arg11[%c104_371, %c0_372] : memref<128x256xf32, #tpu.memory_space<vmem>>, vector<8x256xf32>
    %cst_373 = arith.constant dense<0.000000e+00> : vector<8x256xf32>
    %930 = tpu.matmul %892, %13, %cst_373 {dimension_numbers = #tpu.dot_dimension_numbers<[1], [0], [0], [1], [0, 0, 1, 1], [], []>} : vector<8x64xf32>, vector<64x256xf32>, vector<8x256xf32> -> vector<8x256xf32>
    %931 = arith.addf %929, %930 : vector<8x256xf32>
    %932 = vector.extract_strided_slice %931 {offsets = [0, 0], sizes = [8, 64], strides = [1, 1]} : vector<8x256xf32> to vector<8x64xf32>
    %cst_374 = arith.constant 0.000000e+00 : f32
    %933 = vector.broadcast %cst_374 : f32 to vector<8x64xf32>
    %934 = arith.subf %933, %932 : vector<8x64xf32>
    %935 = math.exp %934 : vector<8x64xf32>
    %cst_375 = arith.constant 1.000000e+00 : f32
    %936 = vector.broadcast %cst_375 : f32 to vector<8x64xf32>
    %937 = arith.addf %936, %935 : vector<8x64xf32>
    %cst_376 = arith.constant 1.000000e+00 : f32
    %938 = vector.broadcast %cst_376 : f32 to vector<8x64xf32>
    %939 = arith.divf %938, %937 : vector<8x64xf32>
    %940 = vector.extract_strided_slice %931 {offsets = [0, 64], sizes = [8, 64], strides = [1, 1]} : vector<8x256xf32> to vector<8x64xf32>
    %cst_377 = arith.constant 0.000000e+00 : f32
    %941 = vector.broadcast %cst_377 : f32 to vector<8x64xf32>
    %942 = arith.subf %941, %940 : vector<8x64xf32>
    %943 = math.exp %942 : vector<8x64xf32>
    %cst_378 = arith.constant 1.000000e+00 : f32
    %944 = vector.broadcast %cst_378 : f32 to vector<8x64xf32>
    %945 = arith.addf %944, %943 : vector<8x64xf32>
    %cst_379 = arith.constant 1.000000e+00 : f32
    %946 = vector.broadcast %cst_379 : f32 to vector<8x64xf32>
    %947 = arith.divf %946, %945 : vector<8x64xf32>
    %948 = vector.extract_strided_slice %931 {offsets = [0, 128], sizes = [8, 64], strides = [1, 1]} : vector<8x256xf32> to vector<8x64xf32>
    %949 = math.tanh %948 : vector<8x64xf32>
    %950 = vector.extract_strided_slice %931 {offsets = [0, 192], sizes = [8, 64], strides = [1, 1]} : vector<8x256xf32> to vector<8x64xf32>
    %cst_380 = arith.constant 0.000000e+00 : f32
    %951 = vector.broadcast %cst_380 : f32 to vector<8x64xf32>
    %952 = arith.subf %951, %950 : vector<8x64xf32>
    %953 = math.exp %952 : vector<8x64xf32>
    %cst_381 = arith.constant 1.000000e+00 : f32
    %954 = vector.broadcast %cst_381 : f32 to vector<8x64xf32>
    %955 = arith.addf %954, %953 : vector<8x64xf32>
    %cst_382 = arith.constant 1.000000e+00 : f32
    %956 = vector.broadcast %cst_382 : f32 to vector<8x64xf32>
    %957 = arith.divf %956, %955 : vector<8x64xf32>
    %958 = arith.mulf %947, %890 : vector<8x64xf32>
    %959 = arith.mulf %939, %949 : vector<8x64xf32>
    %960 = arith.addf %958, %959 : vector<8x64xf32>
    %961 = math.tanh %960 : vector<8x64xf32>
    %962 = arith.mulf %957, %961 : vector<8x64xf32>
    %c104_383 = arith.constant 104 : index
    %c0_384 = arith.constant 0 : index
    %963 = vector.load %arg8[%c104_383, %c0_384] : memref<128x128xf32, #tpu.memory_space<vmem>>, vector<8x64xf32>
    tpu.vector_store %arg8[%c104_383, %c0_384], %962 {strides = array<i32>} : memref<128x128xf32, #tpu.memory_space<vmem>>, vector<8x64xf32>,
    %c16_385 = arith.constant 16 : index
    %c0_386 = arith.constant 0 : index
    %964 = vector.load %arg12[%c16_385, %c0_386] : memref<128x256xf32, #tpu.memory_space<vmem>>, vector<8x256xf32>
    %cst_387 = arith.constant dense<0.000000e+00> : vector<8x256xf32>
    %965 = tpu.matmul %927, %14, %cst_387 {dimension_numbers = #tpu.dot_dimension_numbers<[1], [0], [0], [1], [0, 0, 1, 1], [], []>} : vector<8x64xf32>, vector<64x256xf32>, vector<8x256xf32> -> vector<8x256xf32>
    %966 = arith.addf %964, %965 : vector<8x256xf32>
    %967 = vector.extract_strided_slice %966 {offsets = [0, 0], sizes = [8, 64], strides = [1, 1]} : vector<8x256xf32> to vector<8x64xf32>
    %cst_388 = arith.constant 0.000000e+00 : f32
    %968 = vector.broadcast %cst_388 : f32 to vector<8x64xf32>
    %969 = arith.subf %968, %967 : vector<8x64xf32>
    %970 = math.exp %969 : vector<8x64xf32>
    %cst_389 = arith.constant 1.000000e+00 : f32
    %971 = vector.broadcast %cst_389 : f32 to vector<8x64xf32>
    %972 = arith.addf %971, %970 : vector<8x64xf32>
    %cst_390 = arith.constant 1.000000e+00 : f32
    %973 = vector.broadcast %cst_390 : f32 to vector<8x64xf32>
    %974 = arith.divf %973, %972 : vector<8x64xf32>
    %975 = vector.extract_strided_slice %966 {offsets = [0, 64], sizes = [8, 64], strides = [1, 1]} : vector<8x256xf32> to vector<8x64xf32>
    %cst_391 = arith.constant 0.000000e+00 : f32
    %976 = vector.broadcast %cst_391 : f32 to vector<8x64xf32>
    %977 = arith.subf %976, %975 : vector<8x64xf32>
    %978 = math.exp %977 : vector<8x64xf32>
    %cst_392 = arith.constant 1.000000e+00 : f32
    %979 = vector.broadcast %cst_392 : f32 to vector<8x64xf32>
    %980 = arith.addf %979, %978 : vector<8x64xf32>
    %cst_393 = arith.constant 1.000000e+00 : f32
    %981 = vector.broadcast %cst_393 : f32 to vector<8x64xf32>
    %982 = arith.divf %981, %980 : vector<8x64xf32>
    %983 = vector.extract_strided_slice %966 {offsets = [0, 128], sizes = [8, 64], strides = [1, 1]} : vector<8x256xf32> to vector<8x64xf32>
    %984 = math.tanh %983 : vector<8x64xf32>
    %985 = vector.extract_strided_slice %966 {offsets = [0, 192], sizes = [8, 64], strides = [1, 1]} : vector<8x256xf32> to vector<8x64xf32>
    %cst_394 = arith.constant 0.000000e+00 : f32
    %986 = vector.broadcast %cst_394 : f32 to vector<8x64xf32>
    %987 = arith.subf %986, %985 : vector<8x64xf32>
    %988 = math.exp %987 : vector<8x64xf32>
    %cst_395 = arith.constant 1.000000e+00 : f32
    %989 = vector.broadcast %cst_395 : f32 to vector<8x64xf32>
    %990 = arith.addf %989, %988 : vector<8x64xf32>
    %cst_396 = arith.constant 1.000000e+00 : f32
    %991 = vector.broadcast %cst_396 : f32 to vector<8x64xf32>
    %992 = arith.divf %991, %990 : vector<8x64xf32>
    %993 = arith.mulf %982, %925 : vector<8x64xf32>
    %994 = arith.mulf %974, %984 : vector<8x64xf32>
    %995 = arith.addf %993, %994 : vector<8x64xf32>
    %996 = math.tanh %995 : vector<8x64xf32>
    %997 = arith.mulf %992, %996 : vector<8x64xf32>
    %c16_397 = arith.constant 16 : index
    %c64_398 = arith.constant 64 : index
    %998 = vector.load %arg8[%c16_397, %c64_398] : memref<128x128xf32, #tpu.memory_space<vmem>>, vector<8x64xf32>
    tpu.vector_store %arg8[%c16_397, %c64_398], %997 {strides = array<i32>} : memref<128x128xf32, #tpu.memory_space<vmem>>, vector<8x64xf32>,
    %c112_399 = arith.constant 112 : index
    %c0_400 = arith.constant 0 : index
    %999 = vector.load %arg11[%c112_399, %c0_400] : memref<128x256xf32, #tpu.memory_space<vmem>>, vector<8x256xf32>
    %cst_401 = arith.constant dense<0.000000e+00> : vector<8x256xf32>
    %1000 = tpu.matmul %962, %13, %cst_401 {dimension_numbers = #tpu.dot_dimension_numbers<[1], [0], [0], [1], [0, 0, 1, 1], [], []>} : vector<8x64xf32>, vector<64x256xf32>, vector<8x256xf32> -> vector<8x256xf32>
    %1001 = arith.addf %999, %1000 : vector<8x256xf32>
    %1002 = vector.extract_strided_slice %1001 {offsets = [0, 0], sizes = [8, 64], strides = [1, 1]} : vector<8x256xf32> to vector<8x64xf32>
    %cst_402 = arith.constant 0.000000e+00 : f32
    %1003 = vector.broadcast %cst_402 : f32 to vector<8x64xf32>
    %1004 = arith.subf %1003, %1002 : vector<8x64xf32>
    %1005 = math.exp %1004 : vector<8x64xf32>
    %cst_403 = arith.constant 1.000000e+00 : f32
    %1006 = vector.broadcast %cst_403 : f32 to vector<8x64xf32>
    %1007 = arith.addf %1006, %1005 : vector<8x64xf32>
    %cst_404 = arith.constant 1.000000e+00 : f32
    %1008 = vector.broadcast %cst_404 : f32 to vector<8x64xf32>
    %1009 = arith.divf %1008, %1007 : vector<8x64xf32>
    %1010 = vector.extract_strided_slice %1001 {offsets = [0, 64], sizes = [8, 64], strides = [1, 1]} : vector<8x256xf32> to vector<8x64xf32>
    %cst_405 = arith.constant 0.000000e+00 : f32
    %1011 = vector.broadcast %cst_405 : f32 to vector<8x64xf32>
    %1012 = arith.subf %1011, %1010 : vector<8x64xf32>
    %1013 = math.exp %1012 : vector<8x64xf32>
    %cst_406 = arith.constant 1.000000e+00 : f32
    %1014 = vector.broadcast %cst_406 : f32 to vector<8x64xf32>
    %1015 = arith.addf %1014, %1013 : vector<8x64xf32>
    %cst_407 = arith.constant 1.000000e+00 : f32
    %1016 = vector.broadcast %cst_407 : f32 to vector<8x64xf32>
    %1017 = arith.divf %1016, %1015 : vector<8x64xf32>
    %1018 = vector.extract_strided_slice %1001 {offsets = [0, 128], sizes = [8, 64], strides = [1, 1]} : vector<8x256xf32> to vector<8x64xf32>
    %1019 = math.tanh %1018 : vector<8x64xf32>
    %1020 = vector.extract_strided_slice %1001 {offsets = [0, 192], sizes = [8, 64], strides = [1, 1]} : vector<8x256xf32> to vector<8x64xf32>
    %cst_408 = arith.constant 0.000000e+00 : f32
    %1021 = vector.broadcast %cst_408 : f32 to vector<8x64xf32>
    %1022 = arith.subf %1021, %1020 : vector<8x64xf32>
    %1023 = math.exp %1022 : vector<8x64xf32>
    %cst_409 = arith.constant 1.000000e+00 : f32
    %1024 = vector.broadcast %cst_409 : f32 to vector<8x64xf32>
    %1025 = arith.addf %1024, %1023 : vector<8x64xf32>
    %cst_410 = arith.constant 1.000000e+00 : f32
    %1026 = vector.broadcast %cst_410 : f32 to vector<8x64xf32>
    %1027 = arith.divf %1026, %1025 : vector<8x64xf32>
    %1028 = arith.mulf %1017, %960 : vector<8x64xf32>
    %1029 = arith.mulf %1009, %1019 : vector<8x64xf32>
    %1030 = arith.addf %1028, %1029 : vector<8x64xf32>
    %1031 = math.tanh %1030 : vector<8x64xf32>
    %1032 = arith.mulf %1027, %1031 : vector<8x64xf32>
    %c112_411 = arith.constant 112 : index
    %c0_412 = arith.constant 0 : index
    %1033 = vector.load %arg8[%c112_411, %c0_412] : memref<128x128xf32, #tpu.memory_space<vmem>>, vector<8x64xf32>
    tpu.vector_store %arg8[%c112_411, %c0_412], %1032 {strides = array<i32>} : memref<128x128xf32, #tpu.memory_space<vmem>>, vector<8x64xf32>,
    %c8_413 = arith.constant 8 : index
    %c0_414 = arith.constant 0 : index
    %1034 = vector.load %arg12[%c8_413, %c0_414] : memref<128x256xf32, #tpu.memory_space<vmem>>, vector<8x256xf32>
    %cst_415 = arith.constant dense<0.000000e+00> : vector<8x256xf32>
    %1035 = tpu.matmul %997, %14, %cst_415 {dimension_numbers = #tpu.dot_dimension_numbers<[1], [0], [0], [1], [0, 0, 1, 1], [], []>} : vector<8x64xf32>, vector<64x256xf32>, vector<8x256xf32> -> vector<8x256xf32>
    %1036 = arith.addf %1034, %1035 : vector<8x256xf32>
    %1037 = vector.extract_strided_slice %1036 {offsets = [0, 0], sizes = [8, 64], strides = [1, 1]} : vector<8x256xf32> to vector<8x64xf32>
    %cst_416 = arith.constant 0.000000e+00 : f32
    %1038 = vector.broadcast %cst_416 : f32 to vector<8x64xf32>
    %1039 = arith.subf %1038, %1037 : vector<8x64xf32>
    %1040 = math.exp %1039 : vector<8x64xf32>
    %cst_417 = arith.constant 1.000000e+00 : f32
    %1041 = vector.broadcast %cst_417 : f32 to vector<8x64xf32>
    %1042 = arith.addf %1041, %1040 : vector<8x64xf32>
    %cst_418 = arith.constant 1.000000e+00 : f32
    %1043 = vector.broadcast %cst_418 : f32 to vector<8x64xf32>
    %1044 = arith.divf %1043, %1042 : vector<8x64xf32>
    %1045 = vector.extract_strided_slice %1036 {offsets = [0, 64], sizes = [8, 64], strides = [1, 1]} : vector<8x256xf32> to vector<8x64xf32>
    %cst_419 = arith.constant 0.000000e+00 : f32
    %1046 = vector.broadcast %cst_419 : f32 to vector<8x64xf32>
    %1047 = arith.subf %1046, %1045 : vector<8x64xf32>
    %1048 = math.exp %1047 : vector<8x64xf32>
    %cst_420 = arith.constant 1.000000e+00 : f32
    %1049 = vector.broadcast %cst_420 : f32 to vector<8x64xf32>
    %1050 = arith.addf %1049, %1048 : vector<8x64xf32>
    %cst_421 = arith.constant 1.000000e+00 : f32
    %1051 = vector.broadcast %cst_421 : f32 to vector<8x64xf32>
    %1052 = arith.divf %1051, %1050 : vector<8x64xf32>
    %1053 = vector.extract_strided_slice %1036 {offsets = [0, 128], sizes = [8, 64], strides = [1, 1]} : vector<8x256xf32> to vector<8x64xf32>
    %1054 = math.tanh %1053 : vector<8x64xf32>
    %1055 = vector.extract_strided_slice %1036 {offsets = [0, 192], sizes = [8, 64], strides = [1, 1]} : vector<8x256xf32> to vector<8x64xf32>
    %cst_422 = arith.constant 0.000000e+00 : f32
    %1056 = vector.broadcast %cst_422 : f32 to vector<8x64xf32>
    %1057 = arith.subf %1056, %1055 : vector<8x64xf32>
    %1058 = math.exp %1057 : vector<8x64xf32>
    %cst_423 = arith.constant 1.000000e+00 : f32
    %1059 = vector.broadcast %cst_423 : f32 to vector<8x64xf32>
    %1060 = arith.addf %1059, %1058 : vector<8x64xf32>
    %cst_424 = arith.constant 1.000000e+00 : f32
    %1061 = vector.broadcast %cst_424 : f32 to vector<8x64xf32>
    %1062 = arith.divf %1061, %1060 : vector<8x64xf32>
    %1063 = arith.mulf %1052, %995 : vector<8x64xf32>
    %1064 = arith.mulf %1044, %1054 : vector<8x64xf32>
    %1065 = arith.addf %1063, %1064 : vector<8x64xf32>
    %1066 = math.tanh %1065 : vector<8x64xf32>
    %1067 = arith.mulf %1062, %1066 : vector<8x64xf32>
    %c8_425 = arith.constant 8 : index
    %c64_426 = arith.constant 64 : index
    %1068 = vector.load %arg8[%c8_425, %c64_426] : memref<128x128xf32, #tpu.memory_space<vmem>>, vector<8x64xf32>
    tpu.vector_store %arg8[%c8_425, %c64_426], %1067 {strides = array<i32>} : memref<128x128xf32, #tpu.memory_space<vmem>>, vector<8x64xf32>,
    %c120_427 = arith.constant 120 : index
    %c0_428 = arith.constant 0 : index
    %1069 = vector.load %arg11[%c120_427, %c0_428] : memref<128x256xf32, #tpu.memory_space<vmem>>, vector<8x256xf32>
    %cst_429 = arith.constant dense<0.000000e+00> : vector<8x256xf32>
    %1070 = tpu.matmul %1032, %13, %cst_429 {dimension_numbers = #tpu.dot_dimension_numbers<[1], [0], [0], [1], [0, 0, 1, 1], [], []>} : vector<8x64xf32>, vector<64x256xf32>, vector<8x256xf32> -> vector<8x256xf32>
    %1071 = arith.addf %1069, %1070 : vector<8x256xf32>
    %1072 = vector.extract_strided_slice %1071 {offsets = [0, 0], sizes = [8, 64], strides = [1, 1]} : vector<8x256xf32> to vector<8x64xf32>
    %cst_430 = arith.constant 0.000000e+00 : f32
    %1073 = vector.broadcast %cst_430 : f32 to vector<8x64xf32>
    %1074 = arith.subf %1073, %1072 : vector<8x64xf32>
    %1075 = math.exp %1074 : vector<8x64xf32>
    %cst_431 = arith.constant 1.000000e+00 : f32
    %1076 = vector.broadcast %cst_431 : f32 to vector<8x64xf32>
    %1077 = arith.addf %1076, %1075 : vector<8x64xf32>
    %cst_432 = arith.constant 1.000000e+00 : f32
    %1078 = vector.broadcast %cst_432 : f32 to vector<8x64xf32>
    %1079 = arith.divf %1078, %1077 : vector<8x64xf32>
    %1080 = vector.extract_strided_slice %1071 {offsets = [0, 64], sizes = [8, 64], strides = [1, 1]} : vector<8x256xf32> to vector<8x64xf32>
    %cst_433 = arith.constant 0.000000e+00 : f32
    %1081 = vector.broadcast %cst_433 : f32 to vector<8x64xf32>
    %1082 = arith.subf %1081, %1080 : vector<8x64xf32>
    %1083 = math.exp %1082 : vector<8x64xf32>
    %cst_434 = arith.constant 1.000000e+00 : f32
    %1084 = vector.broadcast %cst_434 : f32 to vector<8x64xf32>
    %1085 = arith.addf %1084, %1083 : vector<8x64xf32>
    %cst_435 = arith.constant 1.000000e+00 : f32
    %1086 = vector.broadcast %cst_435 : f32 to vector<8x64xf32>
    %1087 = arith.divf %1086, %1085 : vector<8x64xf32>
    %1088 = vector.extract_strided_slice %1071 {offsets = [0, 128], sizes = [8, 64], strides = [1, 1]} : vector<8x256xf32> to vector<8x64xf32>
    %1089 = math.tanh %1088 : vector<8x64xf32>
    %1090 = vector.extract_strided_slice %1071 {offsets = [0, 192], sizes = [8, 64], strides = [1, 1]} : vector<8x256xf32> to vector<8x64xf32>
    %cst_436 = arith.constant 0.000000e+00 : f32
    %1091 = vector.broadcast %cst_436 : f32 to vector<8x64xf32>
    %1092 = arith.subf %1091, %1090 : vector<8x64xf32>
    %1093 = math.exp %1092 : vector<8x64xf32>
    %cst_437 = arith.constant 1.000000e+00 : f32
    %1094 = vector.broadcast %cst_437 : f32 to vector<8x64xf32>
    %1095 = arith.addf %1094, %1093 : vector<8x64xf32>
    %cst_438 = arith.constant 1.000000e+00 : f32
    %1096 = vector.broadcast %cst_438 : f32 to vector<8x64xf32>
    %1097 = arith.divf %1096, %1095 : vector<8x64xf32>
    %1098 = arith.mulf %1087, %1030 : vector<8x64xf32>
    %1099 = arith.mulf %1079, %1089 : vector<8x64xf32>
    %1100 = arith.addf %1098, %1099 : vector<8x64xf32>
    %1101 = math.tanh %1100 : vector<8x64xf32>
    %1102 = arith.mulf %1097, %1101 : vector<8x64xf32>
    %c120_439 = arith.constant 120 : index
    %c0_440 = arith.constant 0 : index
    %1103 = vector.load %arg8[%c120_439, %c0_440] : memref<128x128xf32, #tpu.memory_space<vmem>>, vector<8x64xf32>
    tpu.vector_store %arg8[%c120_439, %c0_440], %1102 {strides = array<i32>} : memref<128x128xf32, #tpu.memory_space<vmem>>, vector<8x64xf32>,
    %c0_441 = arith.constant 0 : index
    %c0_442 = arith.constant 0 : index
    %1104 = vector.load %arg12[%c0_441, %c0_442] : memref<128x256xf32, #tpu.memory_space<vmem>>, vector<8x256xf32>
    %cst_443 = arith.constant dense<0.000000e+00> : vector<8x256xf32>
    %1105 = tpu.matmul %1067, %14, %cst_443 {dimension_numbers = #tpu.dot_dimension_numbers<[1], [0], [0], [1], [0, 0, 1, 1], [], []>} : vector<8x64xf32>, vector<64x256xf32>, vector<8x256xf32> -> vector<8x256xf32>
    %1106 = arith.addf %1104, %1105 : vector<8x256xf32>
    %1107 = vector.extract_strided_slice %1106 {offsets = [0, 0], sizes = [8, 64], strides = [1, 1]} : vector<8x256xf32> to vector<8x64xf32>
    %cst_444 = arith.constant 0.000000e+00 : f32
    %1108 = vector.broadcast %cst_444 : f32 to vector<8x64xf32>
    %1109 = arith.subf %1108, %1107 : vector<8x64xf32>
    %1110 = math.exp %1109 : vector<8x64xf32>
    %cst_445 = arith.constant 1.000000e+00 : f32
    %1111 = vector.broadcast %cst_445 : f32 to vector<8x64xf32>
    %1112 = arith.addf %1111, %1110 : vector<8x64xf32>
    %cst_446 = arith.constant 1.000000e+00 : f32
    %1113 = vector.broadcast %cst_446 : f32 to vector<8x64xf32>
    %1114 = arith.divf %1113, %1112 : vector<8x64xf32>
    %1115 = vector.extract_strided_slice %1106 {offsets = [0, 64], sizes = [8, 64], strides = [1, 1]} : vector<8x256xf32> to vector<8x64xf32>
    %cst_447 = arith.constant 0.000000e+00 : f32
    %1116 = vector.broadcast %cst_447 : f32 to vector<8x64xf32>
    %1117 = arith.subf %1116, %1115 : vector<8x64xf32>
    %1118 = math.exp %1117 : vector<8x64xf32>
    %cst_448 = arith.constant 1.000000e+00 : f32
    %1119 = vector.broadcast %cst_448 : f32 to vector<8x64xf32>
    %1120 = arith.addf %1119, %1118 : vector<8x64xf32>
    %cst_449 = arith.constant 1.000000e+00 : f32
    %1121 = vector.broadcast %cst_449 : f32 to vector<8x64xf32>
    %1122 = arith.divf %1121, %1120 : vector<8x64xf32>
    %1123 = vector.extract_strided_slice %1106 {offsets = [0, 128], sizes = [8, 64], strides = [1, 1]} : vector<8x256xf32> to vector<8x64xf32>
    %1124 = math.tanh %1123 : vector<8x64xf32>
    %1125 = vector.extract_strided_slice %1106 {offsets = [0, 192], sizes = [8, 64], strides = [1, 1]} : vector<8x256xf32> to vector<8x64xf32>
    %cst_450 = arith.constant 0.000000e+00 : f32
    %1126 = vector.broadcast %cst_450 : f32 to vector<8x64xf32>
    %1127 = arith.subf %1126, %1125 : vector<8x64xf32>
    %1128 = math.exp %1127 : vector<8x64xf32>
    %cst_451 = arith.constant 1.000000e+00 : f32
    %1129 = vector.broadcast %cst_451 : f32 to vector<8x64xf32>
    %1130 = arith.addf %1129, %1128 : vector<8x64xf32>
    %cst_452 = arith.constant 1.000000e+00 : f32
    %1131 = vector.broadcast %cst_452 : f32 to vector<8x64xf32>
    %1132 = arith.divf %1131, %1130 : vector<8x64xf32>
    %1133 = arith.mulf %1122, %1065 : vector<8x64xf32>
    %1134 = arith.mulf %1114, %1124 : vector<8x64xf32>
    %1135 = arith.addf %1133, %1134 : vector<8x64xf32>
    %1136 = math.tanh %1135 : vector<8x64xf32>
    %1137 = arith.mulf %1132, %1136 : vector<8x64xf32>
    %c0_453 = arith.constant 0 : index
    %c64_454 = arith.constant 64 : index
    %1138 = vector.load %arg8[%c0_453, %c64_454] : memref<128x128xf32, #tpu.memory_space<vmem>>, vector<8x64xf32>
    tpu.vector_store %arg8[%c0_453, %c64_454], %1137 {strides = array<i32>} : memref<128x128xf32, #tpu.memory_space<vmem>>, vector<8x64xf32>,
    %c0_455 = arith.constant 0 : index
    %c0_456 = arith.constant 0 : index
    %1139 = vector.load %arg9[%c0_455, %c0_456] : memref<16x64xf32, #tpu.memory_space<vmem>>, vector<8x64xf32>
    tpu.vector_store %arg9[%c0_455, %c0_456], %1102 {strides = array<i32>} : memref<16x64xf32, #tpu.memory_space<vmem>>, vector<8x64xf32>,
    %c8_457 = arith.constant 8 : index
    %c0_458 = arith.constant 0 : index
    %1140 = vector.load %arg9[%c8_457, %c0_458] : memref<16x64xf32, #tpu.memory_space<vmem>>, vector<8x64xf32>
    tpu.vector_store %arg9[%c8_457, %c0_458], %1137 {strides = array<i32>} : memref<16x64xf32, #tpu.memory_space<vmem>>, vector<8x64xf32>,
    %c0_459 = arith.constant 0 : index
    %c0_460 = arith.constant 0 : index
    %1141 = vector.load %arg10[%c0_459, %c0_460] : memref<16x64xf32, #tpu.memory_space<vmem>>, vector<8x64xf32>
    tpu.vector_store %arg10[%c0_459, %c0_460], %1100 {strides = array<i32>} : memref<16x64xf32, #tpu.memory_space<vmem>>, vector<8x64xf32>,
    %c8_461 = arith.constant 8 : index
    %c0_462 = arith.constant 0 : index
    %1142 = vector.load %arg10[%c8_461, %c0_462] : memref<16x64xf32, #tpu.memory_space<vmem>>, vector<8x64xf32>
    tpu.vector_store %arg10[%c8_461, %c0_462], %1135 {strides = array<i32>} : memref<16x64xf32, #tpu.memory_space<vmem>>, vector<8x64xf32>,
    return
  }
  func.func @transform_0(%arg0: i32) -> (i32, i32) {
    %c0_i32 = arith.constant 0 : i32
    %c0_i32_0 = arith.constant 0 : i32
    %c0_i32_1 = arith.constant 0 : i32
    return %c0_i32, %c0_i32_0 : i32, i32
  }
  func.func @transform_1(%arg0: i32) -> (i32, i32) {
    %c0_i32 = arith.constant 0 : i32
    %c0_i32_0 = arith.constant 0 : i32
    %c0_i32_1 = arith.constant 0 : i32
    return %c0_i32, %c0_i32_0 : i32, i32
  }
  func.func @transform_2(%arg0: i32) -> (i32, i32) {
    %c0_i32 = arith.constant 0 : i32
    %c0_i32_0 = arith.constant 0 : i32
    %c0_i32_1 = arith.constant 0 : i32
    return %c0_i32, %c0_i32_0 : i32, i32
  }
  func.func @transform_3(%arg0: i32) -> (i32, i32) {
    %c0_i32 = arith.constant 0 : i32
    %c0_i32_0 = arith.constant 0 : i32
    %c0_i32_1 = arith.constant 0 : i32
    return %c0_i32, %c0_i32_0 : i32, i32
  }
  func.func @transform_4(%arg0: i32) -> (i32, i32) {
    %c0_i32 = arith.constant 0 : i32
    %c0_i32_0 = arith.constant 0 : i32
    %c0_i32_1 = arith.constant 0 : i32
    return %c0_i32, %c0_i32_0 : i32, i32
  }
  func.func @transform_5(%arg0: i32) -> (i32, i32) {
    %c0_i32 = arith.constant 0 : i32
    %c0_i32_0 = arith.constant 0 : i32
    %c0_i32_1 = arith.constant 0 : i32
    return %c0_i32, %c0_i32_0 : i32, i32
  }
  func.func @transform_6(%arg0: i32) -> (i32, i32) {
    %c0_i32 = arith.constant 0 : i32
    %c0_i32_0 = arith.constant 0 : i32
    %c0_i32_1 = arith.constant 0 : i32
    return %c0_i32, %c0_i32_0 : i32, i32
  }
  func.func @transform_7(%arg0: i32) -> (i32, i32) {
    %c0_i32 = arith.constant 0 : i32
    %c0_i32_0 = arith.constant 0 : i32
    %c0_i32_1 = arith.constant 0 : i32
    return %c0_i32, %c0_i32_0 : i32, i32
  }
  func.func @transform_8(%arg0: i32) -> (i32, i32) {
    %c0_i32 = arith.constant 0 : i32
    %c0_i32_0 = arith.constant 0 : i32
    %c0_i32_1 = arith.constant 0 : i32
    return %c0_i32, %c0_i32_0 : i32, i32
  }
  func.func @transform_9(%arg0: i32) -> (i32, i32) {
    %c0_i32 = arith.constant 0 : i32
    %c0_i32_0 = arith.constant 0 : i32
    %c0_i32_1 = arith.constant 0 : i32
    return %c0_i32, %c0_i32_0 : i32, i32
  }
}

</mosaic_0001>

<bundles_post_ra>
// kernel: tpu_custom_call.1
= control target key start
LH: loop header
LB: loop body
LE: loop exit
PB: predicated region body
PF: predicated region fallthrough
CT: control target
= control target key end

     0   :  { %15 = vsyncpa [#allocation5], 0  ;;  %s6218_s0 = inlined_call_operand.vmem [shape: f32[128,64], index: 0, kind: input, shape index: {}]   ;;  %s6219_s1 = inlined_call_operand.vmem [shape: f32[64,256], index: 1, kind: input, shape index: {}]   ;;  %s6220_s2 = inlined_call_operand.hbm [shape: f32[64,256], index: 2, kind: input, shape index: {}]   ;;  %s6221_s3 = inlined_call_operand.vmem [shape: f32[1,256], index: 3, kind: input, shape index: {}]   ;;  %s6222_s4 = inlined_call_operand.hbm [shape: f32[64,256], index: 4, kind: input, shape index: {}]   ;;  %s6223_s5 = inlined_call_operand.hbm [shape: f32[64,256], index: 5, kind: input, shape index: {}]   ;;  %s6224_s6 = inlined_call_operand.vmem [shape: f32[1,256], index: 6, kind: input, shape index: {}]   ;;  %s6225_s7 = inlined_call_operand.hbm [shape: f32[128,128], index: 7, kind: output, shape index: {0}]   ;;  %s6226_s8 = inlined_call_operand.hbm [shape: f32[16,64], index: 8, kind: output, shape index: {1}]   ;;  %s6227_s9 = inlined_call_operand.hbm [shape: f32[16,64], index: 9, kind: output, shape index: {2}]  }
   0x1   :  { %16 = vsyncpa [#allocation8], 0 }
   0x2   :  { %17 = vsyncpa [#allocation6], 0 }
   0x3   :  { %18 = vsyncpa [#allocation12], 0  ;;  %s5255_s30 = smov [#allocation7]   ;;  %s5256_s11 = smov [#allocation4]  }
   0x4   :  { %s42_s10 = sshll.u32 %s5255_s30, 4  ;;  %s28_s12 = sshll.u32 %s5256_s11, 4  ;;  %s43_s10 = int_to_ptr.vmem [resolvable:$true] %s42_s10  ;;  %s5317_s12 = int_to_ptr.vmem [resolvable:$true] %s28_s12 }
   0x5   :  { %s5115_s15 = scalar_lea.hbm %s6222_s4, 2048 }
   0x6   :  { %p5116_p0 = scmp.ne.s32.totalorder %s6222_s4, %s5115_s15  ;;  %p5119_p1 = scmp.lt.u32.totalorder %s5115_s15, %s6222_s4 }
   0x8   :  { %p5121_p2 = pnand %p5119_p1, %p5116_p0 }
   0xa   :  { %5124 = shalt.err (!%p5121_p2)
}
   0xb   :  { %s5125_s20 = scalar_lea.vmem %s43_s10, 2048  ;;  %p5130_p4 = scmp.lt.s32.totalorder %s43_s10, %s43_s10 }
   0xc   :  { %p5126_p3 = scmp.ne.s32.totalorder %s43_s10, %s5125_s20  ;;  %p5131_p5 = scmp.lt.s32.totalorder %s5125_s20, %s5125_s20 }
   0xe   :  { %p5132_p6 = por %p5131_p5, %p5130_p4 }
  0x10   :  { %p5133_p7 = pnand %p5132_p6, %p5126_p3 }
  0x12   :  { %5136 = shalt.err (!%p5133_p7)
}
  0x13   :  { %s5257_s21 = smov 256   ;;  %s5258_s22 = smov 16  }
  0x14   :  { %48 = dma.hbm_to_vmem [thread:$0]  %s6222_s4, 2048, %s43_s10, [#allocation8], %s5257_s21, %s5257_s21, %s5258_s22  }
  0x15   :  { %s5137_s27 = scalar_lea.hbm %s6220_s2, 2048 }
  0x16   :  { %p5138_p8 = scmp.ne.s32.totalorder %s6220_s2, %s5137_s27  ;;  %p5141_p9 = scmp.lt.u32.totalorder %s5137_s27, %s6220_s2 }
  0x18   :  { %p5143_p10 = pnand %p5141_p9, %p5138_p8 }
  0x1a   :  { %5146 = shalt.err (!%p5143_p10)
}
  0x1b   :  { %s5147_s13 = scalar_lea.vmem %s5317_s12, 2048  ;;  %p5152_p12 = scmp.lt.s32.totalorder %s5317_s12, %s5317_s12 }
  0x1c   :  { %p5148_p11 = scmp.ne.s32.totalorder %s5317_s12, %s5147_s13  ;;  %p5153_p13 = scmp.lt.s32.totalorder %s5147_s13, %s5147_s13 }
  0x1e   :  { %p5154_p0 = por %p5153_p13, %p5152_p12 }
  0x20   :  { %p5155_p1 = pnand %p5154_p0, %p5148_p11 }
  0x22   :  { %5158 = shalt.err (!%p5155_p1)
}
  0x23   :  { %34 = dma.hbm_to_vmem [thread:$0]  %s6220_s2, 2048, %s5317_s12, [#allocation5], %s5257_s21, %s5257_s21, %s5258_s22  }
  0x24   :  { %s5259_s14 = smov [#allocation9]   ;;  %s5159_s18 = scalar_lea.hbm %s6223_s5, 2048 }
  0x25   :  { %s54_s15 = sshll.u32 %s5259_s14, 4  ;;  %p5160_p2 = scmp.ne.s32.totalorder %s6223_s5, %s5159_s18  ;;  %s55_s15 = int_to_ptr.vmem [resolvable:$true] %s54_s15 }
  0x26   :  { %p5163_p3 = scmp.lt.u32.totalorder %s5159_s18, %s6223_s5 }
  0x28   :  { %p5165_p4 = pnand %p5163_p3, %p5160_p2 }
  0x2a   :  { %5168 = shalt.err (!%p5165_p4)
}
  0x2b   :  { %s5169_s25 = scalar_lea.vmem %s55_s15, 2048  ;;  %p5174_p6 = scmp.lt.s32.totalorder %s55_s15, %s55_s15 }
  0x2c   :  { %p5170_p5 = scmp.ne.s32.totalorder %s55_s15, %s5169_s25  ;;  %p5175_p7 = scmp.lt.s32.totalorder %s5169_s25, %s5169_s25 }
  0x2e   :  { %p5176_p8 = por %p5175_p7, %p5174_p6 }
  0x30   :  { %p5177_p9 = pnand %p5176_p8, %p5170_p5 }
  0x32   :  { %5180 = shalt.err (!%p5177_p9)
}
  0x33   :  { %60 = dma.hbm_to_vmem [thread:$0]  %s6223_s5, 2048, %s55_s15, [#allocation8], %s5257_s21, %s5257_s21, %s5258_s22  }
  0x34   :  { %5247 = dma.done.wait [#allocation5], 2048  }
  0x35   :  { %5248 = vsyncadd [#allocation5], 4294965248 }
  0x36   :  { %5249 = dma.done.wait [#allocation8], 4096  }
  0x37   :  { %5250 = vsyncadd [#allocation8], 4294963200  ;;  %v5260_v0 = vmov 0.0   ;;  %v89_v1 = vld [vmem:[%s6219_s1 + $0x8] sm:$0xff]  ;;  %v91_v2 = vld [vmem:[%s6219_s1 + $0x18] sm:$0xff]  ;;  %vm116_vm0 = vcmask 523264  }
  0x38   :  { %229 = vmatprep.mubr.f32.mxu0 %v5260_v0  ;;  %450 = vmatprep.mubr.f32.mxu1 %v5260_v0  ;;  %v359_v3 = vld [vmem:[#allocation7 + $0x8] sm:$0xff]  ;;  %v4047_v4 = vpack.c.bf16 %v91_v2, %v89_v1  ;;  %v361_v5 = vld [vmem:[#allocation7 + $0x18] sm:$0xff]  ;;  %v88_v6 = vld [vmem:[%s6219_s1] sm:$0xff]  ;;  %vm813_vm1 = vcmask 1048064   ;;  %s5263_s20 = smov [#allocation11]  }
  0x39   :  { %v90_v7 = vld [vmem:[%s6219_s1 + $0x10] sm:$0xff]  ;;  %v4063_v8 = vpack.c.bf16 %v361_v5, %v359_v3  ;;  %v358_v10 = vld [vmem:[#allocation7] sm:$0xff]  ;;  %v93_v12 = vld [vmem:[%s6219_s1 + $0x28] sm:$0xff]  ;;  %s3953_s23 = sshll.u32 %s5263_s20, 4  ;;  %s3954_s23 = int_to_ptr.vmem [resolvable:$true] %s3953_s23 }
  0x3a   :  { %v4049_v9 = vpack.c.bf16 %v90_v7, %v88_v6  ;;  %v360_v11 = vld [vmem:[#allocation7 + $0x10] sm:$0xff]  ;;  %4048 = vmatprep.subr.bf16.mxu0 %v4047_v4  ;;  %v95_v14 = vld [vmem:[%s6219_s1 + $0x38] sm:$0xff]  ;;  %v363_v15 = vld [vmem:[#allocation7 + $0x28] sm:$0xff] }
  0x3b   :  { %v4065_v13 = vpack.c.bf16 %v360_v11, %v358_v10  ;;  %v365_v16 = vld [vmem:[#allocation7 + $0x38] sm:$0xff]  ;;  %4064 = vmatprep.subr.bf16.mxu1 %v4063_v8  ;;  %v4051_v17 = vpack.c.bf16 %v95_v14, %v93_v12  ;;  %v92_v19 = vld [vmem:[%s6219_s1 + $0x20] sm:$0xff]  ;;  %v94_v20 = vld [vmem:[%s6219_s1 + $0x30] sm:$0xff] }
  0x3c   :  { %4050 = vmatpush1.bf16.msra.mxu0 %v4049_v9  ;;  %v4067_v18 = vpack.c.bf16 %v365_v16, %v363_v15  ;;  %v362_v21 = vld [vmem:[#allocation7 + $0x20] sm:$0xff]  ;;  %v4053_v22 = vpack.c.bf16 %v94_v20, %v92_v19  ;;  %v364_v23 = vld [vmem:[#allocation7 + $0x30] sm:$0xff]  ;;  %v97_v24 = vld [vmem:[%s6219_s1 + $0x48] sm:$0xff] }
  0x3d   :  { %4066 = vmatpush1.bf16.msra.mxu1 %v4065_v13  ;;  %v99_v25 = vld [vmem:[%s6219_s1 + $0x58] sm:$0xff]  ;;  %4052 = vmatprep.subr.bf16.mxu0 %v4051_v17  ;;  %v4069_v26 = vpack.c.bf16 %v364_v23, %v362_v21  ;;  %v367_v28 = vld [vmem:[#allocation7 + $0x48] sm:$0xff]  ;;  %v96_v30 = vld [vmem:[%s6219_s1 + $0x40] sm:$0xff] }
  0x3e   :  { %4068 = vmatprep.subr.bf16.mxu1 %v4067_v18  ;;  %v4055_v27 = vpack.c.bf16 %v99_v25, %v97_v24  ;;  %v369_v29 = vld [vmem:[#allocation7 + $0x58] sm:$0xff]  ;;  %v98_v32 = vld [vmem:[%s6219_s1 + $0x50] sm:$0xff]  ;;  %v366_v33 = vld [vmem:[#allocation7 + $0x40] sm:$0xff] }
  0x3f   :  { %v4071_v31 = vpack.c.bf16 %v369_v29, %v367_v28  ;;  %v368_v34 = vld [vmem:[#allocation7 + $0x50] sm:$0xff]  ;;  %v4057_v35 = vpack.c.bf16 %v98_v32, %v96_v30  ;;  %v101_v36 = vld [vmem:[%s6219_s1 + $0x68] sm:$0xff]  ;;  %v103_v37 = vld [vmem:[%s6219_s1 + $0x78] sm:$0xff] }
  0x40   :  { %4054 = vmatpush1.bf16.msra.mxu0 %v4053_v22  ;;  %v371_v38 = vld [vmem:[#allocation7 + $0x68] sm:$0xff]  ;;  %v4073_v39 = vpack.c.bf16 %v368_v34, %v366_v33  ;;  %v4059_v40 = vpack.c.bf16 %v103_v37, %v101_v36  ;;  %v373_v41 = vld [vmem:[#allocation7 + $0x78] sm:$0xff]  ;;  %v100_v42 = vld [vmem:[%s6219_s1 + $0x60] sm:$0xff] }
  0x41   :  { %4070 = vmatpush1.bf16.msra.mxu1 %v4069_v26  ;;  %4056 = vmatprep.subr.bf16.mxu0 %v4055_v27  ;;  %v102_v43 = vld [vmem:[%s6219_s1 + $0x70] sm:$0xff]  ;;  %v4075_v44 = vpack.c.bf16 %v373_v41, %v371_v38  ;;  %v370_v45 = vld [vmem:[#allocation7 + $0x60] sm:$0xff]  ;;  %v580_v47 = vld [vmem:[#allocation4 + $0x8] sm:$0xff] }
  0x42   :  { %4072 = vmatprep.subr.bf16.mxu1 %v4071_v31  ;;  %v372_v46 = vld [vmem:[#allocation7 + $0x70] sm:$0xff]  ;;  %v582_v48 = vld [vmem:[#allocation4 + $0x18] sm:$0xff]  ;;  %v596_v49 = vld [vmem:[#allocation9 + $0x8] sm:$0xff]  ;;  %v4061_v50 = vpack.c.bf16 %v102_v43, %v100_v42 }
  0x43   :  { %v598_v51 = vld [vmem:[#allocation9 + $0x18] sm:$0xff]  ;;  %v4077_v52 = vpack.c.bf16 %v372_v46, %v370_v45  ;;  %v5419_v53 = vpack.c.bf16 %v582_v48, %v580_v47  ;;  %v579_v54 = vld [vmem:[#allocation4] sm:$0xff]  ;;  %v581_v55 = vld [vmem:[#allocation4 + $0x10] sm:$0xff] }
  0x44   :  { %4058 = vmatpush1.bf16.msra.mxu0 %v4057_v35  ;;  %v5421_v56 = vpack.c.bf16 %v598_v51, %v596_v49  ;;  %v595_v57 = vld [vmem:[#allocation9] sm:$0xff]  ;;  %v597_v58 = vld [vmem:[#allocation9 + $0x10] sm:$0xff]  ;;  %v584_v59 = vld [vmem:[#allocation4 + $0x28] sm:$0xff]  ;;  %v5426_v62 = vpack.c.bf16 %v581_v55, %v579_v54 }
  0x45   :  { %4074 = vmatpush1.bf16.msra.mxu1 %v4073_v39  ;;  %4060 = vmatprep.subr.bf16.mxu0 %v4059_v40  ;;  %v586_v60 = vld [vmem:[#allocation4 + $0x38] sm:$0xff]  ;;  %v72_v61 = vld [vmem:[%s6218_s0] sm:$0xff]  ;;  %v600_v63 = vld [vmem:[#allocation9 + $0x28] sm:$0xff]  ;;  %v5429_v2 = vpack.c.bf16 %v597_v58, %v595_v57 }
  0x46   :  { %4076 = vmatprep.subr.bf16.mxu1 %v4075_v44  ;;  %v602_v1 = vld [vmem:[#allocation9 + $0x38] sm:$0xff]  ;;  %v5432_v3 = vpack.c.bf16 %v586_v60, %v584_v59  ;;  %v583_v4 = vld [vmem:[#allocation4 + $0x20] sm:$0xff]  ;;  %v585_v5 = vld [vmem:[#allocation4 + $0x30] sm:$0xff] }
  0x47   :  { %v599_v6 = vld [vmem:[#allocation9 + $0x20] sm:$0xff]  ;;  %v5435_v7 = vpack.c.bf16 %v602_v1, %v600_v63  ;;  %v601_v8 = vld [vmem:[#allocation9 + $0x30] sm:$0xff]  ;;  %v588_v9 = vld [vmem:[#allocation4 + $0x48] sm:$0xff]  ;;  %v5444_v14 = vpack.c.bf16 %v585_v5, %v583_v4 }
  0x48   :  { %4062 = vmatpush1.bf16.msra.mxu0 %v4061_v50  ;;  %v590_v10 = vld [vmem:[#allocation4 + $0x58] sm:$0xff]  ;;  %v73_v11 = vld [vmem:[%s6218_s0 + $0x8] sm:$0xff]  ;;  %v5448_v15 = vpack.c.bf16 %v601_v8, %v599_v6  ;;  %v587_v17 = vld [vmem:[#allocation4 + $0x40] sm:$0xff]  ;;  %v106_v50 = vlaneseq }
  0x49   :  { %4078 = vmatpush1.bf16.msra.mxu1 %v4077_v52  ;;  %4080 = vmatprep.subr.bf16.mxu0 %v5419_v53  ;;  %v604_v12 = vld [vmem:[#allocation9 + $0x48] sm:$0xff]  ;;  %v606_v13 = vld [vmem:[#allocation9 + $0x58] sm:$0xff]  ;;  %v5450_v16 = vpack.c.bf16 %v590_v10, %v588_v9  ;;  %v589_v18 = vld [vmem:[#allocation4 + $0x50] sm:$0xff] }
  0x4a   :  { %4096 = vmatprep.subr.bf16.mxu1 %v5421_v56  ;;  %v603_v19 = vld [vmem:[#allocation9 + $0x40] sm:$0xff]  ;;  %v5454_v20 = vpack.c.bf16 %v606_v13, %v604_v12  ;;  %v605_v21 = vld [vmem:[#allocation9 + $0x50] sm:$0xff]  ;;  %v592_v22 = vld [vmem:[#allocation4 + $0x68] sm:$0xff]  ;;  %v5463_v27 = vpack.c.bf16 %v589_v18, %v587_v17  ;;  %v107_v51 = vshrl.u32 %v106_v50, 7 }
  0x4b   :  { %3985 = vmatmul.mubr.msk.f32.vlgmr.msra.gmra.mrb[0].mxu0 %vm116_vm0, %v72_v61  ;;  %v594_v23 = vld [vmem:[#allocation4 + $0x78] sm:$0xff]  ;;  %v74_v24 = vld [vmem:[%s6218_s0 + $0x10] sm:$0xff]  ;;  %v608_v25 = vld [vmem:[#allocation9 + $0x68] sm:$0xff]  ;;  %v5467_v28 = vpack.c.bf16 %v605_v21, %v603_v19 }
  0x4c   :  { %4001 = vmatmul.mubr.msk.f32.vlgmr.msra.gmra.mrb[0].mxu1 %vm116_vm0, %v72_v61  ;;  %4082 = vmatpush1.bf16.msra.mxu0 %v5426_v62  ;;  %v610_v26 = vld [vmem:[#allocation9 + $0x78] sm:$0xff]  ;;  %v5469_v29 = vpack.c.bf16 %v594_v23, %v592_v22  ;;  %v591_v30 = vld [vmem:[#allocation4 + $0x60] sm:$0xff]  ;;  %v593_v31 = vld [vmem:[#allocation4 + $0x70] sm:$0xff]  ;;  %v108_v52 = vsub.s32 0, %v107_v51  ;;  %v112_v8 = vsub.s32 1, %v107_v51 }
  0x4d   :  { %4098 = vmatpush1.bf16.msra.mxu1 %v5429_v2  ;;  %235 = vmatprep.mubr.f32.mxu0 %v5260_v0  ;;  %v5473_v32 = vpack.c.bf16 %v610_v26, %v608_v25  ;;  %v607_v33 = vld [vmem:[#allocation9 + $0x60] sm:$0xff]  ;;  %v609_v34 = vld [vmem:[#allocation9 + $0x70] sm:$0xff]  ;;  %v75_v35 = vld [vmem:[%s6218_s0 + $0x18] sm:$0xff]  ;;  %v5482_v36 = vpack.c.bf16 %v593_v31, %v591_v30 }
  0x4e   :  { %456 = vmatprep.mubr.f32.mxu1 %v5260_v0  ;;  %4084 = vmatprep.subr.bf16.mxu0 %v5432_v3  ;;  %v5486_v37 = vpack.c.bf16 %v609_v34, %v607_v33  ;;  %v76_v38 = vld [vmem:[%s6218_s0 + $0x20] sm:$0xff]  ;;  %v77_v39 = vld [vmem:[%s6218_s0 + $0x28] sm:$0xff]  ;;  %v78_v40 = vld [vmem:[%s6218_s0 + $0x30] sm:$0xff] }
  0x4f   :  { %3986 = vmatmul.mubr.msk.f32.gmra.mrb[2].mxu0 %vm116_vm0, %v73_v11  ;;  %4100 = vmatprep.subr.bf16.mxu1 %v5435_v7  ;;  %v79_v41 = vld [vmem:[%s6218_s0 + $0x38] sm:$0xff]  ;;  %v80_v42 = vld [vmem:[%s6218_s0 + $0x40] sm:$0xff]  ;;  %v81_v43 = vld [vmem:[%s6218_s0 + $0x48] sm:$0xff] }
  0x50   :  { %4002 = vmatmul.mubr.msk.f32.gmra.mrb[2].mxu1 %vm116_vm0, %v73_v11  ;;  %241 = vmatprep.mubr.f32.mxu0 %v5260_v0  ;;  %v82_v44 = vld [vmem:[%s6218_s0 + $0x50] sm:$0xff]  ;;  %v83_v45 = vld [vmem:[%s6218_s0 + $0x58] sm:$0xff]  ;;  %v84_v46 = vld [vmem:[%s6218_s0 + $0x60] sm:$0xff] }
  0x51   :  { %462 = vmatprep.mubr.f32.mxu1 %v5260_v0  ;;  %4086 = vmatpush1.bf16.msra.mxu0 %v5444_v14  ;;  %v85_v47 = vld [vmem:[%s6218_s0 + $0x68] sm:$0xff]  ;;  %v86_v48 = vld [vmem:[%s6218_s0 + $0x70] sm:$0xff]  ;;  %v87_v49 = vld [vmem:[%s6218_s0 + $0x78] sm:$0xff] }
  0x52   :  { %4102 = vmatpush1.bf16.msra.mxu1 %v5448_v15  ;;  %4088 = vmatprep.subr.bf16.mxu0 %v5450_v16  ;;  %v104_v54 = vld [vmem:[%s6221_s3] sm:$0x3]  ;;  %s5261_s3 = smov 64  }
  0x53   :  { %3987 = vmatmul.mubr.msk.f32.gmra.mrb[4].mxu0 %vm116_vm0, %v74_v24  ;;  %4104 = vmatprep.subr.bf16.mxu1 %v5454_v20  ;;  %v5604_v55 = vrot.slane %v104_v54, %v108_v52  ;;  %v374_v57 = vld [vmem:[%s6224_s6] sm:$0x3]  ;;  %v5613_v11 = vrot.slane %v104_v54, %v112_v8  ;;  %s5262_s6 = smov [#allocation10]  }
  0x54   :  { %4003 = vmatmul.mubr.msk.f32.gmra.mrb[4].mxu1 %vm116_vm0, %v74_v24  ;;  %247 = vmatprep.mubr.f32.mxu0 %v5260_v0  ;;  %v5610_v61 = vrot.slane %v374_v57, %v108_v52  ;;  %v5616_v13 = vrot.slane %v374_v57, %v112_v8  ;;  %s3941_s19 = sshll.u32 %s5262_s6, 4  ;;  %s3942_s19 = int_to_ptr.vmem [resolvable:$true] %s3941_s19 }
  0x55   :  { %468 = vmatprep.mubr.f32.mxu1 %v5260_v0  ;;  %4090 = vmatpush1.bf16.msra.mxu0 %v5463_v27  ;;  %s5181_s24 = scalar_lea.vmem %s3942_s19, 2048  ;;  %p5186_p11 = scmp.lt.s32.totalorder %s3942_s19, %s3942_s19 }
  0x56   :  { %4106 = vmatpush1.bf16.msra.mxu1 %v5467_v28  ;;  %4092 = vmatprep.subr.bf16.mxu0 %v5469_v29  ;;  %p5182_p10 = scmp.ne.s32.totalorder %s3942_s19, %s5181_s24  ;;  %p5187_p12 = scmp.lt.s32.totalorder %s5181_s24, %s5181_s24 }
  0x57   :  { %3988 = vmatmul.mubr.msk.f32.gmra.mrb[6].mxu0 %vm116_vm0, %v75_v35  ;;  %4108 = vmatprep.subr.bf16.mxu1 %v5473_v32 }
  0x58   :  { %4004 = vmatmul.mubr.msk.f32.gmra.mrb[6].mxu1 %vm116_vm0, %v75_v35  ;;  %253 = vmatprep.mubr.f32.mxu0 %v5260_v0  ;;  %p5188_p13 = por %p5187_p12, %p5186_p11 }
  0x59   :  { %474 = vmatprep.mubr.f32.mxu1 %v5260_v0  ;;  %4094 = vmatpush1.bf16.msra.mxu0 %v5482_v36 }
  0x5a   :  { %4110 = vmatpush1.bf16.msra.mxu1 %v5486_v37  ;;  %4112 = vmatprep.subr.bf16.mxu0 %v5419_v53  ;;  %p5189_p0 = pnand %p5188_p13, %p5182_p10 }
  0x5b   :  { %3989 = vmatmul.mubr.msk.f32.gmra.mrb[8].mxu0 %vm116_vm0, %v76_v38  ;;  %4128 = vmatprep.subr.bf16.mxu1 %v5421_v56 }
  0x5c   :  { %4005 = vmatmul.mubr.msk.f32.gmra.mrb[8].mxu1 %vm116_vm0, %v76_v38  ;;  %259 = vmatprep.mubr.f32.mxu0 %v5260_v0 }
  0x5d   :  { %480 = vmatprep.mubr.f32.mxu1 %v5260_v0 }
  0x5f   :  { %3990 = vmatmul.mubr.msk.f32.gmra.mrb[10].mxu0 %vm116_vm0, %v77_v39 }
  0x60   :  { %4006 = vmatmul.mubr.msk.f32.gmra.mrb[10].mxu1 %vm116_vm0, %v77_v39  ;;  %265 = vmatprep.mubr.f32.mxu0 %v5260_v0 }
  0x61   :  { %486 = vmatprep.mubr.f32.mxu1 %v5260_v0 }
  0x63   :  { %3991 = vmatmul.mubr.msk.f32.gmra.mrb[12].mxu0 %vm116_vm0, %v78_v40 }
  0x64   :  { %4007 = vmatmul.mubr.msk.f32.gmra.mrb[12].mxu1 %vm116_vm0, %v78_v40  ;;  %271 = vmatprep.mubr.f32.mxu0 %v5260_v0 }
  0x65   :  { %492 = vmatprep.mubr.f32.mxu1 %v5260_v0 }
  0x67   :  { %3992 = vmatmul.mubr.msk.f32.gmra.mrb[14].mxu0 %vm116_vm0, %v79_v41 }
  0x68   :  { %4008 = vmatmul.mubr.msk.f32.gmra.mrb[14].mxu1 %vm116_vm0, %v79_v41  ;;  %277 = vmatprep.mubr.f32.mxu0 %v5260_v0 }
  0x69   :  { %498 = vmatprep.mubr.f32.mxu1 %v5260_v0 }
  0x6b   :  { %3993 = vmatmul.mubr.msk.f32.gmra.mrb[16].mxu0 %vm116_vm0, %v80_v42 }
  0x6c   :  { %4009 = vmatmul.mubr.msk.f32.gmra.mrb[16].mxu1 %vm116_vm0, %v80_v42  ;;  %283 = vmatprep.mubr.f32.mxu0 %v5260_v0 }
  0x6d   :  { %504 = vmatprep.mubr.f32.mxu1 %v5260_v0 }
  0x6f   :  { %3994 = vmatmul.mubr.msk.f32.gmra.mrb[18].mxu0 %vm116_vm0, %v81_v43 }
  0x70   :  { %4010 = vmatmul.mubr.msk.f32.gmra.mrb[18].mxu1 %vm116_vm0, %v81_v43  ;;  %289 = vmatprep.mubr.f32.mxu0 %v5260_v0 }
  0x71   :  { %510 = vmatprep.mubr.f32.mxu1 %v5260_v0 }
  0x73   :  { %3995 = vmatmul.mubr.msk.f32.gmra.mrb[20].mxu0 %vm116_vm0, %v82_v44 }
  0x74   :  { %4011 = vmatmul.mubr.msk.f32.gmra.mrb[20].mxu1 %vm116_vm0, %v82_v44  ;;  %295 = vmatprep.mubr.f32.mxu0 %v5260_v0 }
  0x75   :  { %516 = vmatprep.mubr.f32.mxu1 %v5260_v0 }
  0x77   :  { %3996 = vmatmul.mubr.msk.f32.gmra.mrb[22].mxu0 %vm116_vm0, %v83_v45 }
  0x78   :  { %4012 = vmatmul.mubr.msk.f32.gmra.mrb[22].mxu1 %vm116_vm0, %v83_v45  ;;  %301 = vmatprep.mubr.f32.mxu0 %v5260_v0 }
  0x79   :  { %522 = vmatprep.mubr.f32.mxu1 %v5260_v0 }
  0x7b   :  { %3997 = vmatmul.mubr.msk.f32.gmra.mrb[24].mxu0 %vm116_vm0, %v84_v46 }
  0x7c   :  { %4013 = vmatmul.mubr.msk.f32.gmra.mrb[24].mxu1 %vm116_vm0, %v84_v46  ;;  %307 = vmatprep.mubr.f32.mxu0 %v5260_v0 }
  0x7d   :  { %528 = vmatprep.mubr.f32.mxu1 %v5260_v0 }
  0x7f   :  { %3998 = vmatmul.mubr.msk.f32.gmra.mrb[26].mxu0 %vm116_vm0, %v85_v47 }
  0x80   :  { %4014 = vmatmul.mubr.msk.f32.gmra.mrb[26].mxu1 %vm116_vm0, %v85_v47  ;;  %313 = vmatprep.mubr.f32.mxu0 %v5260_v0 }
  0x81   :  { %534 = vmatprep.mubr.f32.mxu1 %v5260_v0 }
  0x83   :  { %3999 = vmatmul.mubr.msk.f32.gmra.mrb[28].mxu0 %vm116_vm0, %v86_v48 }
  0x84   :  { %4015 = vmatmul.mubr.msk.f32.gmra.mrb[28].mxu1 %vm116_vm0, %v86_v48  ;;  %319 = vmatprep.mubr.f32.mxu0 %v5260_v0 }
  0x85   :  { %540 = vmatprep.mubr.f32.mxu1 %v5260_v0 }
  0x87   :  { %4000 = vmatmul.mubr.msk.f32.gmra.mrb[30].mxu0 %vm116_vm0, %v87_v49 }
  0x88   :  { %4016 = vmatmul.mubr.msk.f32.gmra.mrb[30].mxu1 %vm116_vm0, %v87_v49  ;;  %680 = vmatprep.mubr.f32.mxu0 %v5260_v0 }
  0x89   :  { %782 = vmatprep.mubr.f32.mxu1 %v5260_v0 }
  0x8b   :  { %681 = vmatmul.mubr.f32.vlgmr.msra.gmra.mrb[0].mxu0 %v5260_v0 }
  0x8c   :  { %4114 = vmatpush1.bf16.msra.mxu0 %v5426_v62  ;;  %883 = vmatprep.mubr.f32.mxu0 %v5260_v0 }
  0x8d   :  { %4116 = vmatprep.subr.bf16.mxu0 %v5432_v3 }
  0x90   :  { %783 = vmatmul.mubr.f32.vlgmr.msra.gmra.mrb[30].mxu1 %v5260_v0  ;;  %4118 = vmatpush1.bf16.msra.mxu0 %v5444_v14 }
  0x91   :  { %4130 = vmatpush1.bf16.msra.mxu1 %v5429_v2  ;;  %4120 = vmatprep.subr.bf16.mxu0 %v5450_v16 }
  0x92   :  { %4132 = vmatprep.subr.bf16.mxu1 %v5435_v7  ;;  %990 = vmatprep.mubr.f32.mxu1 %v5260_v0 }
  0x94   :  { %4122 = vmatpush1.bf16.msra.mxu0 %v5463_v27 }
  0x95   :  { %4134 = vmatpush1.bf16.msra.mxu1 %v5448_v15  ;;  %4124 = vmatprep.subr.bf16.mxu0 %v5469_v29 }
  0x96   :  { %4136 = vmatprep.subr.bf16.mxu1 %v5454_v20 }
  0x98   :  { %4126 = vmatpush1.bf16.msra.mxu0 %v5482_v36 }
  0x99   :  { %4138 = vmatpush1.bf16.msra.mxu1 %v5467_v28  ;;  %4144 = vmatprep.subr.bf16.mxu0 %v5419_v53 }
  0x9a   :  { %4140 = vmatprep.subr.bf16.mxu1 %v5473_v32 }
  0x9d   :  { %4142 = vmatpush1.bf16.msra.mxu1 %v5486_v37 }
  0x9e   :  { %4160 = vmatprep.subr.bf16.mxu1 %v5421_v56 }
 0x15e   :  { %v682_v58 = vpop.f32.mrb[0].mxu0 }
 0x15f   :  { %v4591_v59 = vadd.f32 %v682_v58, %v5604_v55  ;;  %v684_v60 = vpop.f32.mrb[1].mxu0 }
 0x160   :  { %v4592_v12 = vadd.f32 %v684_v60, %v5613_v11 }
 0x161   :  { %v689_v63 = vsub.f32 0.0, %v4591_v59 }
 0x162   :  { %v696_v33 = vsub.f32 0.0, %v4592_v12 }
 0x163   :  { %v690_v1 = vmul.f32 1.442695, %v689_v63  ;;  %v784_v4 = vpop.f32.mrb[30].mxu1 }
 0x164   :  { %v4653_v5 = vadd.f32 %v784_v4, %v5610_v61  ;;  %v786_v6 = vpop.f32.mrb[31].mxu1  ;;  %v697_v34 = vmul.f32 1.442695, %v696_v33 }
 0x165   :  { %4731 = vpow2.f32 %v690_v1  ;;  %v4654_v19 = vadd.f32 %v786_v6, %v5616_v13 }
 0x166   :  { %v791_v9 = vsub.f32 0.0, %v4653_v5 }
 0x167   :  { %v798_v35 = vsub.f32 0.0, %v4654_v19 }
 0x168   :  { %v792_v10 = vmul.f32 1.442695, %v791_v9 }
 0x169   :  { %v799_v38 = vmul.f32 1.442695, %v798_v35 }
 0x16a   :  { %4733 = vpow2.f32 %v792_v10 }
 0x16b   :  { %4735 = vtanh.f32 %v4592_v12 }
 0x16f   :  { %v4732_v17 = vpop.eup %4731 }
 0x170   :  { %v692_v18 = vadd.f32 1.0, %v4732_v17 }
 0x172   :  { %4737 = vrcp.f32 %v692_v18 }
 0x173   :  { %4739 = vtanh.f32 %v4654_v19 }
 0x174   :  { %v4734_v21 = vpop.eup %4733 }
 0x175   :  { %v794_v22 = vadd.f32 1.0, %v4734_v21  ;;  %v4736_v23 = vpop.eup %4735 }
 0x177   :  { %4741 = vrcp.f32 %v794_v22 }
 0x178   :  { %4743 = vpow2.f32 %v697_v34 }
 0x179   :  { %4745 = vpow2.f32 %v799_v38 }
 0x17c   :  { %v4738_v24 = vpop.eup %4737 }
 0x17d   :  { %v703_v25 = vmul.f32 %v4738_v24, %v4736_v23  ;;  %v4740_v26 = vpop.eup %4739  ;;  %v702_v41 = vmul.f32 0.0, %v4738_v24 }
 0x17f   :  { %705 = vrot.lane.b32.xlu0 %v703_v25, %s5261_s3 }
 0x181   :  { %v4742_v30 = vpop.eup %4741 }
 0x182   :  { %v805_v31 = vmul.f32 %v4742_v30, %v4740_v26  ;;  %v4744_v39 = vpop.eup %4743  ;;  %v804_v46 = vmul.f32 0.0, %v4742_v30 }
 0x183   :  { %v699_v40 = vadd.f32 1.0, %v4744_v39  ;;  %v4746_v42 = vpop.eup %4745 }
 0x184   :  { %807 = vrot.lane.b32.xlu0 %v805_v31, %s5261_s3  ;;  %v801_v45 = vadd.f32 1.0, %v4746_v42 }
 0x185   :  { %4747 = vrcp.f32 %v699_v40 }
 0x18f   :  { %v4748_v49 = vpop.eup %4747 }
 0x1f1   :  { %v706_v43 = vpop.permute.xlu0 %705 }
 0x1f2   :  { %v5621_v44 = vadd.f32 %v706_v43, %v702_v41 }
 0x1f4   :  { %4749 = vtanh.f32 %v5621_v44 }
 0x1f5   :  { %4751 = vrcp.f32 %v801_v45 }
 0x1f6   :  { %v808_v47 = vpop.permute.xlu0 %807 }
 0x1f7   :  { %v5624_v48 = vadd.f32 %v808_v47, %v804_v46 }
 0x1f9   :  { %4753 = vtanh.f32 %v5624_v48 }
 0x1fe   :  { %v4750_v50 = vpop.eup %4749 }
 0x1ff   :  { %v710_v51 = vmul.f32 %v4750_v50, %v4748_v49  ;;  %v4752_v52 = vpop.eup %4751 }
 0x201   :  { %712 = vrot.lane.b32.xlu1 %v710_v51, %s5261_s3 }
 0x203   :  { %v4754_v54 = vpop.eup %4753 }
 0x204   :  { %v812_v57 = vmul.f32 %v4754_v54, %v4752_v52 }
 0x206   :  { %922 = vrot.lane.b32.xlu1 %v812_v57, %s5261_s3  ;;  %814 = vst.msk [vmem:[#allocation10 + $0x78] sm:$0xff] %vm813_vm1, %v812_v57 }
 0x273   :  { %v713_v58 = vpop.permute.xlu1 %712 }
 0x274   :  { %715 = vst.msk [vmem:[#allocation10] sm:$0xff] %vm116_vm0, %v713_v58  ;;  %4017 = vmatmul.mubr.msk.f32.vlgmr.msra.gmra.mrb[2].mxu0 %vm116_vm0, %v713_v58 }
 0x275   :  { %4146 = vmatpush1.bf16.msra.mxu0 %v5426_v62  ;;  %1090 = vmatprep.mubr.f32.mxu0 %v5260_v0 }
 0x276   :  { %4148 = vmatprep.subr.bf16.mxu0 %v5432_v3 }
 0x278   :  { %v923_v59 = vpop.permute.xlu1 %922 }
 0x279   :  { %4018 = vmatmul.mubr.msk.f32.vlgmr.msra.gmra.mrb[28].mxu1 %vm116_vm0, %v923_v59  ;;  %4150 = vmatpush1.bf16.msra.mxu0 %v5444_v14 }
 0x27a   :  { %4162 = vmatpush1.bf16.msra.mxu1 %v5429_v2  ;;  %4152 = vmatprep.subr.bf16.mxu0 %v5450_v16 }
 0x27b   :  { %4164 = vmatprep.subr.bf16.mxu1 %v5435_v7  ;;  %1197 = vmatprep.mubr.f32.mxu1 %v5260_v0 }
 0x27d   :  { %4154 = vmatpush1.bf16.msra.mxu0 %v5463_v27 }
 0x27e   :  { %4166 = vmatpush1.bf16.msra.mxu1 %v5448_v15  ;;  %4156 = vmatprep.subr.bf16.mxu0 %v5469_v29 }
 0x27f   :  { %4168 = vmatprep.subr.bf16.mxu1 %v5454_v20 }
 0x281   :  { %4158 = vmatpush1.bf16.msra.mxu0 %v5482_v36 }
 0x282   :  { %4170 = vmatpush1.bf16.msra.mxu1 %v5467_v28  ;;  %4176 = vmatprep.subr.bf16.mxu0 %v5419_v53 }
 0x283   :  { %4172 = vmatprep.subr.bf16.mxu1 %v5473_v32 }
 0x286   :  { %4174 = vmatpush1.bf16.msra.mxu1 %v5486_v37 }
 0x287   :  { %4192 = vmatprep.subr.bf16.mxu1 %v5421_v56 }
 0x347   :  { %v885_v60 = vpop.f32.mrb[2].mxu0 }
 0x348   :  { %v4593_v63 = vadd.f32 %v885_v60, %v5604_v55  ;;  %v887_v1 = vpop.f32.mrb[3].mxu0 }
 0x349   :  { %v4594_v17 = vadd.f32 %v887_v1, %v5613_v11 }
 0x34a   :  { %v892_v4 = vsub.f32 0.0, %v4593_v63 }
 0x34b   :  { %v899_v34 = vsub.f32 0.0, %v4594_v17 }
 0x34c   :  { %v893_v5 = vmul.f32 1.442695, %v892_v4  ;;  %v992_v6 = vpop.f32.mrb[28].mxu1 }
 0x34d   :  { %v4651_v8 = vadd.f32 %v992_v6, %v5610_v61  ;;  %v994_v9 = vpop.f32.mrb[29].mxu1  ;;  %v900_v35 = vmul.f32 1.442695, %v899_v34 }
 0x34e   :  { %4755 = vpow2.f32 %v893_v5  ;;  %v4652_v21 = vadd.f32 %v994_v9, %v5616_v13 }
 0x34f   :  { %v999_v10 = vsub.f32 0.0, %v4651_v8 }
 0x350   :  { %v1006_v38 = vsub.f32 0.0, %v4652_v21 }
 0x351   :  { %v1000_v12 = vmul.f32 1.442695, %v999_v10 }
 0x352   :  { %v1007_v39 = vmul.f32 1.442695, %v1006_v38 }
 0x353   :  { %4757 = vpow2.f32 %v1000_v12 }
 0x354   :  { %4759 = vtanh.f32 %v4594_v17 }
 0x358   :  { %v4756_v18 = vpop.eup %4755 }
 0x359   :  { %v895_v19 = vadd.f32 1.0, %v4756_v18 }
 0x35b   :  { %4761 = vrcp.f32 %v895_v19 }
 0x35c   :  { %4763 = vtanh.f32 %v4652_v21 }
 0x35d   :  { %v4758_v22 = vpop.eup %4757 }
 0x35e   :  { %v1002_v23 = vadd.f32 1.0, %v4758_v22  ;;  %v4760_v24 = vpop.eup %4759 }
 0x360   :  { %4765 = vrcp.f32 %v1002_v23 }
 0x361   :  { %4767 = vpow2.f32 %v900_v35 }
 0x362   :  { %4769 = vpow2.f32 %v1007_v39 }
 0x365   :  { %v4762_v25 = vpop.eup %4761 }
 0x366   :  { %v906_v26 = vmul.f32 %v4762_v25, %v4760_v24  ;;  %v4764_v30 = vpop.eup %4763  ;;  %v905_v42 = vmul.f32 %v4762_v25, %v5621_v44 }
 0x368   :  { %908 = vrot.lane.b32.xlu0 %v906_v26, %s5261_s3 }
 0x36a   :  { %v4766_v31 = vpop.eup %4765 }
 0x36b   :  { %v1013_v33 = vmul.f32 %v4766_v31, %v4764_v30  ;;  %v4768_v40 = vpop.eup %4767  ;;  %v1012_v49 = vmul.f32 %v4766_v31, %v5624_v48 }
 0x36c   :  { %v902_v41 = vadd.f32 1.0, %v4768_v40  ;;  %v4770_v43 = vpop.eup %4769 }
 0x36d   :  { %1015 = vrot.lane.b32.xlu1 %v1013_v33, %s5261_s3  ;;  %v1009_v47 = vadd.f32 1.0, %v4770_v43 }
 0x36e   :  { %4771 = vrcp.f32 %v902_v41 }
 0x378   :  { %v4772_v52 = vpop.eup %4771 }
 0x3da   :  { %v909_v45 = vpop.permute.xlu0 %908 }
 0x3db   :  { %v5658_v46 = vadd.f32 %v909_v45, %v905_v42 }
 0x3dd   :  { %4773 = vtanh.f32 %v5658_v46 }
 0x3de   :  { %4775 = vrcp.f32 %v1009_v47 }
 0x3df   :  { %v1016_v50 = vpop.permute.xlu1 %1015 }
 0x3e0   :  { %v5662_v51 = vadd.f32 %v1016_v50, %v1012_v49 }
 0x3e2   :  { %4777 = vtanh.f32 %v5662_v51 }
 0x3e7   :  { %v4774_v54 = vpop.eup %4773 }
 0x3e8   :  { %v913_v57 = vmul.f32 %v4774_v54, %v4772_v52  ;;  %v4776_v44 = vpop.eup %4775 }
 0x3ea   :  { %915 = vrot.lane.b32.xlu0 %v913_v57, %s5261_s3 }
 0x3ec   :  { %v4778_v58 = vpop.eup %4777 }
 0x3ed   :  { %v1020_v59 = vmul.f32 %v4778_v58, %v4776_v44 }
 0x3ef   :  { %1129 = vrot.lane.b32.xlu1 %v1020_v59, %s5261_s3  ;;  %1021 = vst.msk [vmem:[#allocation10 + $0x70] sm:$0xff] %vm813_vm1, %v1020_v59 }
 0x45c   :  { %v916_v60 = vpop.permute.xlu0 %915 }
 0x45d   :  { %918 = vst.msk [vmem:[#allocation10 + $0x8] sm:$0xff] %vm116_vm0, %v916_v60  ;;  %4019 = vmatmul.mubr.msk.f32.vlgmr.msra.gmra.mrb[4].mxu0 %vm116_vm0, %v916_v60 }
 0x45e   :  { %4178 = vmatpush1.bf16.msra.mxu0 %v5426_v62  ;;  %1297 = vmatprep.mubr.f32.mxu0 %v5260_v0 }
 0x45f   :  { %4180 = vmatprep.subr.bf16.mxu0 %v5432_v3 }
 0x461   :  { %v1130_v48 = vpop.permute.xlu1 %1129 }
 0x462   :  { %4020 = vmatmul.mubr.msk.f32.vlgmr.msra.gmra.mrb[26].mxu1 %vm116_vm0, %v1130_v48  ;;  %4182 = vmatpush1.bf16.msra.mxu0 %v5444_v14 }
 0x463   :  { %4194 = vmatpush1.bf16.msra.mxu1 %v5429_v2  ;;  %4184 = vmatprep.subr.bf16.mxu0 %v5450_v16 }
 0x464   :  { %4196 = vmatprep.subr.bf16.mxu1 %v5435_v7  ;;  %1404 = vmatprep.mubr.f32.mxu1 %v5260_v0 }
 0x466   :  { %4186 = vmatpush1.bf16.msra.mxu0 %v5463_v27 }
 0x467   :  { %4198 = vmatpush1.bf16.msra.mxu1 %v5448_v15  ;;  %4188 = vmatprep.subr.bf16.mxu0 %v5469_v29 }
 0x468   :  { %4200 = vmatprep.subr.bf16.mxu1 %v5454_v20 }
 0x46a   :  { %4190 = vmatpush1.bf16.msra.mxu0 %v5482_v36 }
 0x46b   :  { %4202 = vmatpush1.bf16.msra.mxu1 %v5467_v28  ;;  %4208 = vmatprep.subr.bf16.mxu0 %v5419_v53 }
 0x46c   :  { %4204 = vmatprep.subr.bf16.mxu1 %v5473_v32 }
 0x46f   :  { %4206 = vmatpush1.bf16.msra.mxu1 %v5486_v37 }
 0x470   :  { %4224 = vmatprep.subr.bf16.mxu1 %v5421_v56 }
 0x530   :  { %v1092_v63 = vpop.f32.mrb[4].mxu0 }
 0x531   :  { %v4595_v1 = vadd.f32 %v1092_v63, %v5604_v55  ;;  %v1094_v4 = vpop.f32.mrb[5].mxu0 }
 0x532   :  { %v4596_v18 = vadd.f32 %v1094_v4, %v5613_v11 }
 0x533   :  { %v1099_v5 = vsub.f32 0.0, %v4595_v1 }
 0x534   :  { %v1106_v35 = vsub.f32 0.0, %v4596_v18 }
 0x535   :  { %v1100_v6 = vmul.f32 1.442695, %v1099_v5  ;;  %v1199_v8 = vpop.f32.mrb[26].mxu1 }
 0x536   :  { %v4649_v9 = vadd.f32 %v1199_v8, %v5610_v61  ;;  %v1201_v10 = vpop.f32.mrb[27].mxu1  ;;  %v1107_v38 = vmul.f32 1.442695, %v1106_v35 }
 0x537   :  { %4779 = vpow2.f32 %v1100_v6  ;;  %v4650_v22 = vadd.f32 %v1201_v10, %v5616_v13 }
 0x538   :  { %v1206_v12 = vsub.f32 0.0, %v4649_v9 }
 0x539   :  { %v1213_v39 = vsub.f32 0.0, %v4650_v22 }
 0x53a   :  { %v1207_v17 = vmul.f32 1.442695, %v1206_v12 }
 0x53b   :  { %v1214_v40 = vmul.f32 1.442695, %v1213_v39 }
 0x53c   :  { %4781 = vpow2.f32 %v1207_v17 }
 0x53d   :  { %4783 = vtanh.f32 %v4596_v18 }
 0x541   :  { %v4780_v19 = vpop.eup %4779 }
 0x542   :  { %v1102_v21 = vadd.f32 1.0, %v4780_v19 }
 0x544   :  { %4785 = vrcp.f32 %v1102_v21 }
 0x545   :  { %4787 = vtanh.f32 %v4650_v22 }
 0x546   :  { %v4782_v23 = vpop.eup %4781 }
 0x547   :  { %v1209_v24 = vadd.f32 1.0, %v4782_v23  ;;  %v4784_v25 = vpop.eup %4783 }
 0x549   :  { %4789 = vrcp.f32 %v1209_v24 }
 0x54a   :  { %4791 = vpow2.f32 %v1107_v38 }
 0x54b   :  { %4793 = vpow2.f32 %v1214_v40 }
 0x54e   :  { %v4786_v26 = vpop.eup %4785 }
 0x54f   :  { %v1113_v30 = vmul.f32 %v4786_v26, %v4784_v25  ;;  %v4788_v31 = vpop.eup %4787  ;;  %v1112_v43 = vmul.f32 %v4786_v26, %v5658_v46 }
 0x551   :  { %1115 = vrot.lane.b32.xlu0 %v1113_v30, %s5261_s3 }
 0x553   :  { %v4790_v33 = vpop.eup %4789 }
 0x554   :  { %v1220_v34 = vmul.f32 %v4790_v33, %v4788_v31  ;;  %v4792_v41 = vpop.eup %4791  ;;  %v1219_v52 = vmul.f32 %v4790_v33, %v5662_v51 }
 0x555   :  { %v1109_v42 = vadd.f32 1.0, %v4792_v41  ;;  %v4794_v45 = vpop.eup %4793 }
 0x556   :  { %1222 = vrot.lane.b32.xlu1 %v1220_v34, %s5261_s3  ;;  %v1216_v50 = vadd.f32 1.0, %v4794_v45 }
 0x557   :  { %4795 = vrcp.f32 %v1109_v42 }
 0x561   :  { %v4796_v44 = vpop.eup %4795 }
 0x5c3   :  { %v1116_v47 = vpop.permute.xlu0 %1115 }
 0x5c4   :  { %v5696_v49 = vadd.f32 %v1116_v47, %v1112_v43 }
 0x5c6   :  { %4797 = vtanh.f32 %v5696_v49 }
 0x5c7   :  { %4799 = vrcp.f32 %v1216_v50 }
 0x5c8   :  { %v1223_v54 = vpop.permute.xlu1 %1222 }
 0x5c9   :  { %v5700_v57 = vadd.f32 %v1223_v54, %v1219_v52 }
 0x5cb   :  { %4801 = vtanh.f32 %v5700_v57 }
 0x5d0   :  { %v4798_v58 = vpop.eup %4797 }
 0x5d1   :  { %v1120_v59 = vmul.f32 %v4798_v58, %v4796_v44  ;;  %v4800_v46 = vpop.eup %4799 }
 0x5d3   :  { %1122 = vrot.lane.b32.xlu0 %v1120_v59, %s5261_s3 }
 0x5d5   :  { %v4802_v60 = vpop.eup %4801 }
 0x5d6   :  { %v1227_v48 = vmul.f32 %v4802_v60, %v4800_v46 }
 0x5d8   :  { %1336 = vrot.lane.b32.xlu1 %v1227_v48, %s5261_s3  ;;  %1228 = vst.msk [vmem:[#allocation10 + $0x68] sm:$0xff] %vm813_vm1, %v1227_v48 }
 0x645   :  { %v1123_v63 = vpop.permute.xlu0 %1122 }
 0x646   :  { %1125 = vst.msk [vmem:[#allocation10 + $0x10] sm:$0xff] %vm116_vm0, %v1123_v63  ;;  %4021 = vmatmul.mubr.msk.f32.vlgmr.msra.gmra.mrb[6].mxu0 %vm116_vm0, %v1123_v63 }
 0x647   :  { %4210 = vmatpush1.bf16.msra.mxu0 %v5426_v62  ;;  %1504 = vmatprep.mubr.f32.mxu0 %v5260_v0 }
 0x648   :  { %4212 = vmatprep.subr.bf16.mxu0 %v5432_v3 }
 0x64a   :  { %v1337_v51 = vpop.permute.xlu1 %1336 }
 0x64b   :  { %4022 = vmatmul.mubr.msk.f32.vlgmr.msra.gmra.mrb[24].mxu1 %vm116_vm0, %v1337_v51  ;;  %4214 = vmatpush1.bf16.msra.mxu0 %v5444_v14 }
 0x64c   :  { %4226 = vmatpush1.bf16.msra.mxu1 %v5429_v2  ;;  %4216 = vmatprep.subr.bf16.mxu0 %v5450_v16 }
 0x64d   :  { %4228 = vmatprep.subr.bf16.mxu1 %v5435_v7  ;;  %1611 = vmatprep.mubr.f32.mxu1 %v5260_v0 }
 0x64f   :  { %4218 = vmatpush1.bf16.msra.mxu0 %v5463_v27 }
 0x650   :  { %4230 = vmatpush1.bf16.msra.mxu1 %v5448_v15  ;;  %4220 = vmatprep.subr.bf16.mxu0 %v5469_v29 }
 0x651   :  { %4232 = vmatprep.subr.bf16.mxu1 %v5454_v20 }
 0x653   :  { %4222 = vmatpush1.bf16.msra.mxu0 %v5482_v36 }
 0x654   :  { %4234 = vmatpush1.bf16.msra.mxu1 %v5467_v28  ;;  %4240 = vmatprep.subr.bf16.mxu0 %v5419_v53 }
 0x655   :  { %4236 = vmatprep.subr.bf16.mxu1 %v5473_v32 }
 0x658   :  { %4238 = vmatpush1.bf16.msra.mxu1 %v5486_v37 }
 0x659   :  { %4256 = vmatprep.subr.bf16.mxu1 %v5421_v56 }
 0x719   :  { %v1299_v1 = vpop.f32.mrb[6].mxu0 }
 0x71a   :  { %v4597_v4 = vadd.f32 %v1299_v1, %v5604_v55  ;;  %v1301_v5 = vpop.f32.mrb[7].mxu0 }
 0x71b   :  { %v4598_v19 = vadd.f32 %v1301_v5, %v5613_v11 }
 0x71c   :  { %v1306_v6 = vsub.f32 0.0, %v4597_v4 }
 0x71d   :  { %v1313_v38 = vsub.f32 0.0, %v4598_v19 }
 0x71e   :  { %v1307_v8 = vmul.f32 1.442695, %v1306_v6  ;;  %v1406_v9 = vpop.f32.mrb[24].mxu1 }
 0x71f   :  { %v4647_v10 = vadd.f32 %v1406_v9, %v5610_v61  ;;  %v1408_v12 = vpop.f32.mrb[25].mxu1  ;;  %v1314_v39 = vmul.f32 1.442695, %v1313_v38 }
 0x720   :  { %4803 = vpow2.f32 %v1307_v8  ;;  %v4648_v23 = vadd.f32 %v1408_v12, %v5616_v13 }
 0x721   :  { %v1413_v17 = vsub.f32 0.0, %v4647_v10 }
 0x722   :  { %v1420_v40 = vsub.f32 0.0, %v4648_v23 }
 0x723   :  { %v1414_v18 = vmul.f32 1.442695, %v1413_v17 }
 0x724   :  { %v1421_v41 = vmul.f32 1.442695, %v1420_v40 }
 0x725   :  { %4805 = vpow2.f32 %v1414_v18 }
 0x726   :  { %4807 = vtanh.f32 %v4598_v19 }
 0x72a   :  { %v4804_v21 = vpop.eup %4803 }
 0x72b   :  { %v1309_v22 = vadd.f32 1.0, %v4804_v21 }
 0x72d   :  { %4809 = vrcp.f32 %v1309_v22 }
 0x72e   :  { %4811 = vtanh.f32 %v4648_v23 }
 0x72f   :  { %v4806_v24 = vpop.eup %4805 }
 0x730   :  { %v1416_v25 = vadd.f32 1.0, %v4806_v24  ;;  %v4808_v26 = vpop.eup %4807 }
 0x732   :  { %4813 = vrcp.f32 %v1416_v25 }
 0x733   :  { %4815 = vpow2.f32 %v1314_v39 }
 0x734   :  { %4817 = vpow2.f32 %v1421_v41 }
 0x737   :  { %v4810_v30 = vpop.eup %4809 }
 0x738   :  { %v1320_v31 = vmul.f32 %v4810_v30, %v4808_v26  ;;  %v4812_v33 = vpop.eup %4811  ;;  %v1319_v45 = vmul.f32 %v4810_v30, %v5696_v49 }
 0x73a   :  { %1322 = vrot.lane.b32.xlu0 %v1320_v31, %s5261_s3 }
 0x73c   :  { %v4814_v34 = vpop.eup %4813 }
 0x73d   :  { %v1427_v35 = vmul.f32 %v4814_v34, %v4812_v33  ;;  %v4816_v42 = vpop.eup %4815  ;;  %v1426_v44 = vmul.f32 %v4814_v34, %v5700_v57 }
 0x73e   :  { %v1316_v43 = vadd.f32 1.0, %v4816_v42  ;;  %v4818_v47 = vpop.eup %4817 }
 0x73f   :  { %1429 = vrot.lane.b32.xlu1 %v1427_v35, %s5261_s3  ;;  %v1423_v54 = vadd.f32 1.0, %v4818_v47 }
 0x740   :  { %4819 = vrcp.f32 %v1316_v43 }
 0x74a   :  { %v4820_v46 = vpop.eup %4819 }
 0x7ac   :  { %v1323_v50 = vpop.permute.xlu0 %1322 }
 0x7ad   :  { %v5734_v52 = vadd.f32 %v1323_v50, %v1319_v45 }
 0x7af   :  { %4821 = vtanh.f32 %v5734_v52 }
 0x7b0   :  { %4823 = vrcp.f32 %v1423_v54 }
 0x7b1   :  { %v1430_v58 = vpop.permute.xlu1 %1429 }
 0x7b2   :  { %v5738_v59 = vadd.f32 %v1430_v58, %v1426_v44 }
 0x7b4   :  { %4825 = vtanh.f32 %v5738_v59 }
 0x7b9   :  { %v4822_v60 = vpop.eup %4821 }
 0x7ba   :  { %v1327_v48 = vmul.f32 %v4822_v60, %v4820_v46  ;;  %v4824_v49 = vpop.eup %4823 }
 0x7bc   :  { %1329 = vrot.lane.b32.xlu0 %v1327_v48, %s5261_s3 }
 0x7be   :  { %v4826_v63 = vpop.eup %4825 }
 0x7bf   :  { %v1434_v51 = vmul.f32 %v4826_v63, %v4824_v49 }
 0x7c1   :  { %1543 = vrot.lane.b32.xlu1 %v1434_v51, %s5261_s3  ;;  %1435 = vst.msk [vmem:[#allocation10 + $0x60] sm:$0xff] %vm813_vm1, %v1434_v51 }
 0x82e   :  { %v1330_v1 = vpop.permute.xlu0 %1329 }
 0x82f   :  { %1332 = vst.msk [vmem:[#allocation10 + $0x18] sm:$0xff] %vm116_vm0, %v1330_v1  ;;  %4023 = vmatmul.mubr.msk.f32.vlgmr.msra.gmra.mrb[8].mxu0 %vm116_vm0, %v1330_v1 }
 0x830   :  { %4242 = vmatpush1.bf16.msra.mxu0 %v5426_v62  ;;  %1711 = vmatprep.mubr.f32.mxu0 %v5260_v0 }
 0x831   :  { %4244 = vmatprep.subr.bf16.mxu0 %v5432_v3 }
 0x833   :  { %v1544_v57 = vpop.permute.xlu1 %1543 }
 0x834   :  { %4024 = vmatmul.mubr.msk.f32.vlgmr.msra.gmra.mrb[22].mxu1 %vm116_vm0, %v1544_v57  ;;  %4246 = vmatpush1.bf16.msra.mxu0 %v5444_v14 }
 0x835   :  { %4258 = vmatpush1.bf16.msra.mxu1 %v5429_v2  ;;  %4248 = vmatprep.subr.bf16.mxu0 %v5450_v16 }
 0x836   :  { %4260 = vmatprep.subr.bf16.mxu1 %v5435_v7  ;;  %1818 = vmatprep.mubr.f32.mxu1 %v5260_v0 }
 0x838   :  { %4250 = vmatpush1.bf16.msra.mxu0 %v5463_v27 }
 0x839   :  { %4262 = vmatpush1.bf16.msra.mxu1 %v5448_v15  ;;  %4252 = vmatprep.subr.bf16.mxu0 %v5469_v29 }
 0x83a   :  { %4264 = vmatprep.subr.bf16.mxu1 %v5454_v20 }
 0x83c   :  { %4254 = vmatpush1.bf16.msra.mxu0 %v5482_v36 }
 0x83d   :  { %4266 = vmatpush1.bf16.msra.mxu1 %v5467_v28  ;;  %4272 = vmatprep.subr.bf16.mxu0 %v5419_v53 }
 0x83e   :  { %4268 = vmatprep.subr.bf16.mxu1 %v5473_v32 }
 0x841   :  { %4270 = vmatpush1.bf16.msra.mxu1 %v5486_v37 }
 0x842   :  { %4288 = vmatprep.subr.bf16.mxu1 %v5421_v56 }
 0x902   :  { %v1506_v4 = vpop.f32.mrb[8].mxu0 }
 0x903   :  { %v4599_v5 = vadd.f32 %v1506_v4, %v5604_v55  ;;  %v1508_v6 = vpop.f32.mrb[9].mxu0 }
 0x904   :  { %v4600_v21 = vadd.f32 %v1508_v6, %v5613_v11 }
 0x905   :  { %v1513_v8 = vsub.f32 0.0, %v4599_v5 }
 0x906   :  { %v1520_v39 = vsub.f32 0.0, %v4600_v21 }
 0x907   :  { %v1514_v9 = vmul.f32 1.442695, %v1513_v8  ;;  %v1613_v10 = vpop.f32.mrb[22].mxu1 }
 0x908   :  { %v4645_v12 = vadd.f32 %v1613_v10, %v5610_v61  ;;  %v1615_v17 = vpop.f32.mrb[23].mxu1  ;;  %v1521_v40 = vmul.f32 1.442695, %v1520_v39 }
 0x909   :  { %4827 = vpow2.f32 %v1514_v9  ;;  %v4646_v24 = vadd.f32 %v1615_v17, %v5616_v13 }
 0x90a   :  { %v1620_v18 = vsub.f32 0.0, %v4645_v12 }
 0x90b   :  { %v1627_v41 = vsub.f32 0.0, %v4646_v24 }
 0x90c   :  { %v1621_v19 = vmul.f32 1.442695, %v1620_v18 }
 0x90d   :  { %v1628_v42 = vmul.f32 1.442695, %v1627_v41 }
 0x90e   :  { %4829 = vpow2.f32 %v1621_v19 }
 0x90f   :  { %4831 = vtanh.f32 %v4600_v21 }
 0x913   :  { %v4828_v22 = vpop.eup %4827 }
 0x914   :  { %v1516_v23 = vadd.f32 1.0, %v4828_v22 }
 0x916   :  { %4833 = vrcp.f32 %v1516_v23 }
 0x917   :  { %4835 = vtanh.f32 %v4646_v24 }
 0x918   :  { %v4830_v25 = vpop.eup %4829 }
 0x919   :  { %v1623_v26 = vadd.f32 1.0, %v4830_v25  ;;  %v4832_v30 = vpop.eup %4831 }
 0x91b   :  { %4837 = vrcp.f32 %v1623_v26 }
 0x91c   :  { %4839 = vpow2.f32 %v1521_v40 }
 0x91d   :  { %4841 = vpow2.f32 %v1628_v42 }
 0x920   :  { %v4834_v31 = vpop.eup %4833 }
 0x921   :  { %v1527_v33 = vmul.f32 %v4834_v31, %v4832_v30  ;;  %v4836_v34 = vpop.eup %4835  ;;  %v1526_v47 = vmul.f32 %v4834_v31, %v5734_v52 }
 0x923   :  { %1529 = vrot.lane.b32.xlu0 %v1527_v33, %s5261_s3 }
 0x925   :  { %v4838_v35 = vpop.eup %4837 }
 0x926   :  { %v1634_v38 = vmul.f32 %v4838_v35, %v4836_v34  ;;  %v4840_v43 = vpop.eup %4839  ;;  %v1633_v46 = vmul.f32 %v4838_v35, %v5738_v59 }
 0x927   :  { %v1523_v45 = vadd.f32 1.0, %v4840_v43  ;;  %v4842_v50 = vpop.eup %4841 }
 0x928   :  { %1636 = vrot.lane.b32.xlu1 %v1634_v38, %s5261_s3  ;;  %v1630_v58 = vadd.f32 1.0, %v4842_v50 }
 0x929   :  { %4843 = vrcp.f32 %v1523_v45 }
 0x933   :  { %v4844_v49 = vpop.eup %4843 }
 0x995   :  { %v1530_v54 = vpop.permute.xlu0 %1529 }
 0x996   :  { %v5772_v44 = vadd.f32 %v1530_v54, %v1526_v47 }
 0x998   :  { %4845 = vtanh.f32 %v5772_v44 }
 0x999   :  { %4847 = vrcp.f32 %v1630_v58 }
 0x99a   :  { %v1637_v60 = vpop.permute.xlu1 %1636 }
 0x99b   :  { %v5776_v48 = vadd.f32 %v1637_v60, %v1633_v46 }
 0x99d   :  { %4849 = vtanh.f32 %v5776_v48 }
 0x9a2   :  { %v4846_v63 = vpop.eup %4845 }
 0x9a3   :  { %v1534_v51 = vmul.f32 %v4846_v63, %v4844_v49  ;;  %v4848_v52 = vpop.eup %4847 }
 0x9a5   :  { %1536 = vrot.lane.b32.xlu0 %v1534_v51, %s5261_s3 }
 0x9a7   :  { %v4850_v1 = vpop.eup %4849 }
 0x9a8   :  { %v1641_v57 = vmul.f32 %v4850_v1, %v4848_v52 }
 0x9aa   :  { %1750 = vrot.lane.b32.xlu1 %v1641_v57, %s5261_s3  ;;  %1642 = vst.msk [vmem:[#allocation10 + $0x58] sm:$0xff] %vm813_vm1, %v1641_v57 }
 0xa17   :  { %v1537_v4 = vpop.permute.xlu0 %1536 }
 0xa18   :  { %1539 = vst.msk [vmem:[#allocation10 + $0x20] sm:$0xff] %vm116_vm0, %v1537_v4  ;;  %4025 = vmatmul.mubr.msk.f32.vlgmr.msra.gmra.mrb[10].mxu0 %vm116_vm0, %v1537_v4 }
 0xa19   :  { %4274 = vmatpush1.bf16.msra.mxu0 %v5426_v62  ;;  %1918 = vmatprep.mubr.f32.mxu0 %v5260_v0 }
 0xa1a   :  { %4276 = vmatprep.subr.bf16.mxu0 %v5432_v3 }
 0xa1c   :  { %v1751_v59 = vpop.permute.xlu1 %1750 }
 0xa1d   :  { %4026 = vmatmul.mubr.msk.f32.vlgmr.msra.gmra.mrb[20].mxu1 %vm116_vm0, %v1751_v59  ;;  %4278 = vmatpush1.bf16.msra.mxu0 %v5444_v14 }
 0xa1e   :  { %4290 = vmatpush1.bf16.msra.mxu1 %v5429_v2  ;;  %4280 = vmatprep.subr.bf16.mxu0 %v5450_v16 }
 0xa1f   :  { %4292 = vmatprep.subr.bf16.mxu1 %v5435_v7  ;;  %2025 = vmatprep.mubr.f32.mxu1 %v5260_v0 }
 0xa21   :  { %4282 = vmatpush1.bf16.msra.mxu0 %v5463_v27 }
 0xa22   :  { %4294 = vmatpush1.bf16.msra.mxu1 %v5448_v15  ;;  %4284 = vmatprep.subr.bf16.mxu0 %v5469_v29 }
 0xa23   :  { %4296 = vmatprep.subr.bf16.mxu1 %v5454_v20 }
 0xa25   :  { %4286 = vmatpush1.bf16.msra.mxu0 %v5482_v36 }
 0xa26   :  { %4298 = vmatpush1.bf16.msra.mxu1 %v5467_v28  ;;  %4304 = vmatprep.subr.bf16.mxu0 %v5419_v53 }
 0xa27   :  { %4300 = vmatprep.subr.bf16.mxu1 %v5473_v32 }
 0xa2a   :  { %4302 = vmatpush1.bf16.msra.mxu1 %v5486_v37 }
 0xa2b   :  { %4320 = vmatprep.subr.bf16.mxu1 %v5421_v56 }
 0xaeb   :  { %v1713_v5 = vpop.f32.mrb[10].mxu0 }
 0xaec   :  { %v4601_v6 = vadd.f32 %v1713_v5, %v5604_v55  ;;  %v1715_v8 = vpop.f32.mrb[11].mxu0 }
 0xaed   :  { %v4602_v22 = vadd.f32 %v1715_v8, %v5613_v11 }
 0xaee   :  { %v1720_v9 = vsub.f32 0.0, %v4601_v6 }
 0xaef   :  { %v1727_v40 = vsub.f32 0.0, %v4602_v22 }
 0xaf0   :  { %v1721_v10 = vmul.f32 1.442695, %v1720_v9  ;;  %v1820_v12 = vpop.f32.mrb[20].mxu1 }
 0xaf1   :  { %v4643_v17 = vadd.f32 %v1820_v12, %v5610_v61  ;;  %v1822_v18 = vpop.f32.mrb[21].mxu1  ;;  %v1728_v41 = vmul.f32 1.442695, %v1727_v40 }
 0xaf2   :  { %4851 = vpow2.f32 %v1721_v10  ;;  %v4644_v25 = vadd.f32 %v1822_v18, %v5616_v13 }
 0xaf3   :  { %v1827_v19 = vsub.f32 0.0, %v4643_v17 }
 0xaf4   :  { %v1834_v42 = vsub.f32 0.0, %v4644_v25 }
 0xaf5   :  { %v1828_v21 = vmul.f32 1.442695, %v1827_v19 }
 0xaf6   :  { %v1835_v43 = vmul.f32 1.442695, %v1834_v42 }
 0xaf7   :  { %4853 = vpow2.f32 %v1828_v21 }
 0xaf8   :  { %4855 = vtanh.f32 %v4602_v22 }
 0xafc   :  { %v4852_v23 = vpop.eup %4851 }
 0xafd   :  { %v1723_v24 = vadd.f32 1.0, %v4852_v23 }
 0xaff   :  { %4857 = vrcp.f32 %v1723_v24 }
 0xb00   :  { %4859 = vtanh.f32 %v4644_v25 }
 0xb01   :  { %v4854_v26 = vpop.eup %4853 }
 0xb02   :  { %v1830_v30 = vadd.f32 1.0, %v4854_v26  ;;  %v4856_v31 = vpop.eup %4855 }
 0xb04   :  { %4861 = vrcp.f32 %v1830_v30 }
 0xb05   :  { %4863 = vpow2.f32 %v1728_v41 }
 0xb06   :  { %4865 = vpow2.f32 %v1835_v43 }
 0xb09   :  { %v4858_v33 = vpop.eup %4857 }
 0xb0a   :  { %v1734_v34 = vmul.f32 %v4858_v33, %v4856_v31  ;;  %v4860_v35 = vpop.eup %4859  ;;  %v1733_v50 = vmul.f32 %v4858_v33, %v5772_v44 }
 0xb0c   :  { %1736 = vrot.lane.b32.xlu0 %v1734_v34, %s5261_s3 }
 0xb0e   :  { %v4862_v38 = vpop.eup %4861 }
 0xb0f   :  { %v1841_v39 = vmul.f32 %v4862_v38, %v4860_v35  ;;  %v4864_v45 = vpop.eup %4863  ;;  %v1840_v49 = vmul.f32 %v4862_v38, %v5776_v48 }
 0xb10   :  { %v1730_v47 = vadd.f32 1.0, %v4864_v45  ;;  %v4866_v54 = vpop.eup %4865 }
 0xb11   :  { %1843 = vrot.lane.b32.xlu1 %v1841_v39, %s5261_s3  ;;  %v1837_v60 = vadd.f32 1.0, %v4866_v54 }
 0xb12   :  { %4867 = vrcp.f32 %v1730_v47 }
 0xb1c   :  { %v4868_v52 = vpop.eup %4867 }
 0xb7e   :  { %v1737_v58 = vpop.permute.xlu0 %1736 }
 0xb7f   :  { %v5810_v46 = vadd.f32 %v1737_v58, %v1733_v50 }
 0xb81   :  { %4869 = vtanh.f32 %v5810_v46 }
 0xb82   :  { %4871 = vrcp.f32 %v1837_v60 }
 0xb83   :  { %v1844_v63 = vpop.permute.xlu1 %1843 }
 0xb84   :  { %v5814_v51 = vadd.f32 %v1844_v63, %v1840_v49 }
 0xb86   :  { %4873 = vtanh.f32 %v5814_v51 }
 0xb8b   :  { %v4870_v1 = vpop.eup %4869 }
 0xb8c   :  { %v1741_v57 = vmul.f32 %v4870_v1, %v4868_v52  ;;  %v4872_v44 = vpop.eup %4871 }
 0xb8e   :  { %1743 = vrot.lane.b32.xlu0 %v1741_v57, %s5261_s3 }
 0xb90   :  { %v4874_v4 = vpop.eup %4873 }
 0xb91   :  { %v1848_v59 = vmul.f32 %v4874_v4, %v4872_v44 }
 0xb93   :  { %1957 = vrot.lane.b32.xlu1 %v1848_v59, %s5261_s3  ;;  %1849 = vst.msk [vmem:[#allocation10 + $0x50] sm:$0xff] %vm813_vm1, %v1848_v59 }
 0xc00   :  { %v1744_v5 = vpop.permute.xlu0 %1743 }
 0xc01   :  { %1746 = vst.msk [vmem:[#allocation10 + $0x28] sm:$0xff] %vm116_vm0, %v1744_v5  ;;  %4027 = vmatmul.mubr.msk.f32.vlgmr.msra.gmra.mrb[12].mxu0 %vm116_vm0, %v1744_v5 }
 0xc02   :  { %4306 = vmatpush1.bf16.msra.mxu0 %v5426_v62  ;;  %2125 = vmatprep.mubr.f32.mxu0 %v5260_v0 }
 0xc03   :  { %4308 = vmatprep.subr.bf16.mxu0 %v5432_v3 }
 0xc05   :  { %v1958_v48 = vpop.permute.xlu1 %1957 }
 0xc06   :  { %4028 = vmatmul.mubr.msk.f32.vlgmr.msra.gmra.mrb[18].mxu1 %vm116_vm0, %v1958_v48  ;;  %4310 = vmatpush1.bf16.msra.mxu0 %v5444_v14 }
 0xc07   :  { %4322 = vmatpush1.bf16.msra.mxu1 %v5429_v2  ;;  %4312 = vmatprep.subr.bf16.mxu0 %v5450_v16 }
 0xc08   :  { %4324 = vmatprep.subr.bf16.mxu1 %v5435_v7  ;;  %2232 = vmatprep.mubr.f32.mxu1 %v5260_v0 }
 0xc0a   :  { %4314 = vmatpush1.bf16.msra.mxu0 %v5463_v27 }
 0xc0b   :  { %4326 = vmatpush1.bf16.msra.mxu1 %v5448_v15  ;;  %4316 = vmatprep.subr.bf16.mxu0 %v5469_v29 }
 0xc0c   :  { %4328 = vmatprep.subr.bf16.mxu1 %v5454_v20 }
 0xc0e   :  { %4318 = vmatpush1.bf16.msra.mxu0 %v5482_v36 }
 0xc0f   :  { %4330 = vmatpush1.bf16.msra.mxu1 %v5467_v28  ;;  %4336 = vmatprep.subr.bf16.mxu0 %v5419_v53 }
 0xc10   :  { %4332 = vmatprep.subr.bf16.mxu1 %v5473_v32 }
 0xc13   :  { %4334 = vmatpush1.bf16.msra.mxu1 %v5486_v37 }
 0xc14   :  { %4352 = vmatprep.subr.bf16.mxu1 %v5421_v56 }
 0xcd4   :  { %v1920_v6 = vpop.f32.mrb[12].mxu0 }
 0xcd5   :  { %v4603_v8 = vadd.f32 %v1920_v6, %v5604_v55  ;;  %v1922_v9 = vpop.f32.mrb[13].mxu0 }
 0xcd6   :  { %v4604_v23 = vadd.f32 %v1922_v9, %v5613_v11 }
 0xcd7   :  { %v1927_v10 = vsub.f32 0.0, %v4603_v8 }
 0xcd8   :  { %v1934_v41 = vsub.f32 0.0, %v4604_v23 }
 0xcd9   :  { %v1928_v12 = vmul.f32 1.442695, %v1927_v10  ;;  %v2027_v17 = vpop.f32.mrb[18].mxu1 }
 0xcda   :  { %v4641_v18 = vadd.f32 %v2027_v17, %v5610_v61  ;;  %v2029_v19 = vpop.f32.mrb[19].mxu1  ;;  %v1935_v42 = vmul.f32 1.442695, %v1934_v41 }
 0xcdb   :  { %4875 = vpow2.f32 %v1928_v12  ;;  %v4642_v26 = vadd.f32 %v2029_v19, %v5616_v13 }
 0xcdc   :  { %v2034_v21 = vsub.f32 0.0, %v4641_v18 }
 0xcdd   :  { %v2041_v43 = vsub.f32 0.0, %v4642_v26 }
 0xcde   :  { %v2035_v22 = vmul.f32 1.442695, %v2034_v21 }
 0xcdf   :  { %v2042_v45 = vmul.f32 1.442695, %v2041_v43 }
 0xce0   :  { %4877 = vpow2.f32 %v2035_v22 }
 0xce1   :  { %4879 = vtanh.f32 %v4604_v23 }
 0xce5   :  { %v4876_v24 = vpop.eup %4875 }
 0xce6   :  { %v1930_v25 = vadd.f32 1.0, %v4876_v24 }
 0xce8   :  { %4881 = vrcp.f32 %v1930_v25 }
 0xce9   :  { %4883 = vtanh.f32 %v4642_v26 }
 0xcea   :  { %v4878_v30 = vpop.eup %4877 }
 0xceb   :  { %v2037_v31 = vadd.f32 1.0, %v4878_v30  ;;  %v4880_v33 = vpop.eup %4879 }
 0xced   :  { %4885 = vrcp.f32 %v2037_v31 }
 0xcee   :  { %4887 = vpow2.f32 %v1935_v42 }
 0xcef   :  { %4889 = vpow2.f32 %v2042_v45 }
 0xcf2   :  { %v4882_v34 = vpop.eup %4881 }
 0xcf3   :  { %v1941_v35 = vmul.f32 %v4882_v34, %v4880_v33  ;;  %v4884_v38 = vpop.eup %4883  ;;  %v1940_v54 = vmul.f32 %v4882_v34, %v5810_v46 }
 0xcf5   :  { %1943 = vrot.lane.b32.xlu0 %v1941_v35, %s5261_s3 }
 0xcf7   :  { %v4886_v39 = vpop.eup %4885 }
 0xcf8   :  { %v2048_v40 = vmul.f32 %v4886_v39, %v4884_v38  ;;  %v4888_v47 = vpop.eup %4887  ;;  %v2047_v52 = vmul.f32 %v4886_v39, %v5814_v51 }
 0xcf9   :  { %v1937_v50 = vadd.f32 1.0, %v4888_v47  ;;  %v4890_v58 = vpop.eup %4889 }
 0xcfa   :  { %2050 = vrot.lane.b32.xlu1 %v2048_v40, %s5261_s3  ;;  %v2044_v63 = vadd.f32 1.0, %v4890_v58 }
 0xcfb   :  { %4891 = vrcp.f32 %v1937_v50 }
 0xd05   :  { %v4892_v44 = vpop.eup %4891 }
 0xd67   :  { %v1944_v60 = vpop.permute.xlu0 %1943 }
 0xd68   :  { %v5848_v49 = vadd.f32 %v1944_v60, %v1940_v54 }
 0xd6a   :  { %4893 = vtanh.f32 %v5848_v49 }
 0xd6b   :  { %4895 = vrcp.f32 %v2044_v63 }
 0xd6c   :  { %v2051_v1 = vpop.permute.xlu1 %2050 }
 0xd6d   :  { %v5852_v57 = vadd.f32 %v2051_v1, %v2047_v52 }
 0xd6f   :  { %4897 = vtanh.f32 %v5852_v57 }
 0xd74   :  { %v4894_v4 = vpop.eup %4893 }
 0xd75   :  { %v1948_v59 = vmul.f32 %v4894_v4, %v4892_v44  ;;  %v4896_v46 = vpop.eup %4895 }
 0xd77   :  { %1950 = vrot.lane.b32.xlu0 %v1948_v59, %s5261_s3 }
 0xd79   :  { %v4898_v5 = vpop.eup %4897 }
 0xd7a   :  { %v2055_v48 = vmul.f32 %v4898_v5, %v4896_v46 }
 0xd7c   :  { %2164 = vrot.lane.b32.xlu1 %v2055_v48, %s5261_s3  ;;  %2056 = vst.msk [vmem:[#allocation10 + $0x48] sm:$0xff] %vm813_vm1, %v2055_v48 }
 0xde9   :  { %v1951_v6 = vpop.permute.xlu0 %1950 }
 0xdea   :  { %1953 = vst.msk [vmem:[#allocation10 + $0x30] sm:$0xff] %vm116_vm0, %v1951_v6  ;;  %4029 = vmatmul.mubr.msk.f32.vlgmr.msra.gmra.mrb[14].mxu0 %vm116_vm0, %v1951_v6 }
 0xdeb   :  { %4338 = vmatpush1.bf16.msra.mxu0 %v5426_v62  ;;  %2332 = vmatprep.mubr.f32.mxu0 %v5260_v0 }
 0xdec   :  { %4340 = vmatprep.subr.bf16.mxu0 %v5432_v3 }
 0xdee   :  { %v2165_v51 = vpop.permute.xlu1 %2164 }
 0xdef   :  { %4030 = vmatmul.mubr.msk.f32.vlgmr.msra.gmra.mrb[16].mxu1 %vm116_vm0, %v2165_v51  ;;  %4342 = vmatpush1.bf16.msra.mxu0 %v5444_v14 }
 0xdf0   :  { %4354 = vmatpush1.bf16.msra.mxu1 %v5429_v2  ;;  %4344 = vmatprep.subr.bf16.mxu0 %v5450_v16 }
 0xdf1   :  { %4356 = vmatprep.subr.bf16.mxu1 %v5435_v7  ;;  %2439 = vmatprep.mubr.f32.mxu1 %v5260_v0 }
 0xdf3   :  { %4346 = vmatpush1.bf16.msra.mxu0 %v5463_v27 }
 0xdf4   :  { %4358 = vmatpush1.bf16.msra.mxu1 %v5448_v15  ;;  %4348 = vmatprep.subr.bf16.mxu0 %v5469_v29 }
 0xdf5   :  { %4360 = vmatprep.subr.bf16.mxu1 %v5454_v20 }
 0xdf7   :  { %4350 = vmatpush1.bf16.msra.mxu0 %v5482_v36 }
 0xdf8   :  { %4362 = vmatpush1.bf16.msra.mxu1 %v5467_v28  ;;  %4368 = vmatprep.subr.bf16.mxu0 %v5419_v53 }
 0xdf9   :  { %4364 = vmatprep.subr.bf16.mxu1 %v5473_v32 }
 0xdfc   :  { %4366 = vmatpush1.bf16.msra.mxu1 %v5486_v37 }
 0xdfd   :  { %4384 = vmatprep.subr.bf16.mxu1 %v5421_v56 }
 0xebd   :  { %v2127_v8 = vpop.f32.mrb[14].mxu0 }
 0xebe   :  { %v4605_v9 = vadd.f32 %v2127_v8, %v5604_v55  ;;  %v2129_v10 = vpop.f32.mrb[15].mxu0 }
 0xebf   :  { %v4606_v24 = vadd.f32 %v2129_v10, %v5613_v11 }
 0xec0   :  { %v2134_v12 = vsub.f32 0.0, %v4605_v9 }
 0xec1   :  { %v2141_v42 = vsub.f32 0.0, %v4606_v24 }
 0xec2   :  { %v2135_v17 = vmul.f32 1.442695, %v2134_v12  ;;  %v2234_v18 = vpop.f32.mrb[16].mxu1 }
 0xec3   :  { %v4639_v19 = vadd.f32 %v2234_v18, %v5610_v61  ;;  %v2236_v21 = vpop.f32.mrb[17].mxu1  ;;  %v2142_v43 = vmul.f32 1.442695, %v2141_v42 }
 0xec4   :  { %4899 = vpow2.f32 %v2135_v17  ;;  %v4640_v30 = vadd.f32 %v2236_v21, %v5616_v13 }
 0xec5   :  { %v2241_v22 = vsub.f32 0.0, %v4639_v19 }
 0xec6   :  { %v2248_v45 = vsub.f32 0.0, %v4640_v30 }
 0xec7   :  { %v2242_v23 = vmul.f32 1.442695, %v2241_v22 }
 0xec8   :  { %v2249_v47 = vmul.f32 1.442695, %v2248_v45 }
 0xec9   :  { %4901 = vpow2.f32 %v2242_v23 }
 0xeca   :  { %4903 = vtanh.f32 %v4606_v24 }
 0xece   :  { %v4900_v25 = vpop.eup %4899 }
 0xecf   :  { %v2137_v26 = vadd.f32 1.0, %v4900_v25 }
 0xed1   :  { %4905 = vrcp.f32 %v2137_v26 }
 0xed2   :  { %4907 = vtanh.f32 %v4640_v30 }
 0xed3   :  { %v4902_v31 = vpop.eup %4901 }
 0xed4   :  { %v2244_v33 = vadd.f32 1.0, %v4902_v31  ;;  %v4904_v34 = vpop.eup %4903 }
 0xed6   :  { %4909 = vrcp.f32 %v2244_v33 }
 0xed7   :  { %4911 = vpow2.f32 %v2142_v43 }
 0xed8   :  { %4913 = vpow2.f32 %v2249_v47 }
 0xedb   :  { %v4906_v35 = vpop.eup %4905 }
 0xedc   :  { %v2148_v38 = vmul.f32 %v4906_v35, %v4904_v34  ;;  %v4908_v39 = vpop.eup %4907  ;;  %v2147_v58 = vmul.f32 %v4906_v35, %v5848_v49 }
 0xede   :  { %2150 = vrot.lane.b32.xlu0 %v2148_v38, %s5261_s3 }
 0xee0   :  { %v4910_v40 = vpop.eup %4909 }
 0xee1   :  { %v2255_v41 = vmul.f32 %v4910_v40, %v4908_v39  ;;  %v4912_v50 = vpop.eup %4911  ;;  %v2254_v44 = vmul.f32 %v4910_v40, %v5852_v57 }
 0xee2   :  { %v2144_v54 = vadd.f32 1.0, %v4912_v50  ;;  %v4914_v60 = vpop.eup %4913 }
 0xee3   :  { %2257 = vrot.lane.b32.xlu1 %v2255_v41, %s5261_s3  ;;  %v2251_v1 = vadd.f32 1.0, %v4914_v60 }
 0xee4   :  { %4915 = vrcp.f32 %v2144_v54 }
 0xeee   :  { %v4916_v46 = vpop.eup %4915 }
 0xf50   :  { %v2151_v63 = vpop.permute.xlu0 %2150 }
 0xf51   :  { %v5886_v52 = vadd.f32 %v2151_v63, %v2147_v58 }
 0xf53   :  { %4917 = vtanh.f32 %v5886_v52 }
 0xf54   :  { %4919 = vrcp.f32 %v2251_v1 }
 0xf55   :  { %v2258_v4 = vpop.permute.xlu1 %2257 }
 0xf56   :  { %v5890_v59 = vadd.f32 %v2258_v4, %v2254_v44 }
 0xf58   :  { %4921 = vtanh.f32 %v5890_v59 }
 0xf5d   :  { %v4918_v5 = vpop.eup %4917 }
 0xf5e   :  { %v2155_v48 = vmul.f32 %v4918_v5, %v4916_v46  ;;  %v4920_v49 = vpop.eup %4919 }
 0xf60   :  { %2157 = vrot.lane.b32.xlu0 %v2155_v48, %s5261_s3 }
 0xf62   :  { %v4922_v6 = vpop.eup %4921 }
 0xf63   :  { %v2262_v51 = vmul.f32 %v4922_v6, %v4920_v49 }
 0xf65   :  { %2371 = vrot.lane.b32.xlu1 %v2262_v51, %s5261_s3  ;;  %2263 = vst.msk [vmem:[#allocation10 + $0x40] sm:$0xff] %vm813_vm1, %v2262_v51 }
 0xfd2   :  { %v2158_v8 = vpop.permute.xlu0 %2157 }
 0xfd3   :  { %2160 = vst.msk [vmem:[#allocation10 + $0x38] sm:$0xff] %vm116_vm0, %v2158_v8  ;;  %4031 = vmatmul.mubr.msk.f32.vlgmr.msra.gmra.mrb[16].mxu0 %vm116_vm0, %v2158_v8 }
 0xfd4   :  { %4370 = vmatpush1.bf16.msra.mxu0 %v5426_v62  ;;  %2539 = vmatprep.mubr.f32.mxu0 %v5260_v0 }
 0xfd5   :  { %4372 = vmatprep.subr.bf16.mxu0 %v5432_v3 }
 0xfd7   :  { %v2372_v57 = vpop.permute.xlu1 %2371 }
 0xfd8   :  { %4032 = vmatmul.mubr.msk.f32.vlgmr.msra.gmra.mrb[14].mxu1 %vm116_vm0, %v2372_v57  ;;  %4374 = vmatpush1.bf16.msra.mxu0 %v5444_v14 }
 0xfd9   :  { %4386 = vmatpush1.bf16.msra.mxu1 %v5429_v2  ;;  %4376 = vmatprep.subr.bf16.mxu0 %v5450_v16 }
 0xfda   :  { %4388 = vmatprep.subr.bf16.mxu1 %v5435_v7  ;;  %2646 = vmatprep.mubr.f32.mxu1 %v5260_v0 }
 0xfdc   :  { %4378 = vmatpush1.bf16.msra.mxu0 %v5463_v27 }
 0xfdd   :  { %4390 = vmatpush1.bf16.msra.mxu1 %v5448_v15  ;;  %4380 = vmatprep.subr.bf16.mxu0 %v5469_v29 }
 0xfde   :  { %4392 = vmatprep.subr.bf16.mxu1 %v5454_v20 }
 0xfe0   :  { %4382 = vmatpush1.bf16.msra.mxu0 %v5482_v36 }
 0xfe1   :  { %4394 = vmatpush1.bf16.msra.mxu1 %v5467_v28  ;;  %4400 = vmatprep.subr.bf16.mxu0 %v5419_v53 }
 0xfe2   :  { %4396 = vmatprep.subr.bf16.mxu1 %v5473_v32 }
 0xfe5   :  { %4398 = vmatpush1.bf16.msra.mxu1 %v5486_v37 }
 0xfe6   :  { %4416 = vmatprep.subr.bf16.mxu1 %v5421_v56 }
0x10a6   :  { %v2334_v9 = vpop.f32.mrb[16].mxu0 }
0x10a7   :  { %v4607_v10 = vadd.f32 %v2334_v9, %v5604_v55  ;;  %v2336_v12 = vpop.f32.mrb[17].mxu0 }
0x10a8   :  { %v4608_v25 = vadd.f32 %v2336_v12, %v5613_v11 }
0x10a9   :  { %v2341_v17 = vsub.f32 0.0, %v4607_v10 }
0x10aa   :  { %v2348_v43 = vsub.f32 0.0, %v4608_v25 }
0x10ab   :  { %v2342_v18 = vmul.f32 1.442695, %v2341_v17  ;;  %v2441_v19 = vpop.f32.mrb[14].mxu1 }
0x10ac   :  { %v4637_v21 = vadd.f32 %v2441_v19, %v5610_v61  ;;  %v2443_v22 = vpop.f32.mrb[15].mxu1  ;;  %v2349_v45 = vmul.f32 1.442695, %v2348_v43 }
0x10ad   :  { %4923 = vpow2.f32 %v2342_v18  ;;  %v4638_v31 = vadd.f32 %v2443_v22, %v5616_v13 }
0x10ae   :  { %v2448_v23 = vsub.f32 0.0, %v4637_v21 }
0x10af   :  { %v2455_v47 = vsub.f32 0.0, %v4638_v31 }
0x10b0   :  { %v2449_v24 = vmul.f32 1.442695, %v2448_v23 }
0x10b1   :  { %v2456_v50 = vmul.f32 1.442695, %v2455_v47 }
0x10b2   :  { %4925 = vpow2.f32 %v2449_v24 }
0x10b3   :  { %4927 = vtanh.f32 %v4608_v25 }
0x10b7   :  { %v4924_v26 = vpop.eup %4923 }
0x10b8   :  { %v2344_v30 = vadd.f32 1.0, %v4924_v26 }
0x10ba   :  { %4929 = vrcp.f32 %v2344_v30 }
0x10bb   :  { %4931 = vtanh.f32 %v4638_v31 }
0x10bc   :  { %v4926_v33 = vpop.eup %4925 }
0x10bd   :  { %v2451_v34 = vadd.f32 1.0, %v4926_v33  ;;  %v4928_v35 = vpop.eup %4927 }
0x10bf   :  { %4933 = vrcp.f32 %v2451_v34 }
0x10c0   :  { %4935 = vpow2.f32 %v2349_v45 }
0x10c1   :  { %4937 = vpow2.f32 %v2456_v50 }
0x10c4   :  { %v4930_v38 = vpop.eup %4929 }
0x10c5   :  { %v2355_v39 = vmul.f32 %v4930_v38, %v4928_v35  ;;  %v4932_v40 = vpop.eup %4931  ;;  %v2354_v60 = vmul.f32 %v4930_v38, %v5886_v52 }
0x10c7   :  { %2357 = vrot.lane.b32.xlu0 %v2355_v39, %s5261_s3 }
0x10c9   :  { %v4934_v41 = vpop.eup %4933 }
0x10ca   :  { %v2462_v42 = vmul.f32 %v4934_v41, %v4932_v40  ;;  %v4936_v54 = vpop.eup %4935  ;;  %v2461_v46 = vmul.f32 %v4934_v41, %v5890_v59 }
0x10cb   :  { %v2351_v58 = vadd.f32 1.0, %v4936_v54  ;;  %v4938_v63 = vpop.eup %4937 }
0x10cc   :  { %2464 = vrot.lane.b32.xlu1 %v2462_v42, %s5261_s3  ;;  %v2458_v4 = vadd.f32 1.0, %v4938_v63 }
0x10cd   :  { %4939 = vrcp.f32 %v2351_v58 }
0x10d7   :  { %v4940_v49 = vpop.eup %4939 }
0x1139   :  { %v2358_v1 = vpop.permute.xlu0 %2357 }
0x113a   :  { %v5924_v44 = vadd.f32 %v2358_v1, %v2354_v60 }
0x113c   :  { %4941 = vtanh.f32 %v5924_v44 }
0x113d   :  { %4943 = vrcp.f32 %v2458_v4 }
0x113e   :  { %v2465_v5 = vpop.permute.xlu1 %2464 }
0x113f   :  { %v5928_v48 = vadd.f32 %v2465_v5, %v2461_v46 }
0x1141   :  { %4945 = vtanh.f32 %v5928_v48 }
0x1146   :  { %v4942_v6 = vpop.eup %4941 }
0x1147   :  { %v2362_v51 = vmul.f32 %v4942_v6, %v4940_v49  ;;  %v4944_v52 = vpop.eup %4943 }
0x1149   :  { %2364 = vrot.lane.b32.xlu0 %v2362_v51, %s5261_s3 }
0x114b   :  { %v4946_v8 = vpop.eup %4945 }
0x114c   :  { %v2469_v57 = vmul.f32 %v4946_v8, %v4944_v52 }
0x114e   :  { %2578 = vrot.lane.b32.xlu1 %v2469_v57, %s5261_s3  ;;  %2470 = vst.msk [vmem:[#allocation10 + $0x38] sm:$0xff] %vm813_vm1, %v2469_v57 }
0x11bb   :  { %v2365_v9 = vpop.permute.xlu0 %2364 }
0x11bc   :  { %2367 = vst.msk [vmem:[#allocation10 + $0x40] sm:$0xff] %vm116_vm0, %v2365_v9  ;;  %4033 = vmatmul.mubr.msk.f32.vlgmr.msra.gmra.mrb[18].mxu0 %vm116_vm0, %v2365_v9 }
0x11bd   :  { %4402 = vmatpush1.bf16.msra.mxu0 %v5426_v62  ;;  %2746 = vmatprep.mubr.f32.mxu0 %v5260_v0 }
0x11be   :  { %4404 = vmatprep.subr.bf16.mxu0 %v5432_v3 }
0x11c0   :  { %v2579_v59 = vpop.permute.xlu1 %2578 }
0x11c1   :  { %4034 = vmatmul.mubr.msk.f32.vlgmr.msra.gmra.mrb[12].mxu1 %vm116_vm0, %v2579_v59  ;;  %4406 = vmatpush1.bf16.msra.mxu0 %v5444_v14 }
0x11c2   :  { %4418 = vmatpush1.bf16.msra.mxu1 %v5429_v2  ;;  %4408 = vmatprep.subr.bf16.mxu0 %v5450_v16 }
0x11c3   :  { %4420 = vmatprep.subr.bf16.mxu1 %v5435_v7  ;;  %2853 = vmatprep.mubr.f32.mxu1 %v5260_v0 }
0x11c5   :  { %4410 = vmatpush1.bf16.msra.mxu0 %v5463_v27 }
0x11c6   :  { %4422 = vmatpush1.bf16.msra.mxu1 %v5448_v15  ;;  %4412 = vmatprep.subr.bf16.mxu0 %v5469_v29 }
0x11c7   :  { %4424 = vmatprep.subr.bf16.mxu1 %v5454_v20 }
0x11c9   :  { %4414 = vmatpush1.bf16.msra.mxu0 %v5482_v36 }
0x11ca   :  { %4426 = vmatpush1.bf16.msra.mxu1 %v5467_v28  ;;  %4432 = vmatprep.subr.bf16.mxu0 %v5419_v53 }
0x11cb   :  { %4428 = vmatprep.subr.bf16.mxu1 %v5473_v32 }
0x11ce   :  { %4430 = vmatpush1.bf16.msra.mxu1 %v5486_v37 }
0x11cf   :  { %4448 = vmatprep.subr.bf16.mxu1 %v5421_v56 }
0x128f   :  { %v2541_v10 = vpop.f32.mrb[18].mxu0 }
0x1290   :  { %v4609_v12 = vadd.f32 %v2541_v10, %v5604_v55  ;;  %v2543_v17 = vpop.f32.mrb[19].mxu0 }
0x1291   :  { %v4610_v26 = vadd.f32 %v2543_v17, %v5613_v11 }
0x1292   :  { %v2548_v18 = vsub.f32 0.0, %v4609_v12 }
0x1293   :  { %v2555_v45 = vsub.f32 0.0, %v4610_v26 }
0x1294   :  { %v2549_v19 = vmul.f32 1.442695, %v2548_v18  ;;  %v2648_v21 = vpop.f32.mrb[12].mxu1 }
0x1295   :  { %v4635_v22 = vadd.f32 %v2648_v21, %v5610_v61  ;;  %v2650_v23 = vpop.f32.mrb[13].mxu1  ;;  %v2556_v47 = vmul.f32 1.442695, %v2555_v45 }
0x1296   :  { %4947 = vpow2.f32 %v2549_v19  ;;  %v4636_v33 = vadd.f32 %v2650_v23, %v5616_v13 }
0x1297   :  { %v2655_v24 = vsub.f32 0.0, %v4635_v22 }
0x1298   :  { %v2662_v50 = vsub.f32 0.0, %v4636_v33 }
0x1299   :  { %v2656_v25 = vmul.f32 1.442695, %v2655_v24 }
0x129a   :  { %v2663_v54 = vmul.f32 1.442695, %v2662_v50 }
0x129b   :  { %4949 = vpow2.f32 %v2656_v25 }
0x129c   :  { %4951 = vtanh.f32 %v4610_v26 }
0x12a0   :  { %v4948_v30 = vpop.eup %4947 }
0x12a1   :  { %v2551_v31 = vadd.f32 1.0, %v4948_v30 }
0x12a3   :  { %4953 = vrcp.f32 %v2551_v31 }
0x12a4   :  { %4955 = vtanh.f32 %v4636_v33 }
0x12a5   :  { %v4950_v34 = vpop.eup %4949 }
0x12a6   :  { %v2658_v35 = vadd.f32 1.0, %v4950_v34  ;;  %v4952_v38 = vpop.eup %4951 }
0x12a8   :  { %4957 = vrcp.f32 %v2658_v35 }
0x12a9   :  { %4959 = vpow2.f32 %v2556_v47 }
0x12aa   :  { %4961 = vpow2.f32 %v2663_v54 }
0x12ad   :  { %v4954_v39 = vpop.eup %4953 }
0x12ae   :  { %v2562_v40 = vmul.f32 %v4954_v39, %v4952_v38  ;;  %v4956_v41 = vpop.eup %4955  ;;  %v2561_v63 = vmul.f32 %v4954_v39, %v5924_v44 }
0x12b0   :  { %2564 = vrot.lane.b32.xlu0 %v2562_v40, %s5261_s3 }
0x12b2   :  { %v4958_v42 = vpop.eup %4957 }
0x12b3   :  { %v2669_v43 = vmul.f32 %v4958_v42, %v4956_v41  ;;  %v4960_v58 = vpop.eup %4959  ;;  %v2668_v49 = vmul.f32 %v4958_v42, %v5928_v48 }
0x12b4   :  { %v2558_v60 = vadd.f32 1.0, %v4960_v58  ;;  %v4962_v1 = vpop.eup %4961 }
0x12b5   :  { %2671 = vrot.lane.b32.xlu1 %v2669_v43, %s5261_s3  ;;  %v2665_v5 = vadd.f32 1.0, %v4962_v1 }
0x12b6   :  { %4963 = vrcp.f32 %v2558_v60 }
0x12c0   :  { %v4964_v52 = vpop.eup %4963 }
0x1322   :  { %v2565_v4 = vpop.permute.xlu0 %2564 }
0x1323   :  { %v5962_v46 = vadd.f32 %v2565_v4, %v2561_v63 }
0x1325   :  { %4965 = vtanh.f32 %v5962_v46 }
0x1326   :  { %4967 = vrcp.f32 %v2665_v5 }
0x1327   :  { %v2672_v6 = vpop.permute.xlu1 %2671 }
0x1328   :  { %v5966_v51 = vadd.f32 %v2672_v6, %v2668_v49 }
0x132a   :  { %4969 = vtanh.f32 %v5966_v51 }
0x132f   :  { %v4966_v8 = vpop.eup %4965 }
0x1330   :  { %v2569_v57 = vmul.f32 %v4966_v8, %v4964_v52  ;;  %v4968_v44 = vpop.eup %4967 }
0x1332   :  { %2571 = vrot.lane.b32.xlu0 %v2569_v57, %s5261_s3 }
0x1334   :  { %v4970_v9 = vpop.eup %4969 }
0x1335   :  { %v2676_v59 = vmul.f32 %v4970_v9, %v4968_v44 }
0x1337   :  { %2785 = vrot.lane.b32.xlu1 %v2676_v59, %s5261_s3  ;;  %2677 = vst.msk [vmem:[#allocation10 + $0x30] sm:$0xff] %vm813_vm1, %v2676_v59 }
0x13a4   :  { %v2572_v10 = vpop.permute.xlu0 %2571 }
0x13a5   :  { %2574 = vst.msk [vmem:[#allocation10 + $0x48] sm:$0xff] %vm116_vm0, %v2572_v10  ;;  %4035 = vmatmul.mubr.msk.f32.vlgmr.msra.gmra.mrb[20].mxu0 %vm116_vm0, %v2572_v10 }
0x13a6   :  { %4434 = vmatpush1.bf16.msra.mxu0 %v5426_v62  ;;  %2953 = vmatprep.mubr.f32.mxu0 %v5260_v0 }
0x13a7   :  { %4436 = vmatprep.subr.bf16.mxu0 %v5432_v3 }
0x13a9   :  { %v2786_v48 = vpop.permute.xlu1 %2785 }
0x13aa   :  { %4036 = vmatmul.mubr.msk.f32.vlgmr.msra.gmra.mrb[10].mxu1 %vm116_vm0, %v2786_v48  ;;  %4438 = vmatpush1.bf16.msra.mxu0 %v5444_v14 }
0x13ab   :  { %4450 = vmatpush1.bf16.msra.mxu1 %v5429_v2  ;;  %4440 = vmatprep.subr.bf16.mxu0 %v5450_v16 }
0x13ac   :  { %4452 = vmatprep.subr.bf16.mxu1 %v5435_v7  ;;  %3060 = vmatprep.mubr.f32.mxu1 %v5260_v0 }
0x13ae   :  { %4442 = vmatpush1.bf16.msra.mxu0 %v5463_v27 }
0x13af   :  { %4454 = vmatpush1.bf16.msra.mxu1 %v5448_v15  ;;  %4444 = vmatprep.subr.bf16.mxu0 %v5469_v29 }
0x13b0   :  { %4456 = vmatprep.subr.bf16.mxu1 %v5454_v20 }
0x13b2   :  { %4446 = vmatpush1.bf16.msra.mxu0 %v5482_v36 }
0x13b3   :  { %4458 = vmatpush1.bf16.msra.mxu1 %v5467_v28  ;;  %4464 = vmatprep.subr.bf16.mxu0 %v5419_v53 }
0x13b4   :  { %4460 = vmatprep.subr.bf16.mxu1 %v5473_v32 }
0x13b7   :  { %4462 = vmatpush1.bf16.msra.mxu1 %v5486_v37 }
0x13b8   :  { %4480 = vmatprep.subr.bf16.mxu1 %v5421_v56 }
0x1478   :  { %v2748_v12 = vpop.f32.mrb[20].mxu0 }
0x1479   :  { %v4611_v17 = vadd.f32 %v2748_v12, %v5604_v55  ;;  %v2750_v18 = vpop.f32.mrb[21].mxu0 }
0x147a   :  { %v4612_v30 = vadd.f32 %v2750_v18, %v5613_v11 }
0x147b   :  { %v2755_v19 = vsub.f32 0.0, %v4611_v17 }
0x147c   :  { %v2762_v47 = vsub.f32 0.0, %v4612_v30 }
0x147d   :  { %v2756_v21 = vmul.f32 1.442695, %v2755_v19  ;;  %v2855_v22 = vpop.f32.mrb[10].mxu1 }
0x147e   :  { %v4633_v23 = vadd.f32 %v2855_v22, %v5610_v61  ;;  %v2857_v24 = vpop.f32.mrb[11].mxu1  ;;  %v2763_v50 = vmul.f32 1.442695, %v2762_v47 }
0x147f   :  { %4971 = vpow2.f32 %v2756_v21  ;;  %v4634_v34 = vadd.f32 %v2857_v24, %v5616_v13 }
0x1480   :  { %v2862_v25 = vsub.f32 0.0, %v4633_v23 }
0x1481   :  { %v2869_v54 = vsub.f32 0.0, %v4634_v34 }
0x1482   :  { %v2863_v26 = vmul.f32 1.442695, %v2862_v25 }
0x1483   :  { %v2870_v58 = vmul.f32 1.442695, %v2869_v54 }
0x1484   :  { %4973 = vpow2.f32 %v2863_v26 }
0x1485   :  { %4975 = vtanh.f32 %v4612_v30 }
0x1489   :  { %v4972_v31 = vpop.eup %4971 }
0x148a   :  { %v2758_v33 = vadd.f32 1.0, %v4972_v31 }
0x148c   :  { %4977 = vrcp.f32 %v2758_v33 }
0x148d   :  { %4979 = vtanh.f32 %v4634_v34 }
0x148e   :  { %v4974_v35 = vpop.eup %4973 }
0x148f   :  { %v2865_v38 = vadd.f32 1.0, %v4974_v35  ;;  %v4976_v39 = vpop.eup %4975 }
0x1491   :  { %4981 = vrcp.f32 %v2865_v38 }
0x1492   :  { %4983 = vpow2.f32 %v2763_v50 }
0x1493   :  { %4985 = vpow2.f32 %v2870_v58 }
0x1496   :  { %v4978_v40 = vpop.eup %4977 }
0x1497   :  { %v2769_v41 = vmul.f32 %v4978_v40, %v4976_v39  ;;  %v4980_v42 = vpop.eup %4979  ;;  %v2768_v1 = vmul.f32 %v4978_v40, %v5962_v46 }
0x1499   :  { %2771 = vrot.lane.b32.xlu0 %v2769_v41, %s5261_s3 }
0x149b   :  { %v4982_v43 = vpop.eup %4981 }
0x149c   :  { %v2876_v45 = vmul.f32 %v4982_v43, %v4980_v42  ;;  %v4984_v60 = vpop.eup %4983  ;;  %v2875_v52 = vmul.f32 %v4982_v43, %v5966_v51 }
0x149d   :  { %v2765_v63 = vadd.f32 1.0, %v4984_v60  ;;  %v4986_v4 = vpop.eup %4985 }
0x149e   :  { %2878 = vrot.lane.b32.xlu1 %v2876_v45, %s5261_s3  ;;  %v2872_v6 = vadd.f32 1.0, %v4986_v4 }
0x149f   :  { %4987 = vrcp.f32 %v2765_v63 }
0x14a9   :  { %v4988_v44 = vpop.eup %4987 }
0x150b   :  { %v2772_v5 = vpop.permute.xlu0 %2771 }
0x150c   :  { %v6000_v49 = vadd.f32 %v2772_v5, %v2768_v1 }
0x150e   :  { %4989 = vtanh.f32 %v6000_v49 }
0x150f   :  { %4991 = vrcp.f32 %v2872_v6 }
0x1510   :  { %v2879_v8 = vpop.permute.xlu1 %2878 }
0x1511   :  { %v6004_v57 = vadd.f32 %v2879_v8, %v2875_v52 }
0x1513   :  { %4993 = vtanh.f32 %v6004_v57 }
0x1518   :  { %v4990_v9 = vpop.eup %4989 }
0x1519   :  { %v2776_v59 = vmul.f32 %v4990_v9, %v4988_v44  ;;  %v4992_v46 = vpop.eup %4991 }
0x151b   :  { %2778 = vrot.lane.b32.xlu0 %v2776_v59, %s5261_s3 }
0x151d   :  { %v4994_v10 = vpop.eup %4993 }
0x151e   :  { %v2883_v48 = vmul.f32 %v4994_v10, %v4992_v46 }
0x1520   :  { %2992 = vrot.lane.b32.xlu1 %v2883_v48, %s5261_s3  ;;  %2884 = vst.msk [vmem:[#allocation10 + $0x28] sm:$0xff] %vm813_vm1, %v2883_v48 }
0x158d   :  { %v2779_v12 = vpop.permute.xlu0 %2778 }
0x158e   :  { %2781 = vst.msk [vmem:[#allocation10 + $0x50] sm:$0xff] %vm116_vm0, %v2779_v12  ;;  %4037 = vmatmul.mubr.msk.f32.vlgmr.msra.gmra.mrb[22].mxu0 %vm116_vm0, %v2779_v12 }
0x158f   :  { %4466 = vmatpush1.bf16.msra.mxu0 %v5426_v62  ;;  %3160 = vmatprep.mubr.f32.mxu0 %v5260_v0 }
0x1590   :  { %4468 = vmatprep.subr.bf16.mxu0 %v5432_v3 }
0x1592   :  { %v2993_v51 = vpop.permute.xlu1 %2992 }
0x1593   :  { %4038 = vmatmul.mubr.msk.f32.vlgmr.msra.gmra.mrb[8].mxu1 %vm116_vm0, %v2993_v51  ;;  %4470 = vmatpush1.bf16.msra.mxu0 %v5444_v14 }
0x1594   :  { %4482 = vmatpush1.bf16.msra.mxu1 %v5429_v2  ;;  %4472 = vmatprep.subr.bf16.mxu0 %v5450_v16 }
0x1595   :  { %4484 = vmatprep.subr.bf16.mxu1 %v5435_v7  ;;  %3267 = vmatprep.mubr.f32.mxu1 %v5260_v0 }
0x1597   :  { %4474 = vmatpush1.bf16.msra.mxu0 %v5463_v27 }
0x1598   :  { %4486 = vmatpush1.bf16.msra.mxu1 %v5448_v15  ;;  %4476 = vmatprep.subr.bf16.mxu0 %v5469_v29 }
0x1599   :  { %4488 = vmatprep.subr.bf16.mxu1 %v5454_v20 }
0x159b   :  { %4478 = vmatpush1.bf16.msra.mxu0 %v5482_v36 }
0x159c   :  { %4490 = vmatpush1.bf16.msra.mxu1 %v5467_v28  ;;  %4496 = vmatprep.subr.bf16.mxu0 %v5419_v53 }
0x159d   :  { %4492 = vmatprep.subr.bf16.mxu1 %v5473_v32 }
0x15a0   :  { %4494 = vmatpush1.bf16.msra.mxu1 %v5486_v37 }
0x15a1   :  { %4512 = vmatprep.subr.bf16.mxu1 %v5421_v56 }
0x1661   :  { %v2955_v17 = vpop.f32.mrb[22].mxu0 }
0x1662   :  { %v4613_v18 = vadd.f32 %v2955_v17, %v5604_v55  ;;  %v2957_v19 = vpop.f32.mrb[23].mxu0 }
0x1663   :  { %v4614_v31 = vadd.f32 %v2957_v19, %v5613_v11 }
0x1664   :  { %v2962_v21 = vsub.f32 0.0, %v4613_v18 }
0x1665   :  { %v2969_v50 = vsub.f32 0.0, %v4614_v31 }
0x1666   :  { %v2963_v22 = vmul.f32 1.442695, %v2962_v21  ;;  %v3062_v23 = vpop.f32.mrb[8].mxu1 }
0x1667   :  { %v4631_v24 = vadd.f32 %v3062_v23, %v5610_v61  ;;  %v3064_v25 = vpop.f32.mrb[9].mxu1  ;;  %v2970_v54 = vmul.f32 1.442695, %v2969_v50 }
0x1668   :  { %4995 = vpow2.f32 %v2963_v22  ;;  %v4632_v35 = vadd.f32 %v3064_v25, %v5616_v13 }
0x1669   :  { %v3069_v26 = vsub.f32 0.0, %v4631_v24 }
0x166a   :  { %v3076_v58 = vsub.f32 0.0, %v4632_v35 }
0x166b   :  { %v3070_v30 = vmul.f32 1.442695, %v3069_v26 }
0x166c   :  { %v3077_v60 = vmul.f32 1.442695, %v3076_v58 }
0x166d   :  { %4997 = vpow2.f32 %v3070_v30 }
0x166e   :  { %4999 = vtanh.f32 %v4614_v31 }
0x1672   :  { %v4996_v33 = vpop.eup %4995 }
0x1673   :  { %v2965_v34 = vadd.f32 1.0, %v4996_v33 }
0x1675   :  { %5001 = vrcp.f32 %v2965_v34 }
0x1676   :  { %5003 = vtanh.f32 %v4632_v35 }
0x1677   :  { %v4998_v38 = vpop.eup %4997 }
0x1678   :  { %v3072_v39 = vadd.f32 1.0, %v4998_v38  ;;  %v5000_v40 = vpop.eup %4999 }
0x167a   :  { %5005 = vrcp.f32 %v3072_v39 }
0x167b   :  { %5007 = vpow2.f32 %v2970_v54 }
0x167c   :  { %5009 = vpow2.f32 %v3077_v60 }
0x167f   :  { %v5002_v41 = vpop.eup %5001 }
0x1680   :  { %v2976_v42 = vmul.f32 %v5002_v41, %v5000_v40  ;;  %v5004_v43 = vpop.eup %5003  ;;  %v2975_v4 = vmul.f32 %v5002_v41, %v6000_v49 }
0x1682   :  { %2978 = vrot.lane.b32.xlu0 %v2976_v42, %s5261_s3 }
0x1684   :  { %v5006_v45 = vpop.eup %5005 }
0x1685   :  { %v3083_v47 = vmul.f32 %v5006_v45, %v5004_v43  ;;  %v5008_v63 = vpop.eup %5007  ;;  %v3082_v44 = vmul.f32 %v5006_v45, %v6004_v57 }
0x1686   :  { %v2972_v1 = vadd.f32 1.0, %v5008_v63  ;;  %v5010_v5 = vpop.eup %5009 }
0x1687   :  { %3085 = vrot.lane.b32.xlu1 %v3083_v47, %s5261_s3  ;;  %v3079_v8 = vadd.f32 1.0, %v5010_v5 }
0x1688   :  { %5011 = vrcp.f32 %v2972_v1 }
0x1692   :  { %v5012_v46 = vpop.eup %5011 }
0x16f4   :  { %v2979_v6 = vpop.permute.xlu0 %2978 }
0x16f5   :  { %v6038_v52 = vadd.f32 %v2979_v6, %v2975_v4 }
0x16f7   :  { %5013 = vtanh.f32 %v6038_v52 }
0x16f8   :  { %5015 = vrcp.f32 %v3079_v8 }
0x16f9   :  { %v3086_v9 = vpop.permute.xlu1 %3085 }
0x16fa   :  { %v6042_v59 = vadd.f32 %v3086_v9, %v3082_v44 }
0x16fc   :  { %5017 = vtanh.f32 %v6042_v59 }
0x1701   :  { %v5014_v10 = vpop.eup %5013 }
0x1702   :  { %v2983_v48 = vmul.f32 %v5014_v10, %v5012_v46  ;;  %v5016_v49 = vpop.eup %5015 }
0x1704   :  { %2985 = vrot.lane.b32.xlu0 %v2983_v48, %s5261_s3 }
0x1706   :  { %v5018_v12 = vpop.eup %5017 }
0x1707   :  { %v3090_v51 = vmul.f32 %v5018_v12, %v5016_v49 }
0x1709   :  { %3199 = vrot.lane.b32.xlu1 %v3090_v51, %s5261_s3  ;;  %3091 = vst.msk [vmem:[#allocation10 + $0x20] sm:$0xff] %vm813_vm1, %v3090_v51 }
0x1776   :  { %v2986_v17 = vpop.permute.xlu0 %2985 }
0x1777   :  { %2988 = vst.msk [vmem:[#allocation10 + $0x58] sm:$0xff] %vm116_vm0, %v2986_v17  ;;  %4039 = vmatmul.mubr.msk.f32.vlgmr.msra.gmra.mrb[24].mxu0 %vm116_vm0, %v2986_v17 }
0x1778   :  { %4498 = vmatpush1.bf16.msra.mxu0 %v5426_v62  ;;  %3367 = vmatprep.mubr.f32.mxu0 %v5260_v0 }
0x1779   :  { %4500 = vmatprep.subr.bf16.mxu0 %v5432_v3 }
0x177b   :  { %v3200_v57 = vpop.permute.xlu1 %3199 }
0x177c   :  { %4040 = vmatmul.mubr.msk.f32.vlgmr.msra.gmra.mrb[6].mxu1 %vm116_vm0, %v3200_v57  ;;  %4502 = vmatpush1.bf16.msra.mxu0 %v5444_v14 }
0x177d   :  { %4514 = vmatpush1.bf16.msra.mxu1 %v5429_v2  ;;  %4504 = vmatprep.subr.bf16.mxu0 %v5450_v16 }
0x177e   :  { %4516 = vmatprep.subr.bf16.mxu1 %v5435_v7  ;;  %3474 = vmatprep.mubr.f32.mxu1 %v5260_v0 }
0x1780   :  { %4506 = vmatpush1.bf16.msra.mxu0 %v5463_v27 }
0x1781   :  { %4518 = vmatpush1.bf16.msra.mxu1 %v5448_v15  ;;  %4508 = vmatprep.subr.bf16.mxu0 %v5469_v29 }
0x1782   :  { %4520 = vmatprep.subr.bf16.mxu1 %v5454_v20 }
0x1784   :  { %4510 = vmatpush1.bf16.msra.mxu0 %v5482_v36 }
0x1785   :  { %4522 = vmatpush1.bf16.msra.mxu1 %v5467_v28  ;;  %4528 = vmatprep.subr.bf16.mxu0 %v5419_v53 }
0x1786   :  { %4524 = vmatprep.subr.bf16.mxu1 %v5473_v32 }
0x1789   :  { %4526 = vmatpush1.bf16.msra.mxu1 %v5486_v37 }
0x178a   :  { %4544 = vmatprep.subr.bf16.mxu1 %v5421_v56 }
0x184a   :  { %v3162_v18 = vpop.f32.mrb[24].mxu0 }
0x184b   :  { %v4615_v19 = vadd.f32 %v3162_v18, %v5604_v55  ;;  %v3164_v21 = vpop.f32.mrb[25].mxu0 }
0x184c   :  { %v4616_v33 = vadd.f32 %v3164_v21, %v5613_v11 }
0x184d   :  { %v3169_v22 = vsub.f32 0.0, %v4615_v19 }
0x184e   :  { %v3176_v54 = vsub.f32 0.0, %v4616_v33 }
0x184f   :  { %v3170_v23 = vmul.f32 1.442695, %v3169_v22  ;;  %v3269_v24 = vpop.f32.mrb[6].mxu1 }
0x1850   :  { %v4629_v25 = vadd.f32 %v3269_v24, %v5610_v61  ;;  %v3271_v26 = vpop.f32.mrb[7].mxu1  ;;  %v3177_v58 = vmul.f32 1.442695, %v3176_v54 }
0x1851   :  { %5019 = vpow2.f32 %v3170_v23  ;;  %v4630_v38 = vadd.f32 %v3271_v26, %v5616_v13 }
0x1852   :  { %v3276_v30 = vsub.f32 0.0, %v4629_v25 }
0x1853   :  { %v3283_v60 = vsub.f32 0.0, %v4630_v38 }
0x1854   :  { %v3277_v31 = vmul.f32 1.442695, %v3276_v30 }
0x1855   :  { %v3284_v63 = vmul.f32 1.442695, %v3283_v60 }
0x1856   :  { %5021 = vpow2.f32 %v3277_v31 }
0x1857   :  { %5023 = vtanh.f32 %v4616_v33 }
0x185b   :  { %v5020_v34 = vpop.eup %5019 }
0x185c   :  { %v3172_v35 = vadd.f32 1.0, %v5020_v34 }
0x185e   :  { %5025 = vrcp.f32 %v3172_v35 }
0x185f   :  { %5027 = vtanh.f32 %v4630_v38 }
0x1860   :  { %v5022_v39 = vpop.eup %5021 }
0x1861   :  { %v3279_v40 = vadd.f32 1.0, %v5022_v39  ;;  %v5024_v41 = vpop.eup %5023 }
0x1863   :  { %5029 = vrcp.f32 %v3279_v40 }
0x1864   :  { %5031 = vpow2.f32 %v3177_v58 }
0x1865   :  { %5033 = vpow2.f32 %v3284_v63 }
0x1868   :  { %v5026_v42 = vpop.eup %5025 }
0x1869   :  { %v3183_v43 = vmul.f32 %v5026_v42, %v5024_v41  ;;  %v5028_v45 = vpop.eup %5027  ;;  %v3182_v5 = vmul.f32 %v5026_v42, %v6038_v52 }
0x186b   :  { %3185 = vrot.lane.b32.xlu0 %v3183_v43, %s5261_s3 }
0x186d   :  { %v5030_v47 = vpop.eup %5029 }
0x186e   :  { %v3290_v50 = vmul.f32 %v5030_v47, %v5028_v45  ;;  %v5032_v1 = vpop.eup %5031  ;;  %v3289_v46 = vmul.f32 %v5030_v47, %v6042_v59 }
0x186f   :  { %v3179_v4 = vadd.f32 1.0, %v5032_v1  ;;  %v5034_v6 = vpop.eup %5033 }
0x1870   :  { %3292 = vrot.lane.b32.xlu1 %v3290_v50, %s5261_s3  ;;  %v3286_v9 = vadd.f32 1.0, %v5034_v6 }
0x1871   :  { %5035 = vrcp.f32 %v3179_v4 }
0x187b   :  { %v5036_v49 = vpop.eup %5035 }
0x18dd   :  { %v3186_v8 = vpop.permute.xlu0 %3185 }
0x18de   :  { %v6076_v44 = vadd.f32 %v3186_v8, %v3182_v5 }
0x18e0   :  { %5037 = vtanh.f32 %v6076_v44 }
0x18e1   :  { %5039 = vrcp.f32 %v3286_v9 }
0x18e2   :  { %v3293_v10 = vpop.permute.xlu1 %3292 }
0x18e3   :  { %v6080_v48 = vadd.f32 %v3293_v10, %v3289_v46 }
0x18e5   :  { %5041 = vtanh.f32 %v6080_v48 }
0x18ea   :  { %v5038_v12 = vpop.eup %5037 }
0x18eb   :  { %v3190_v51 = vmul.f32 %v5038_v12, %v5036_v49  ;;  %v5040_v52 = vpop.eup %5039 }
0x18ed   :  { %3192 = vrot.lane.b32.xlu0 %v3190_v51, %s5261_s3 }
0x18ef   :  { %v5042_v17 = vpop.eup %5041 }
0x18f0   :  { %v3297_v57 = vmul.f32 %v5042_v17, %v5040_v52 }
0x18f2   :  { %3406 = vrot.lane.b32.xlu1 %v3297_v57, %s5261_s3  ;;  %3298 = vst.msk [vmem:[#allocation10 + $0x18] sm:$0xff] %vm813_vm1, %v3297_v57 }
0x195f   :  { %v3193_v18 = vpop.permute.xlu0 %3192 }
0x1960   :  { %3195 = vst.msk [vmem:[#allocation10 + $0x60] sm:$0xff] %vm116_vm0, %v3193_v18  ;;  %4041 = vmatmul.mubr.msk.f32.vlgmr.msra.gmra.mrb[26].mxu0 %vm116_vm0, %v3193_v18 }
0x1961   :  { %4530 = vmatpush1.bf16.msra.mxu0 %v5426_v62  ;;  %3574 = vmatprep.mubr.f32.mxu0 %v5260_v0 }
0x1962   :  { %4532 = vmatprep.subr.bf16.mxu0 %v5432_v3 }
0x1964   :  { %v3407_v59 = vpop.permute.xlu1 %3406 }
0x1965   :  { %4042 = vmatmul.mubr.msk.f32.vlgmr.msra.gmra.mrb[4].mxu1 %vm116_vm0, %v3407_v59  ;;  %4534 = vmatpush1.bf16.msra.mxu0 %v5444_v14 }
0x1966   :  { %4546 = vmatpush1.bf16.msra.mxu1 %v5429_v2  ;;  %4536 = vmatprep.subr.bf16.mxu0 %v5450_v16 }
0x1967   :  { %4548 = vmatprep.subr.bf16.mxu1 %v5435_v7  ;;  %3681 = vmatprep.mubr.f32.mxu1 %v5260_v0 }
0x1969   :  { %4538 = vmatpush1.bf16.msra.mxu0 %v5463_v27 }
0x196a   :  { %4550 = vmatpush1.bf16.msra.mxu1 %v5448_v15  ;;  %4540 = vmatprep.subr.bf16.mxu0 %v5469_v29 }
0x196b   :  { %4552 = vmatprep.subr.bf16.mxu1 %v5454_v20 }
0x196d   :  { %4542 = vmatpush1.bf16.msra.mxu0 %v5482_v36 }
0x196e   :  { %4554 = vmatpush1.bf16.msra.mxu1 %v5467_v28  ;;  %4560 = vmatprep.subr.bf16.mxu0 %v5419_v53 }
0x196f   :  { %4556 = vmatprep.subr.bf16.mxu1 %v5473_v32 }
0x1972   :  { %4558 = vmatpush1.bf16.msra.mxu1 %v5486_v37 }
0x1973   :  { %4576 = vmatprep.subr.bf16.mxu1 %v5421_v56 }
0x1a33   :  { %v3369_v19 = vpop.f32.mrb[26].mxu0 }
0x1a34   :  { %v4617_v21 = vadd.f32 %v3369_v19, %v5604_v55  ;;  %v3371_v22 = vpop.f32.mrb[27].mxu0 }
0x1a35   :  { %v4618_v53 = vadd.f32 %v3371_v22, %v5613_v11 }
0x1a36   :  { %v3376_v23 = vsub.f32 0.0, %v4617_v21 }
0x1a37   :  { %v3383_v50 = vsub.f32 0.0, %v4618_v53 }
0x1a38   :  { %v3377_v24 = vmul.f32 1.442695, %v3376_v23  ;;  %v3476_v25 = vpop.f32.mrb[4].mxu1 }
0x1a39   :  { %v4627_v26 = vadd.f32 %v3476_v25, %v5610_v61  ;;  %v3478_v30 = vpop.f32.mrb[5].mxu1  ;;  %v3384_v54 = vmul.f32 1.442695, %v3383_v50 }
0x1a3a   :  { %5043 = vpow2.f32 %v3377_v24  ;;  %v4628_v56 = vadd.f32 %v3478_v30, %v5616_v13 }
0x1a3b   :  { %v3483_v31 = vsub.f32 0.0, %v4627_v26 }
0x1a3c   :  { %v3490_v58 = vsub.f32 0.0, %v4628_v56 }
0x1a3d   :  { %v3484_v33 = vmul.f32 1.442695, %v3483_v31 }
0x1a3e   :  { %v3491_v60 = vmul.f32 1.442695, %v3490_v58 }
0x1a3f   :  { %5045 = vpow2.f32 %v3484_v33 }
0x1a40   :  { %5047 = vtanh.f32 %v4618_v53 }
0x1a44   :  { %v5044_v34 = vpop.eup %5043 }
0x1a45   :  { %v3379_v35 = vadd.f32 1.0, %v5044_v34 }
0x1a47   :  { %5049 = vrcp.f32 %v3379_v35 }
0x1a48   :  { %5051 = vtanh.f32 %v4628_v56 }
0x1a49   :  { %v5046_v38 = vpop.eup %5045 }
0x1a4a   :  { %v3486_v39 = vadd.f32 1.0, %v5046_v38  ;;  %v5048_v40 = vpop.eup %5047 }
0x1a4c   :  { %5053 = vrcp.f32 %v3486_v39 }
0x1a4d   :  { %5055 = vpow2.f32 %v3384_v54 }
0x1a4e   :  { %5057 = vpow2.f32 %v3491_v60 }
0x1a51   :  { %v5050_v41 = vpop.eup %5049 }
0x1a52   :  { %v3390_v42 = vmul.f32 %v5050_v41, %v5048_v40  ;;  %v5052_v43 = vpop.eup %5051  ;;  %v3389_v4 = vmul.f32 %v5050_v41, %v6076_v44 }
0x1a54   :  { %3392 = vrot.lane.b32.xlu0 %v3390_v42, %s5261_s3 }
0x1a56   :  { %v5054_v45 = vpop.eup %5053 }
0x1a57   :  { %v3497_v47 = vmul.f32 %v5054_v45, %v5052_v43  ;;  %v5056_v63 = vpop.eup %5055  ;;  %v3496_v46 = vmul.f32 %v5054_v45, %v6080_v48 }
0x1a58   :  { %v3386_v1 = vadd.f32 1.0, %v5056_v63  ;;  %v5058_v5 = vpop.eup %5057 }
0x1a59   :  { %3499 = vrot.lane.b32.xlu1 %v3497_v47, %s5261_s3  ;;  %v3493_v9 = vadd.f32 1.0, %v5058_v5 }
0x1a5a   :  { %5059 = vrcp.f32 %v3386_v1 }
0x1a64   :  { %v5060_v12 = vpop.eup %5059 }
0x1ac6   :  { %v3393_v6 = vpop.permute.xlu0 %3392 }
0x1ac7   :  { %v6114_v8 = vadd.f32 %v3393_v6, %v3389_v4 }
0x1ac9   :  { %5061 = vtanh.f32 %v6114_v8 }
0x1aca   :  { %5063 = vrcp.f32 %v3493_v9 }
0x1acb   :  { %v3500_v10 = vpop.permute.xlu1 %3499 }
0x1acc   :  { %v6118_v49 = vadd.f32 %v3500_v10, %v3496_v46 }
0x1ace   :  { %5065 = vtanh.f32 %v6118_v49 }
0x1ad3   :  { %v5062_v51 = vpop.eup %5061 }
0x1ad4   :  { %v3397_v52 = vmul.f32 %v5062_v51, %v5060_v12  ;;  %v5064_v44 = vpop.eup %5063 }
0x1ad6   :  { %3399 = vrot.lane.b32.xlu0 %v3397_v52, %s5261_s3 }
0x1ad8   :  { %v5066_v17 = vpop.eup %5065 }
0x1ad9   :  { %v3504_v57 = vmul.f32 %v5066_v17, %v5064_v44 }
0x1adb   :  { %3613 = vrot.lane.b32.xlu1 %v3504_v57, %s5261_s3  ;;  %3505 = vst.msk [vmem:[#allocation10 + $0x10] sm:$0xff] %vm813_vm1, %v3504_v57 }
0x1b48   :  { %v3400_v18 = vpop.permute.xlu0 %3399 }
0x1b49   :  { %3402 = vst.msk [vmem:[#allocation10 + $0x68] sm:$0xff] %vm116_vm0, %v3400_v18  ;;  %4043 = vmatmul.mubr.msk.f32.vlgmr.msra.gmra.mrb[28].mxu0 %vm116_vm0, %v3400_v18 }
0x1b4a   :  { %4562 = vmatpush1.bf16.msra.mxu0 %v5426_v62  ;;  %3781 = vmatprep.mubr.f32.mxu0 %v5260_v0 }
0x1b4b   :  { %4564 = vmatprep.subr.bf16.mxu0 %v5432_v3 }
0x1b4d   :  { %v3614_v48 = vpop.permute.xlu1 %3613 }
0x1b4e   :  { %4044 = vmatmul.mubr.msk.f32.vlgmr.msra.gmra.mrb[2].mxu1 %vm116_vm0, %v3614_v48  ;;  %4566 = vmatpush1.bf16.msra.mxu0 %v5444_v14 }
0x1b4f   :  { %4578 = vmatpush1.bf16.msra.mxu1 %v5429_v2  ;;  %4568 = vmatprep.subr.bf16.mxu0 %v5450_v16 }
0x1b50   :  { %4580 = vmatprep.subr.bf16.mxu1 %v5435_v7  ;;  %3888 = vmatprep.mubr.f32.mxu1 %v5260_v0 }
0x1b52   :  { %4570 = vmatpush1.bf16.msra.mxu0 %v5463_v27 }
0x1b53   :  { %4582 = vmatpush1.bf16.msra.mxu1 %v5448_v15  ;;  %4572 = vmatprep.subr.bf16.mxu0 %v5469_v29 }
0x1b54   :  { %4584 = vmatprep.subr.bf16.mxu1 %v5454_v20 }
0x1b56   :  { %4574 = vmatpush1.bf16.msra.mxu0 %v5482_v36 }
0x1b57   :  { %4586 = vmatpush1.bf16.msra.mxu1 %v5467_v28 }
0x1b58   :  { %4588 = vmatprep.subr.bf16.mxu1 %v5473_v32 }
0x1b5b   :  { %4590 = vmatpush1.bf16.msra.mxu1 %v5486_v37 }
0x1c1c   :  { %v3576_v62 = vpop.f32.mrb[28].mxu0 }
0x1c1d   :  { %v4619_v2 = vadd.f32 %v3576_v62, %v5604_v55  ;;  %v3578_v0 = vpop.f32.mrb[29].mxu0 }
0x1c1e   :  { %v4620_v28 = vadd.f32 %v3578_v0, %v5613_v11 }
0x1c1f   :  { %v3583_v3 = vsub.f32 0.0, %v4619_v2 }
0x1c20   :  { %v3590_v26 = vsub.f32 0.0, %v4620_v28 }
0x1c21   :  { %v3584_v7 = vmul.f32 1.442695, %v3583_v3  ;;  %v3683_v14 = vpop.f32.mrb[2].mxu1 }
0x1c22   :  { %v4625_v15 = vadd.f32 %v3683_v14, %v5610_v61  ;;  %v3685_v16 = vpop.f32.mrb[3].mxu1  ;;  %v3591_v30 = vmul.f32 1.442695, %v3590_v26 }
0x1c23   :  { %5067 = vpow2.f32 %v3584_v7  ;;  %v4626_v36 = vadd.f32 %v3685_v16, %v5616_v13 }
0x1c24   :  { %v3690_v20 = vsub.f32 0.0, %v4625_v15 }
0x1c25   :  { %v3697_v31 = vsub.f32 0.0, %v4626_v36 }
0x1c26   :  { %v3691_v27 = vmul.f32 1.442695, %v3690_v20 }
0x1c27   :  { %v3698_v33 = vmul.f32 1.442695, %v3697_v31 }
0x1c28   :  { %5069 = vpow2.f32 %v3691_v27 }
0x1c29   :  { %5071 = vtanh.f32 %v4620_v28 }
0x1c2d   :  { %v5068_v29 = vpop.eup %5067 }
0x1c2e   :  { %v3586_v32 = vadd.f32 1.0, %v5068_v29 }
0x1c30   :  { %5073 = vrcp.f32 %v3586_v32 }
0x1c31   :  { %5075 = vtanh.f32 %v4626_v36 }
0x1c32   :  { %v5070_v37 = vpop.eup %5069 }
0x1c33   :  { %v3693_v59 = vadd.f32 1.0, %v5070_v37  ;;  %v5072_v19 = vpop.eup %5071 }
0x1c35   :  { %5077 = vrcp.f32 %v3693_v59 }
0x1c36   :  { %5079 = vpow2.f32 %v3591_v30 }
0x1c37   :  { %5081 = vpow2.f32 %v3698_v33 }
0x1c3a   :  { %v5074_v21 = vpop.eup %5073 }
0x1c3b   :  { %v3597_v22 = vmul.f32 %v5074_v21, %v5072_v19  ;;  %v5076_v23 = vpop.eup %5075  ;;  %v3596_v35 = vmul.f32 %v5074_v21, %v6114_v8 }
0x1c3d   :  { %3599 = vrot.lane.b32.xlu0 %v3597_v22, %s5261_s3 }
0x1c3f   :  { %v5078_v24 = vpop.eup %5077 }
0x1c40   :  { %v3704_v25 = vmul.f32 %v5078_v24, %v5076_v23  ;;  %v5080_v53 = vpop.eup %5079  ;;  %v3703_v41 = vmul.f32 %v5078_v24, %v6118_v49 }
0x1c41   :  { %v3593_v34 = vadd.f32 1.0, %v5080_v53  ;;  %v5082_v56 = vpop.eup %5081 }
0x1c42   :  { %3706 = vrot.lane.b32.xlu1 %v3704_v25, %s5261_s3  ;;  %v3700_v40 = vadd.f32 1.0, %v5082_v56 }
0x1c43   :  { %5083 = vrcp.f32 %v3593_v34 }
0x1c4d   :  { %v5084_v45 = vpop.eup %5083 }
0x1caf   :  { %v3600_v38 = vpop.permute.xlu0 %3599 }
0x1cb0   :  { %v3602_v39 = vadd.f32 %v3600_v38, %v3596_v35 }
0x1cb2   :  { %5085 = vtanh.f32 %v3602_v39 }
0x1cb3   :  { %5087 = vrcp.f32 %v3700_v40 }
0x1cb4   :  { %v3707_v42 = vpop.permute.xlu1 %3706 }
0x1cb5   :  { %v3709_v43 = vadd.f32 %v3707_v42, %v3703_v41 }
0x1cb7   :  { %5089 = vtanh.f32 %v3709_v43 }
0x1cbc   :  { %v5086_v47 = vpop.eup %5085 }
0x1cbd   :  { %v3604_v50 = vmul.f32 %v5086_v47, %v5084_v45  ;;  %v5088_v54 = vpop.eup %5087 }
0x1cbf   :  { %3606 = vrot.lane.b32.xlu0 %v3604_v50, %s5261_s3 }
0x1cc1   :  { %v5090_v58 = vpop.eup %5089 }
0x1cc2   :  { %v3711_v60 = vmul.f32 %v5090_v58, %v5088_v54 }
0x1cc4   :  { %3820 = vrot.lane.b32.xlu1 %v3711_v60, %s5261_s3  ;;  %3712 = vst.msk [vmem:[#allocation10 + $0x8] sm:$0xff] %vm813_vm1, %v3711_v60 }
0x1d31   :  { %v3607_v63 = vpop.permute.xlu0 %3606 }
0x1d32   :  { %3609 = vst.msk [vmem:[#allocation10 + $0x70] sm:$0xff] %vm116_vm0, %v3607_v63  ;;  %4045 = vmatmul.mubr.msk.f32.vlgmr.msra.gmra.mrb[30].mxu0 %vm116_vm0, %v3607_v63 }
0x1d36   :  { %v3821_v1 = vpop.permute.xlu1 %3820 }
0x1d37   :  { %4046 = vmatmul.mubr.msk.f32.vlgmr.msra.gmra.mrb[0].mxu1 %vm116_vm0, %v3821_v1 }
0x1e05   :  { %v3783_v4 = vpop.f32.mrb[30].mxu0 }
0x1e06   :  { %v4621_v5 = vadd.f32 %v3783_v4, %v5604_v55  ;;  %v3785_v6 = vpop.f32.mrb[31].mxu0 }
0x1e07   :  { %v4622_v52 = vadd.f32 %v3785_v6, %v5613_v11 }
0x1e08   :  { %v3790_v8 = vsub.f32 0.0, %v4621_v5 }
0x1e09   :  { %v3797_v11 = vsub.f32 0.0, %v4622_v52 }
0x1e0a   :  { %v3791_v9 = vmul.f32 1.442695, %v3790_v8  ;;  %v3890_v46 = vpop.f32.mrb[0].mxu1 }
0x1e0b   :  { %v4623_v10 = vadd.f32 %v3890_v46, %v5610_v61  ;;  %v3892_v49 = vpop.f32.mrb[1].mxu1  ;;  %v3798_v7 = vmul.f32 1.442695, %v3797_v11 }
0x1e0c   :  { %5091 = vpow2.f32 %v3791_v9  ;;  %v4624_v57 = vadd.f32 %v3892_v49, %v5616_v13 }
0x1e0d   :  { %v3897_v12 = vsub.f32 0.0, %v4623_v10 }
0x1e0e   :  { %v3904_v14 = vsub.f32 0.0, %v4624_v57 }
0x1e0f   :  { %v3898_v51 = vmul.f32 1.442695, %v3897_v12 }
0x1e10   :  { %v3905_v15 = vmul.f32 1.442695, %v3904_v14 }
0x1e11   :  { %5093 = vpow2.f32 %v3898_v51 }
0x1e12   :  { %5095 = vtanh.f32 %v4622_v52 }
0x1e16   :  { %v5092_v44 = vpop.eup %5091 }
0x1e17   :  { %v3793_v17 = vadd.f32 1.0, %v5092_v44 }
0x1e19   :  { %5097 = vrcp.f32 %v3793_v17 }
0x1e1a   :  { %5099 = vtanh.f32 %v4624_v57 }
0x1e1b   :  { %v5094_v55 = vpop.eup %5093 }
0x1e1c   :  { %v3900_v18 = vadd.f32 1.0, %v5094_v55  ;;  %v5096_v48 = vpop.eup %5095 }
0x1e1e   :  { %5101 = vrcp.f32 %v3900_v18 }
0x1e1f   :  { %5103 = vpow2.f32 %v3798_v7 }
0x1e20   :  { %5105 = vpow2.f32 %v3905_v15 }
0x1e23   :  { %v5098_v62 = vpop.eup %5097 }
0x1e24   :  { %v3804_v61 = vmul.f32 %v5098_v62, %v5096_v48  ;;  %v5100_v2 = vpop.eup %5099  ;;  %v3803_v20 = vmul.f32 %v5098_v62, %v3602_v39 }
0x1e26   :  { %3806 = vrot.lane.b32.xlu0 %v3804_v61, %s5261_s3 }
0x1e28   :  { %v5102_v0 = vpop.eup %5101 }
0x1e29   :  { %v3911_v3 = vmul.f32 %v5102_v0, %v5100_v2  ;;  %v5104_v13 = vpop.eup %5103  ;;  %v3910_v36 = vmul.f32 %v5102_v0, %v3709_v43 }
0x1e2a   :  { %v3800_v16 = vadd.f32 1.0, %v5104_v13  ;;  %v5106_v27 = vpop.eup %5105 }
0x1e2b   :  { %3913 = vrot.lane.b32.xlu1 %v3911_v3, %s5261_s3  ;;  %v3907_v32 = vadd.f32 1.0, %v5106_v27 }
0x1e2c   :  { %5107 = vrcp.f32 %v3800_v16 }
0x1e36   :  { %v5108_v19 = vpop.eup %5107 }
0x1e98   :  { %v3807_v28 = vpop.permute.xlu0 %3806 }
0x1e99   :  { %v3809_v29 = vadd.f32 %v3807_v28, %v3803_v20 }
0x1e9b   :  { %5109 = vtanh.f32 %v3809_v29 }
0x1e9c   :  { %5111 = vrcp.f32 %v3907_v32 }
0x1e9d   :  { %v3914_v37 = vpop.permute.xlu1 %3913 }
0x1e9e   :  { %v3916_v59 = vadd.f32 %v3914_v37, %v3910_v36 }
0x1ea0   :  { %5113 = vtanh.f32 %v3916_v59 }
0x1ea5   :  { %v5110_v21 = vpop.eup %5109 }
0x1ea6   :  { %v3811_v22 = vmul.f32 %v5110_v21, %v5108_v19  ;;  %v5112_v23 = vpop.eup %5111 }
0x1ea8   :  { %3813 = vrot.lane.b32.xlu0 %v3811_v22, %s5261_s3 }
0x1eaa   :  { %v5114_v24 = vpop.eup %5113 }
0x1eab   :  { %v3918_v25 = vmul.f32 %v5114_v24, %v5112_v23 }
0x1eac   :  { %3927 = vrot.lane.b32.xlu0 %v3809_v29, %s5261_s3 }
0x1ead   :  { %3922 = vrot.lane.b32.xlu1 %v3918_v25, %s5261_s3  ;;  %3919 = vst.msk [vmem:[#allocation10] sm:$0xff] %vm813_vm1, %v3918_v25 }
0x1eb1   :  { %3932 = vrot.lane.b32.xlu1 %v3916_v59, %s5261_s3 }
0x1f1a   :  { %v3814_v26 = vpop.permute.xlu0 %3813 }
0x1f1b   :  { %3816 = vst.msk [vmem:[#allocation10 + $0x78] sm:$0xff] %vm116_vm0, %v3814_v26  ;;  %3920 = vst.msk [vmem:[#allocation11] sm:$0xff] %vm116_vm0, %v3814_v26 }
0x1f1c   :  { %5192 = shalt.err (!%p5189_p0)
}
0x1f1d   :  { %s5193_s12 = scalar_lea.hbm %s6225_s7, 2048 }
0x1f1e   :  { %p5194_p1 = scmp.ne.s32.totalorder %s6225_s7, %s5193_s12  ;;  %p5197_p2 = scmp.lt.u32.totalorder %s5193_s12, %s6225_s7 }
0x1f20   :  { %p5199_p3 = pnand %p5197_p2, %p5194_p1 }
0x1f22   :  { %5202 = shalt.err (!%p5199_p3)
}
0x1f23   :  { %s5264_s5 = smov 128   ;;  %s5265_s21 = smov 8   ;;  %v3928_v30 = vpop.permute.xlu0 %3927  ;;  %v3923_v31 = vpop.permute.xlu1 %3922 }
0x1f24   :  { %3947 = dma.vmem_to_hbm [thread:$0]  %s3942_s19, 2048, %s6225_s7, [#allocation6], %s5264_s5, %s5264_s5, %s5265_s21   ;;  %3930 = vst.msk [vmem:[#allocation13] sm:$0xff] %vm116_vm0, %v3928_v30  ;;  %3925 = vst.msk [vmem:[#allocation11 + $0x8] sm:$0xff] %vm116_vm0, %v3923_v31 }
0x1f25   :  { %s5266_s1 = smov [#allocation13]   ;;  %s5203_s13 = scalar_lea.vmem %s3954_s23, 256 }
0x1f26   :  { %s3965_s11 = sshll.u32 %s5266_s1, 4  ;;  %p5204_p4 = scmp.ne.s32.totalorder %s3954_s23, %s5203_s13  ;;  %s3966_s11 = int_to_ptr.vmem [resolvable:$true] %s3965_s11 }
0x1f27   :  { %p5208_p5 = scmp.lt.s32.totalorder %s3954_s23, %s3954_s23  ;;  %p5209_p6 = scmp.lt.s32.totalorder %s5203_s13, %s5203_s13 }
0x1f29   :  { %p5210_p7 = por %p5209_p6, %p5208_p5 }
0x1f2b   :  { %p5211_p8 = pnand %p5210_p7, %p5204_p4 }
0x1f2d   :  { %5214 = shalt.err (!%p5211_p8)
}
0x1f2e   :  { %s5215_s7 = scalar_lea.hbm %s6226_s8, 256 }
0x1f2f   :  { %p5216_p9 = scmp.ne.s32.totalorder %s6226_s8, %s5215_s7  ;;  %p5219_p10 = scmp.lt.u32.totalorder %s5215_s7, %s6226_s8 }
0x1f31   :  { %p5221_p11 = pnand %p5219_p10, %p5216_p9 }
0x1f33   :  { %5224 = shalt.err (!%p5221_p11)
}
0x1f34   :  { %3959 = dma.vmem_to_hbm [thread:$0]  %s3954_s23, 256, %s6226_s8, [#allocation12], %s5264_s5, %s5264_s5, %s5265_s21   ;;  %v3933_v33 = vpop.permute.xlu1 %3932 }
0x1f35   :  { %3935 = vst.msk [vmem:[#allocation13 + $0x8] sm:$0xff] %vm116_vm0, %v3933_v33  ;;  %s5225_s3 = scalar_lea.vmem %s3966_s11, 256  ;;  %p5230_p13 = scmp.lt.s32.totalorder %s3966_s11, %s3966_s11 }
0x1f36   :  { %p5226_p12 = scmp.ne.s32.totalorder %s3966_s11, %s5225_s3  ;;  %p5231_p0 = scmp.lt.s32.totalorder %s5225_s3, %s5225_s3 }
0x1f38   :  { %p5232_p1 = por %p5231_p0, %p5230_p13 }
0x1f3a   :  { %p5233_p2 = pnand %p5232_p1, %p5226_p12 }
0x1f3c   :  { %5236 = shalt.err (!%p5233_p2)
}
0x1f3d   :  { %s5237_s20 = scalar_lea.hbm %s6227_s9, 256 }
0x1f3e   :  { %p5238_p3 = scmp.ne.s32.totalorder %s6227_s9, %s5237_s20  ;;  %p5241_p4 = scmp.lt.u32.totalorder %s5237_s20, %s6227_s9 }
0x1f40   :  { %p5243_p5 = pnand %p5241_p4, %p5238_p3 }
0x1f42   :  { %5246 = shalt.err (!%p5243_p5)
}
0x1f43   :  { %3971 = dma.vmem_to_hbm [thread:$0]  %s3966_s11, 256, %s6227_s9, [#allocation12], %s5264_s5, %s5264_s5, %s5265_s21  }
0x1f44   :  { %5251 = dma.done.wait [#allocation6], 2048  }
0x1f45   :  { %5252 = vsyncadd [#allocation6], 4294965248 }
0x1f46   :  { %5253 = dma.done.wait [#allocation12], 512  }
0x1f47   :  { %5254 = vsyncadd [#allocation12], 4294966784 }
0x1f48   :  { %3981 = vsyncpa [#allocation5], 1 }
0x1f49   :  { %3982 = vsyncpa [#allocation8], 1 }
0x1f4a   :  { %3983 = vsyncpa [#allocation6], 1 }
0x1f4b   :  { %3984 = vsyncpa [#allocation12], 1 }

</bundles_post_ra>
